<compile_context>
chip_gen: v6e
topology: v6e:2x2x1
jax: 0.10.0
libtpu: 0.0.40
codegen_flags: <defaults>
</compile_context>

<pallas_src>
import math
from functools import partial

import jax
import jax.numpy as jnp
from jax.experimental import pallas as pl
from jax.experimental.pallas import tpu as pltpu

BN_EPS = 1e-5
_SQRT_2_OVER_PI = math.sqrt(2.0 / math.pi)


# ----------------------------------------------------------------------------
# helpers
# ----------------------------------------------------------------------------
def _gelu(x):
    # tanh-approximate GELU (EUP transcendental, not a VPU erf polynomial).
    return 0.5 * x * (1.0 + jnp.tanh(_SQRT_2_OVER_PI * (x + 0.044715 * x * x * x)))


def _pick_tile(dim, target, align):
    """Largest multiple of `align` that divides `dim` and is <= target; else the full dim.
    TODO(synk): pad/mask awkward N/K instead of falling back to the full dimension."""
    if dim <= target:
        return dim
    t = (target // align) * align
    while t >= align:
        if dim % t == 0:
            return t
        t -= align
    return dim


def _vmem_capacity_bytes():
    try:
        cap = getattr(pltpu.get_tpu_info(), "vmem_capacity_bytes", None)
        if cap:
            return int(cap)
    except Exception:
        pass
    return 64 << 20  # conservative default (v7x per-core VMEM)


def _vmem_budgets():
    cap = _vmem_capacity_bytes()
    # Never request all of physical VMEM: cap the limit at 3/4 of capacity (<= 96 MiB),
    # and keep ~16 MiB of that as headroom for compiler-internal scratch.
    limit_cap = int(min(cap * 3 // 4, 96 << 20))
    block_budget = max(limit_cap - (16 << 20), 8 << 20)
    return block_budget, limit_cap


def _vmem_limit(footprint, limit_cap):
    return int(min(max(footprint + (16 << 20), 32 << 20), limit_cap))


def _sublane_align(itemsize):
    return {1: 32, 2: 16}.get(itemsize, 8)


# ----------------------------------------------------------------------------
# Kernel 1: matmul + bias (+ optional GELU).  BN affines are pre-folded into w/bias.
#   variant A: full-K in one step (no accumulator scratch, 2-D parallel grid)
#   variant B: K-tiled reduction with an f32 VMEM accumulator (3-D grid, k innermost)
# ----------------------------------------------------------------------------
def _matmul_bias_kernel(x_ref, w_ref, b_ref, o_ref, *, apply_gelu):
    y = jnp.dot(x_ref[...], w_ref[...], preferred_element_type=jnp.float32)
    y = y + b_ref[...].astype(jnp.float32)
    if apply_gelu:
        y = _gelu(y)
    o_ref[...] = y.astype(o_ref.dtype)


def _matmul_bias_acc_kernel(x_ref, w_ref, b_ref, o_ref, acc_ref, *, apply_gelu):
    @pl.when(pl.program_id(2) == 0)
    def _init():
        acc_ref[...] = jnp.zeros_like(acc_ref)

    acc_ref[...] += jnp.dot(x_ref[...], w_ref[...], preferred_element_type=jnp.float32)

    @pl.when(pl.program_id(2) == pl.num_programs(2) - 1)
    def _epilogue():
        y = acc_ref[...] + b_ref[...].astype(jnp.float32)
        if apply_gelu:
            y = _gelu(y)
        o_ref[...] = y.astype(o_ref.dtype)


def _matmul_tiles(M, K, N, itemsize, block_budget):
    """Pick (tm, tk, tn): prefer full-K (drops the reduction axis + accumulator) and the
    widest lane-dense tn that keeps the double-buffered working set inside the budget."""
    am = _sublane_align(itemsize)
    tm = _pick_tile(M, 512 if block_budget >= (48 << 20) else 256, am)

    def footprint(tk, tn):
        f = 2 * itemsize * (tm * tk + tk * tn)   # double-buffered x strip + weight tile
        f += 2 * itemsize * tm * tn              # double-buffered output tile
        f += 2 * 4 * tn                          # bias
        if tk != K:
            f += 4 * tm * tn                     # f32 accumulator scratch
        return f

    tn_cands = sorted({_pick_tile(N, t, 128)
                       for t in (N, 2048, 1536, 1024, 512, 256, 128)}, reverse=True)
    tk_cands = sorted({_pick_tile(K, t, 128)
                       for t in (K, 1024, 512, 256, 128)}, reverse=True)
    for tn in tn_cands:
        for tk in tk_cands:
            if footprint(tk, tn) <= block_budget:
                return tm, tk, tn
    return tm, tk_cands[-1], tn_cands[-1]


def matmul_bias(x, w, bias, apply_gelu=False):
    """y = x @ w + bias, optionally GELU.  (BN scale/shift already folded into w/bias.)"""
    M, K = x.shape
    N = w.shape[1]
    itemsize = x.dtype.itemsize

    # Pad the token axis to the sublane alignment (cheap) so tiles stay well-formed.
    am = _sublane_align(itemsize)
    Mp = -(-M // am) * am
    if Mp != M:
        x = jnp.pad(x, ((0, Mp - M), (0, 0)))

    block_budget, limit_cap = _vmem_budgets()
    tm, tk, tn = _matmul_tiles(Mp, K, N, itemsize, block_budget)

    gi, gj = Mp // tm, N // tn
    # Keep >= 2 parallel tiles so v7x's two TensorCores both get work.
    while gi * gj < 2 and tn > 128 and tn % 256 == 0:
        tn //= 2
        gj = N // tn
    nk = K // tk

    footprint = (2 * itemsize * (tm * tk + tk * tn) + 2 * itemsize * tm * tn
                 + 2 * 4 * tn + (4 * tm * tn if nk > 1 else 0))
    vmem_limit = _vmem_limit(footprint, limit_cap)

    bias2 = bias.reshape(1, N).astype(jnp.float32)
    cost = pl.CostEstimate(
        flops=2 * Mp * K * N,
        transcendentals=(Mp * N) if apply_gelu else 0,
        bytes_accessed=itemsize * (Mp * K + K * N + Mp * N) + 4 * N,
    )

    if nk == 1:
        out = pl.pallas_call(
            partial(_matmul_bias_kernel, apply_gelu=apply_gelu),
            out_shape=jax.ShapeDtypeStruct((Mp, N), x.dtype),
            grid=(gi, gj),
            in_specs=[
                pl.BlockSpec((tm, tk), lambda i, j: (i, 0)),
                pl.BlockSpec((tk, tn), lambda i, j: (0, j)),
                pl.BlockSpec((1, tn), lambda i, j: (0, j)),
            ],
            out_specs=pl.BlockSpec((tm, tn), lambda i, j: (i, j)),
            compiler_params=pltpu.CompilerParams(
                dimension_semantics=("parallel", "parallel"),
                vmem_limit_bytes=vmem_limit,
            ),
            cost_estimate=cost,
        )(x, w, bias2)
    else:
        out = pl.pallas_call(
            partial(_matmul_bias_acc_kernel, apply_gelu=apply_gelu),
            out_shape=jax.ShapeDtypeStruct((Mp, N), x.dtype),
            grid=(gi, gj, nk),
            in_specs=[
                pl.BlockSpec((tm, tk), lambda i, j, k: (i, k)),
                pl.BlockSpec((tk, tn), lambda i, j, k: (k, j)),
                pl.BlockSpec((1, tn), lambda i, j, k: (0, j)),
            ],
            out_specs=pl.BlockSpec((tm, tn), lambda i, j, k: (i, j)),
            scratch_shapes=[pltpu.VMEM((tm, tn), jnp.float32)],
            compiler_params=pltpu.CompilerParams(
                dimension_semantics=("parallel", "parallel", "arbitrary"),
                vmem_limit_bytes=vmem_limit,
            ),
            cost_estimate=cost,
        )(x, w, bias2)

    return out[:M] if Mp != M else out


# ----------------------------------------------------------------------------
# Kernel 2: depthwise 3x3 conv (padding=1, NHWC) + folded-BN bias + GELU.
#   grid = (B, hidden // tc) — channels are independent, so a channel split needs no halo.
#   The padding=1 halo is handled in-kernel: row loop with clamped reads + weight gating for
#   the top/bottom rows, masked pltpu.roll (XLU) for the left/right column taps.
# ----------------------------------------------------------------------------
def _dwconv_kernel(x_ref, w_ref, b_ref, o_ref, *, H, W):
    f32 = jnp.float32
    tc = x_ref.shape[-1]
    w = w_ref[...].astype(f32)                     # (9, tc): taps in row-major [di*3 + dj]
    b = b_ref[...].astype(f32)                     # (1, tc)

    # Column-edge masks, hoisted out of the row loop (rolls are cyclic → zero the wrap col).
    col = jax.lax.broadcasted_iota(jnp.int32, (W, tc), 0)
    first_col = col == 0
    last_col = col == W - 1

    def taps(row, w3):
        # dj=0 -> input col j-1 ; dj=2 -> input col j+1.  Shifts run on the XLU slot.
        left = jnp.where(first_col, 0.0, pltpu.roll(row, 1, 0))
        right = jnp.where(last_col, 0.0, pltpu.roll(row, W - 1, 0))
        return left * w3[0] + row * w3[1] + right * w3[2]

    def row_body(h, carry):
        # Only the 3 contributing input rows are live per iteration (no full-tile load).
        cur = x_ref[0, h].astype(f32)
        prev = x_ref[0, jnp.maximum(h - 1, 0)].astype(f32)
        nxt = x_ref[0, jnp.minimum(h + 1, H - 1)].astype(f32)
        top_valid = (h > 0).astype(f32)            # zero-padding rows via gated weights
        bot_valid = (h < H - 1).astype(f32)

        acc = taps(cur, w[3:6])
        acc = acc + taps(prev, w[0:3] * top_valid)
        acc = acc + taps(nxt, w[6:9] * bot_valid)
        o_ref[0, h] = _gelu(acc + b).astype(o_ref.dtype)
        return carry

    jax.lax.fori_loop(0, H, row_body, 0, unroll=H <= 16)


def dwconv_bn_gelu(x, w9, bias):
    """3x3 depthwise conv, padding=1, NHWC input, folded-BN bias, GELU epilogue."""
    # TODO(synk): add an H-strip grid axis (overlapping halo) for very large images.
    B, H, W, hid = x.shape
    tc = _pick_tile(hid, 128, 128)
    grid = (B, hid // tc)
    itemsize = x.dtype.itemsize

    _, limit_cap = _vmem_budgets()
    footprint = 4 * itemsize * H * W * tc + 2 * 4 * 10 * tc   # in+out double-buffered + w/b
    vmem_limit = _vmem_limit(footprint, limit_cap)

    cost = pl.CostEstimate(
        flops=2 * 9 * B * H * W * hid,
        transcendentals=B * H * W * hid,
        bytes_accessed=2 * itemsize * B * H * W * hid + 4 * 10 * hid,
    )
    return pl.pallas_call(
        partial(_dwconv_kernel, H=H, W=W),
        out_shape=jax.ShapeDtypeStruct((B, H, W, hid), x.dtype),
        grid=grid,
        in_specs=[
            pl.BlockSpec((1, H, W, tc), lambda b, c: (b, 0, 0, c)),
            pl.BlockSpec((9, tc), lambda b, c: (0, c)),
            pl.BlockSpec((1, tc), lambda b, c: (0, c)),
        ],
        out_specs=pl.BlockSpec((1, H, W, tc), lambda b, c: (b, 0, 0, c)),
        compiler_params=pltpu.CompilerParams(
            dimension_semantics=("parallel", "parallel"),
            vmem_limit_bytes=vmem_limit,
        ),
        cost_estimate=cost,
    )(x, w9, bias.reshape(1, hid))


# ----------------------------------------------------------------------------
# Parameter prep: fold eval-mode BatchNorm (running stats) into weights/biases.
# ----------------------------------------------------------------------------
def prepare_mlp_params(p):
    q = dict(in_features=p["in_features"])
    if p["in_features"] == 768:
        q.update(fc1_w=p["fc1_w"], fc1_b=p["fc1_b"], fc2_w=p["fc2_w"], fc2_b=p["fc2_b"])
        return q

    def fold(bn):
        scale = bn["g"] / jnp.sqrt(bn["v"] + BN_EPS)
        shift = bn["b"] - bn["m"] * scale
        return scale, shift

    s1, t1 = fold(p["bn1"])
    s2, t2 = fold(p["bn2"])
    s3, t3 = fold(p["bn3"])
    q["fc1_w"] = p["fc1_w"] * s1[None, :]
    q["fc1_b"] = p["fc1_b"] * s1 + t1
    # depthwise weights stored as (kh*kw, C) with taps row-major; BN2 folded in
    dw9 = jnp.transpose(p["dw_w"], (1, 2, 0)).reshape(9, -1)
    q["dw_w9"] = dw9 * s2[None, :]
    q["dw_b"] = p["dw_b"] * s2 + t2
    q["fc2_w"] = p["fc2_w"] * s3[None, :]
    q["fc2_b"] = p["fc2_b"] * s3 + t3
    return q


# ----------------------------------------------------------------------------
# Mlp forward (glue is reshape-only; all math runs in the Pallas kernels)
# ----------------------------------------------------------------------------
def mlp_forward(x, p):
    B, N, C = x.shape
    if p["in_features"] == 768:
        h = matmul_bias(x.reshape(B * N, C), p["fc1_w"], p["fc1_b"], apply_gelu=True)
        h = matmul_bias(h, p["fc2_w"], p["fc2_b"], apply_gelu=False)
        return h.reshape(B, N, -1)

    s = int(round(math.sqrt(N)))  # TODO(synk): non-square token grids unsupported
    hid = p["fc1_w"].shape[1]
    h = matmul_bias(x.reshape(B * N, C), p["fc1_w"], p["fc1_b"], apply_gelu=True)
    h = dwconv_bn_gelu(h.reshape(B, s, s, hid), p["dw_w9"], p["dw_b"])
    h = matmul_bias(h.reshape(B * N, hid), p["fc2_w"], p["fc2_b"], apply_gelu=False)
    return h.reshape(B, N, -1)


# ----------------------------------------------------------------------------
# Pure-JAX reference (unfolded params, eval-mode BN) for correctness checking
# ----------------------------------------------------------------------------
def mlp_reference(x, p):
    HI = jax.lax.Precision.HIGHEST
    if p["in_features"] == 768:
        h = _gelu(jnp.dot(x, p["fc1_w"], precision=HI) + p["fc1_b"])
        return jnp.dot(h, p["fc2_w"], precision=HI) + p["fc2_b"]

    B, N, C = x.shape
    s = int(round(math.sqrt(N)))

    def bn(y, d):
        return (y - d["m"]) / jnp.sqrt(d["v"] + BN_EPS) * d["g"] + d["b"]

    h = jnp.dot(x.reshape(B * N, C), p["fc1_w"], precision=HI) + p["fc1_b"]
    h = _gelu(bn(h, p["bn1"])).reshape(B, s, s, -1)
    hp = jnp.pad(h, ((0, 0), (1, 1), (1, 1), (0, 0)))
    acc = jnp.zeros_like(h)
    for di in range(3):
        for dj in range(3):
            acc = acc + hp[:, di:di + s, dj:dj + s, :] * p["dw_w"][:, di, dj]
    h = _gelu(bn(acc + p["dw_b"], p["bn2"]))
    h = jnp.dot(h.reshape(B * N, -1), p["fc2_w"], precision=HI) + p["fc2_b"]
    return bn(h, p["bn3"]).reshape(B, N, -1)


# ----------------------------------------------------------------------------
# Deterministic synthetic parameter init (shapes follow the PyTorch __init__)
# ----------------------------------------------------------------------------
def init_mlp_params(key, in_features, hidden_features=None, out_features=None):
    out_features = out_features or in_features
    hidden_features = hidden_features or in_features
    ks = jax.random.split(key, 9)

    def w(k, shape, std=0.02):
        return (std * jax.random.normal(k, shape)).astype(jnp.float32)

    def bn(k, n):  # non-trivial running stats so the BN fold is actually exercised
        kg, kb, km, kv = jax.random.split(k, 4)
        return dict(
            g=(1.0 + 0.1 * jax.random.normal(kg, (n,))).astype(jnp.float32),
            b=(0.1 * jax.random.normal(kb, (n,))).astype(jnp.float32),
            m=(0.1 * jax.random.normal(km, (n,))).astype(jnp.float32),
            v=jnp.abs(1.0 + 0.1 * jax.random.normal(kv, (n,))).astype(jnp.float32),
        )

    p = dict(
        in_features=in_features,
        fc1_w=w(ks[0], (in_features, hidden_features)),           # stored (in, out)
        fc1_b=(0.02 * jax.random.normal(ks[1], (hidden_features,))).astype(jnp.float32),
        fc2_w=w(ks[2], (hidden_features, out_features)),
        fc2_b=(0.02 * jax.random.normal(ks[3], (out_features,))).astype(jnp.float32),
    )
    if in_features == 768:
        return p
    p["dw_w"] = w(ks[4], (hidden_features, 3, 3), std=0.2)        # PyTorch (C,1,3,3) squeezed
    p["dw_b"] = (0.02 * jax.random.normal(ks[5], (hidden_features,))).astype(jnp.float32)
    p["bn1"] = bn(ks[6], hidden_features)
    p["bn2"] = bn(ks[7], hidden_features)
    p["bn3"] = bn(ks[8], out_features)
    return p


if __name__ == "__main__":
    key = jax.random.PRNGKey(0)
    k1, k2, k3, k4 = jax.random.split(key, 4)

    # ---- conv branch (in_features != 768): B=2, 8x8 image -> N=64, C=64, hidden=256 ----
    B, s, C = 2, 8, 64
    N = s * s
    raw_conv = init_mlp_params(k1, C, hidden_features=4 * C)
    params_conv = prepare_mlp_params(raw_conv)
    x = jax.random.normal(k2, (B, N, C), jnp.float32)
    out = jax.jit(lambda a: mlp_forward(a, params_conv))(x)
    jax.block_until_ready(out)
    ref = mlp_reference(x, raw_conv)
    assert out.shape == (B, N, C)
    err = float(jnp.max(jnp.abs(out - ref)))
    assert bool(jnp.allclose(out, ref, rtol=2e-3, atol=2e-3)), f"conv branch max err {err}"

    # ---- linear branch (in_features == 768): B=2, N=16 tokens ----
    raw_lin = init_mlp_params(k3, 768)
    params_lin = prepare_mlp_params(raw_lin)
    x2 = jax.random.normal(k4, (2, 16, 768), jnp.float32)
    out2 = jax.jit(lambda a: mlp_forward(a, params_lin))(x2)
    jax.block_until_ready(out2)
    ref2 = mlp_reference(x2, raw_lin)
    assert out2.shape == (2, 16, 768)
    err2 = float(jnp.max(jnp.abs(out2 - ref2)))
    assert bool(jnp.allclose(out2, ref2, rtol=2e-3, atol=2e-3)), f"linear branch max err {err2}"

    print("KERNEL_OK")
</pallas_src>

<mosaic_0001>
module attributes {stable_mosaic.version = 11 : i64} {
  func.func @_matmul_bias_kernel(%arg0: i32, %arg1: i32, %arg2: memref<128x256xf32, #tpu.memory_space<vmem>>, %arg3: memref<256x64xf32, #tpu.memory_space<vmem>>, %arg4: memref<1x64xf32, #tpu.memory_space<vmem>>, %arg5: memref<128x64xf32, #tpu.memory_space<vmem>>) attributes {dimension_semantics = [#tpu.dimension_semantics<parallel>, #tpu.dimension_semantics<parallel>], iteration_bounds = array<i64: 1, 1>, scalar_prefetch = 0 : i64, scratch_operands = 0 : i64, tpu.core_type = #tpu.core_type<tc>, window_params = [{transform_indices = @transform_0, window_bounds = array<i64: 128, 256>}, {transform_indices = @transform_1, window_bounds = array<i64: 256, 64>}, {transform_indices = @transform_2, window_bounds = array<i64: 1, 64>}, {transform_indices = @transform_3, window_bounds = array<i64: 128, 64>}]} {
    %c0 = arith.constant 0 : index
    %c0_0 = arith.constant 0 : index
    %0 = vector.load %arg2[%c0, %c0_0] : memref<128x256xf32, #tpu.memory_space<vmem>>, vector<128x256xf32>
    %c0_1 = arith.constant 0 : index
    %c0_2 = arith.constant 0 : index
    %1 = vector.load %arg3[%c0_1, %c0_2] : memref<256x64xf32, #tpu.memory_space<vmem>>, vector<256x64xf32>
    %cst = arith.constant dense<0.000000e+00> : vector<128x64xf32>
    %2 = tpu.matmul %0, %1, %cst {dimension_numbers = #tpu.dot_dimension_numbers<[1], [0], [0], [1], [0, 0, 1, 1], [], []>} : vector<128x256xf32>, vector<256x64xf32>, vector<128x64xf32> -> vector<128x64xf32>
    %c0_3 = arith.constant 0 : index
    %c0_4 = arith.constant 0 : index
    %3 = vector.load %arg4[%c0_3, %c0_4] : memref<1x64xf32, #tpu.memory_space<vmem>>, vector<1x64xf32>
    %4 = vector.broadcast %3 : vector<1x64xf32> to vector<128x64xf32>
    %5 = arith.addf %2, %4 : vector<128x64xf32>
    %c0_5 = arith.constant 0 : index
    %c0_6 = arith.constant 0 : index
    %6 = vector.load %arg5[%c0_5, %c0_6] : memref<128x64xf32, #tpu.memory_space<vmem>>, vector<128x64xf32>
    tpu.vector_store %arg5[%c0_5, %c0_6], %5 {strides = array<i32>} : memref<128x64xf32, #tpu.memory_space<vmem>>, vector<128x64xf32>,
    return
  }
  func.func @transform_0(%arg0: i32, %arg1: i32) -> (i32, i32) {
    %c0_i32 = arith.constant 0 : i32
    %c0_i32_0 = arith.constant 0 : i32
    return %arg0, %c0_i32 : i32, i32
  }
  func.func @transform_1(%arg0: i32, %arg1: i32) -> (i32, i32) {
    %c0_i32 = arith.constant 0 : i32
    %c0_i32_0 = arith.constant 0 : i32
    return %c0_i32, %arg1 : i32, i32
  }
  func.func @transform_2(%arg0: i32, %arg1: i32) -> (i32, i32) {
    %c0_i32 = arith.constant 0 : i32
    %c0_i32_0 = arith.constant 0 : i32
    return %c0_i32, %arg1 : i32, i32
  }
  func.func @transform_3(%arg0: i32, %arg1: i32) -> (i32, i32) {
    %c0_i32 = arith.constant 0 : i32
    return %arg0, %arg1 : i32, i32
  }
}

module attributes {stable_mosaic.version = 11 : i64} {
  func.func @_matmul_bias_kernel(%arg0: i32, %arg1: i32, %arg2: memref<128x64xf32, #tpu.memory_space<vmem>>, %arg3: memref<64x128xf32, #tpu.memory_space<vmem>>, %arg4: memref<1x128xf32, #tpu.memory_space<vmem>>, %arg5: memref<128x128xf32, #tpu.memory_space<vmem>>) attributes {dimension_semantics = [#tpu.dimension_semantics<parallel>, #tpu.dimension_semantics<parallel>], iteration_bounds = array<i64: 1, 2>, scalar_prefetch = 0 : i64, scratch_operands = 0 : i64, tpu.core_type = #tpu.core_type<tc>, window_params = [{transform_indices = @transform_0, window_bounds = array<i64: 128, 64>}, {transform_indices = @transform_1, window_bounds = array<i64: 64, 128>}, {transform_indices = @transform_2, window_bounds = array<i64: 1, 128>}, {transform_indices = @transform_3, window_bounds = array<i64: 128, 128>}]} {
    %c0 = arith.constant 0 : index
    %c0_0 = arith.constant 0 : index
    %0 = vector.load %arg2[%c0, %c0_0] : memref<128x64xf32, #tpu.memory_space<vmem>>, vector<128x64xf32>
    %c0_1 = arith.constant 0 : index
    %c0_2 = arith.constant 0 : index
    %1 = vector.load %arg3[%c0_1, %c0_2] : memref<64x128xf32, #tpu.memory_space<vmem>>, vector<64x128xf32>
    %cst = arith.constant dense<0.000000e+00> : vector<128x128xf32>
    %2 = tpu.matmul %0, %1, %cst {dimension_numbers = #tpu.dot_dimension_numbers<[1], [0], [0], [1], [0, 0, 1, 1], [], []>} : vector<128x64xf32>, vector<64x128xf32>, vector<128x128xf32> -> vector<128x128xf32>
    %c0_3 = arith.constant 0 : index
    %c0_4 = arith.constant 0 : index
    %3 = vector.load %arg4[%c0_3, %c0_4] : memref<1x128xf32, #tpu.memory_space<vmem>>, vector<1x128xf32>
    %4 = vector.broadcast %3 : vector<1x128xf32> to vector<128x128xf32>
    %5 = arith.addf %2, %4 : vector<128x128xf32>
    %cst_5 = arith.constant 5.000000e-01 : f32
    %6 = vector.broadcast %cst_5 : f32 to vector<128x128xf32>
    %7 = arith.mulf %6, %5 : vector<128x128xf32>
    %cst_6 = arith.constant 4.471500e-02 : f32
    %8 = vector.broadcast %cst_6 : f32 to vector<128x128xf32>
    %9 = arith.mulf %8, %5 : vector<128x128xf32>
    %10 = arith.mulf %9, %5 : vector<128x128xf32>
    %11 = arith.mulf %10, %5 : vector<128x128xf32>
    %12 = arith.addf %5, %11 : vector<128x128xf32>
    %cst_7 = arith.constant 0.797884583 : f32
    %13 = vector.broadcast %cst_7 : f32 to vector<128x128xf32>
    %14 = arith.mulf %13, %12 : vector<128x128xf32>
    %15 = math.tanh %14 : vector<128x128xf32>
    %cst_8 = arith.constant 1.000000e+00 : f32
    %16 = vector.broadcast %cst_8 : f32 to vector<128x128xf32>
    %17 = arith.addf %16, %15 : vector<128x128xf32>
    %18 = arith.mulf %7, %17 : vector<128x128xf32>
    %c0_9 = arith.constant 0 : index
    %c0_10 = arith.constant 0 : index
    %19 = vector.load %arg5[%c0_9, %c0_10] : memref<128x128xf32, #tpu.memory_space<vmem>>, vector<128x128xf32>
    tpu.vector_store %arg5[%c0_9, %c0_10], %18 {strides = array<i32>} : memref<128x128xf32, #tpu.memory_space<vmem>>, vector<128x128xf32>,
    return
  }
  func.func @transform_0(%arg0: i32, %arg1: i32) -> (i32, i32) {
    %c0_i32 = arith.constant 0 : i32
    %c0_i32_0 = arith.constant 0 : i32
    return %arg0, %c0_i32 : i32, i32
  }
  func.func @transform_1(%arg0: i32, %arg1: i32) -> (i32, i32) {
    %c0_i32 = arith.constant 0 : i32
    %c0_i32_0 = arith.constant 0 : i32
    return %c0_i32, %arg1 : i32, i32
  }
  func.func @transform_2(%arg0: i32, %arg1: i32) -> (i32, i32) {
    %c0_i32 = arith.constant 0 : i32
    %c0_i32_0 = arith.constant 0 : i32
    return %c0_i32, %arg1 : i32, i32
  }
  func.func @transform_3(%arg0: i32, %arg1: i32) -> (i32, i32) {
    %c0_i32 = arith.constant 0 : i32
    return %arg0, %arg1 : i32, i32
  }
}

module attributes {stable_mosaic.version = 11 : i64} {
  func.func @_dwconv_kernel(%arg0: i32, %arg1: i32, %arg2: memref<1x8x8x128xf32, #tpu.memory_space<vmem>>, %arg3: memref<9x128xf32, #tpu.memory_space<vmem>>, %arg4: memref<1x128xf32, #tpu.memory_space<vmem>>, %arg5: memref<1x8x8x128xf32, #tpu.memory_space<vmem>>) attributes {dimension_semantics = [#tpu.dimension_semantics<parallel>, #tpu.dimension_semantics<parallel>], iteration_bounds = array<i64: 2, 2>, scalar_prefetch = 0 : i64, scratch_operands = 0 : i64, tpu.core_type = #tpu.core_type<tc>, window_params = [{transform_indices = @transform_0, window_bounds = array<i64: 1, 8, 8, 128>}, {transform_indices = @transform_1, window_bounds = array<i64: 9, 128>}, {transform_indices = @transform_2, window_bounds = array<i64: 1, 128>}, {transform_indices = @transform_3, window_bounds = array<i64: 1, 8, 8, 128>}]} {
    %c0 = arith.constant 0 : index
    %c0_0 = arith.constant 0 : index
    %0 = vector.load %arg3[%c0, %c0_0] : memref<9x128xf32, #tpu.memory_space<vmem>>, vector<9x128xf32>
    %c0_1 = arith.constant 0 : index
    %c0_2 = arith.constant 0 : index
    %1 = vector.load %arg4[%c0_1, %c0_2] : memref<1x128xf32, #tpu.memory_space<vmem>>, vector<1x128xf32>
    %2 = tpu.iota {dimensions = array<i32: 0>} : vector<8x128xi32>
    %c0_i32 = arith.constant 0 : i32
    %3 = vector.broadcast %c0_i32 : i32 to vector<8x128xi32>
    %4 = arith.cmpi eq, %2, %3 : vector<8x128xi32>
    %c7_i32 = arith.constant 7 : i32
    %5 = vector.broadcast %c7_i32 : i32 to vector<8x128xi32>
    %6 = arith.cmpi eq, %2, %5 : vector<8x128xi32>
    %c0_i32_3 = arith.constant 0 : i32
    %c0_4 = arith.constant 0 : index
    %7 = arith.index_cast %c0_i32_3 : i32 to index
    %c0_5 = arith.constant 0 : index
    %c0_6 = arith.constant 0 : index
    %8 = vector.load %arg2[%c0_4, %7, %c0_5, %c0_6] : memref<1x8x8x128xf32, #tpu.memory_space<vmem>>, vector<1x1x8x128xf32>
    %9 = vector.shape_cast %8 : vector<1x1x8x128xf32> to vector<8x128xf32>
    %c1_i32 = arith.constant 1 : i32
    %10 = arith.subi %c0_i32_3, %c1_i32 : i32
    %c0_i32_7 = arith.constant 0 : i32
    %11 = arith.maxsi %10, %c0_i32_7 : i32
    %c0_8 = arith.constant 0 : index
    %12 = arith.index_cast %11 : i32 to index
    %c0_9 = arith.constant 0 : index
    %c0_10 = arith.constant 0 : index
    %13 = vector.load %arg2[%c0_8, %12, %c0_9, %c0_10] : memref<1x8x8x128xf32, #tpu.memory_space<vmem>>, vector<1x1x8x128xf32>
    %14 = vector.shape_cast %13 : vector<1x1x8x128xf32> to vector<8x128xf32>
    %c1_i32_11 = arith.constant 1 : i32
    %15 = arith.addi %c0_i32_3, %c1_i32_11 : i32
    %c7_i32_12 = arith.constant 7 : i32
    %16 = arith.minsi %15, %c7_i32_12 : i32
    %c0_13 = arith.constant 0 : index
    %17 = arith.index_cast %16 : i32 to index
    %c0_14 = arith.constant 0 : index
    %c0_15 = arith.constant 0 : index
    %18 = vector.load %arg2[%c0_13, %17, %c0_14, %c0_15] : memref<1x8x8x128xf32, #tpu.memory_space<vmem>>, vector<1x1x8x128xf32>
    %19 = vector.shape_cast %18 : vector<1x1x8x128xf32> to vector<8x128xf32>
    %c0_i32_16 = arith.constant 0 : i32
    %20 = arith.cmpi sgt, %c0_i32_3, %c0_i32_16 : i32
    %21 = arith.extui %20 : i1 to i32
    %22 = arith.sitofp %21 : i32 to f32
    %c7_i32_17 = arith.constant 7 : i32
    %23 = arith.cmpi slt, %c0_i32_3, %c7_i32_17 : i32
    %24 = arith.extui %23 : i1 to i32
    %25 = arith.sitofp %24 : i32 to f32
    %26 = vector.extract_strided_slice %0 {offsets = [3, 0], sizes = [3, 128], strides = [1, 1]} : vector<9x128xf32> to vector<3x128xf32>
    %c1_i32_18 = arith.constant 1 : i32
    %27 = tpu.dynamic_rotate %9 by %c1_i32_18 dim 0 : vector<8x128xf32>, i32 -> vector<8x128xf32>
    %cst = arith.constant 0.000000e+00 : f32
    %28 = vector.broadcast %cst : f32 to vector<8x128xf32>
    %29 = arith.select %4, %28, %27 : vector<8x128xi1>, vector<8x128xf32>
    %c7_i32_19 = arith.constant 7 : i32
    %30 = tpu.dynamic_rotate %9 by %c7_i32_19 dim 0 : vector<8x128xf32>, i32 -> vector<8x128xf32>
    %cst_20 = arith.constant 0.000000e+00 : f32
    %31 = vector.broadcast %cst_20 : f32 to vector<8x128xf32>
    %32 = arith.select %6, %31, %30 : vector<8x128xi1>, vector<8x128xf32>
    %33 = vector.extract_strided_slice %26 {offsets = [0, 0], sizes = [1, 128], strides = [1, 1]} : vector<3x128xf32> to vector<1x128xf32>
    %34 = vector.shape_cast %33 : vector<1x128xf32> to vector<128xf32>
    %35 = vector.shape_cast %34 : vector<128xf32> to vector<1x128xf32>
    %36 = vector.broadcast %35 : vector<1x128xf32> to vector<8x128xf32>
    %37 = arith.mulf %29, %36 : vector<8x128xf32>
    %38 = vector.extract_strided_slice %26 {offsets = [1, 0], sizes = [1, 128], strides = [1, 1]} : vector<3x128xf32> to vector<1x128xf32>
    %39 = vector.shape_cast %38 : vector<1x128xf32> to vector<128xf32>
    %40 = vector.shape_cast %39 : vector<128xf32> to vector<1x128xf32>
    %41 = vector.broadcast %40 : vector<1x128xf32> to vector<8x128xf32>
    %42 = arith.mulf %9, %41 : vector<8x128xf32>
    %43 = arith.addf %37, %42 : vector<8x128xf32>
    %44 = vector.extract_strided_slice %26 {offsets = [2, 0], sizes = [1, 128], strides = [1, 1]} : vector<3x128xf32> to vector<1x128xf32>
    %45 = vector.shape_cast %44 : vector<1x128xf32> to vector<128xf32>
    %46 = vector.shape_cast %45 : vector<128xf32> to vector<1x128xf32>
    %47 = vector.broadcast %46 : vector<1x128xf32> to vector<8x128xf32>
    %48 = arith.mulf %32, %47 : vector<8x128xf32>
    %49 = arith.addf %43, %48 : vector<8x128xf32>
    %50 = vector.extract_strided_slice %0 {offsets = [0, 0], sizes = [3, 128], strides = [1, 1]} : vector<9x128xf32> to vector<3x128xf32>
    %51 = vector.broadcast %22 : f32 to vector<3x128xf32>
    %52 = arith.mulf %50, %51 : vector<3x128xf32>
    %c1_i32_21 = arith.constant 1 : i32
    %53 = tpu.dynamic_rotate %14 by %c1_i32_21 dim 0 : vector<8x128xf32>, i32 -> vector<8x128xf32>
    %cst_22 = arith.constant 0.000000e+00 : f32
    %54 = vector.broadcast %cst_22 : f32 to vector<8x128xf32>
    %55 = arith.select %4, %54, %53 : vector<8x128xi1>, vector<8x128xf32>
    %c7_i32_23 = arith.constant 7 : i32
    %56 = tpu.dynamic_rotate %14 by %c7_i32_23 dim 0 : vector<8x128xf32>, i32 -> vector<8x128xf32>
    %cst_24 = arith.constant 0.000000e+00 : f32
    %57 = vector.broadcast %cst_24 : f32 to vector<8x128xf32>
    %58 = arith.select %6, %57, %56 : vector<8x128xi1>, vector<8x128xf32>
    %59 = vector.extract_strided_slice %52 {offsets = [0, 0], sizes = [1, 128], strides = [1, 1]} : vector<3x128xf32> to vector<1x128xf32>
    %60 = vector.shape_cast %59 : vector<1x128xf32> to vector<128xf32>
    %61 = vector.shape_cast %60 : vector<128xf32> to vector<1x128xf32>
    %62 = vector.broadcast %61 : vector<1x128xf32> to vector<8x128xf32>
    %63 = arith.mulf %55, %62 : vector<8x128xf32>
    %64 = vector.extract_strided_slice %52 {offsets = [1, 0], sizes = [1, 128], strides = [1, 1]} : vector<3x128xf32> to vector<1x128xf32>
    %65 = vector.shape_cast %64 : vector<1x128xf32> to vector<128xf32>
    %66 = vector.shape_cast %65 : vector<128xf32> to vector<1x128xf32>
    %67 = vector.broadcast %66 : vector<1x128xf32> to vector<8x128xf32>
    %68 = arith.mulf %14, %67 : vector<8x128xf32>
    %69 = arith.addf %63, %68 : vector<8x128xf32>
    %70 = vector.extract_strided_slice %52 {offsets = [2, 0], sizes = [1, 128], strides = [1, 1]} : vector<3x128xf32> to vector<1x128xf32>
    %71 = vector.shape_cast %70 : vector<1x128xf32> to vector<128xf32>
    %72 = vector.shape_cast %71 : vector<128xf32> to vector<1x128xf32>
    %73 = vector.broadcast %72 : vector<1x128xf32> to vector<8x128xf32>
    %74 = arith.mulf %58, %73 : vector<8x128xf32>
    %75 = arith.addf %69, %74 : vector<8x128xf32>
    %76 = arith.addf %49, %75 : vector<8x128xf32>
    %77 = vector.extract_strided_slice %0 {offsets = [6, 0], sizes = [3, 128], strides = [1, 1]} : vector<9x128xf32> to vector<3x128xf32>
    %78 = vector.broadcast %25 : f32 to vector<3x128xf32>
    %79 = arith.mulf %77, %78 : vector<3x128xf32>
    %c1_i32_25 = arith.constant 1 : i32
    %80 = tpu.dynamic_rotate %19 by %c1_i32_25 dim 0 : vector<8x128xf32>, i32 -> vector<8x128xf32>
    %cst_26 = arith.constant 0.000000e+00 : f32
    %81 = vector.broadcast %cst_26 : f32 to vector<8x128xf32>
    %82 = arith.select %4, %81, %80 : vector<8x128xi1>, vector<8x128xf32>
    %c7_i32_27 = arith.constant 7 : i32
    %83 = tpu.dynamic_rotate %19 by %c7_i32_27 dim 0 : vector<8x128xf32>, i32 -> vector<8x128xf32>
    %cst_28 = arith.constant 0.000000e+00 : f32
    %84 = vector.broadcast %cst_28 : f32 to vector<8x128xf32>
    %85 = arith.select %6, %84, %83 : vector<8x128xi1>, vector<8x128xf32>
    %86 = vector.extract_strided_slice %79 {offsets = [0, 0], sizes = [1, 128], strides = [1, 1]} : vector<3x128xf32> to vector<1x128xf32>
    %87 = vector.shape_cast %86 : vector<1x128xf32> to vector<128xf32>
    %88 = vector.shape_cast %87 : vector<128xf32> to vector<1x128xf32>
    %89 = vector.broadcast %88 : vector<1x128xf32> to vector<8x128xf32>
    %90 = arith.mulf %82, %89 : vector<8x128xf32>
    %91 = vector.extract_strided_slice %79 {offsets = [1, 0], sizes = [1, 128], strides = [1, 1]} : vector<3x128xf32> to vector<1x128xf32>
    %92 = vector.shape_cast %91 : vector<1x128xf32> to vector<128xf32>
    %93 = vector.shape_cast %92 : vector<128xf32> to vector<1x128xf32>
    %94 = vector.broadcast %93 : vector<1x128xf32> to vector<8x128xf32>
    %95 = arith.mulf %19, %94 : vector<8x128xf32>
    %96 = arith.addf %90, %95 : vector<8x128xf32>
    %97 = vector.extract_strided_slice %79 {offsets = [2, 0], sizes = [1, 128], strides = [1, 1]} : vector<3x128xf32> to vector<1x128xf32>
    %98 = vector.shape_cast %97 : vector<1x128xf32> to vector<128xf32>
    %99 = vector.shape_cast %98 : vector<128xf32> to vector<1x128xf32>
    %100 = vector.broadcast %99 : vector<1x128xf32> to vector<8x128xf32>
    %101 = arith.mulf %85, %100 : vector<8x128xf32>
    %102 = arith.addf %96, %101 : vector<8x128xf32>
    %103 = arith.addf %76, %102 : vector<8x128xf32>
    %104 = vector.broadcast %1 : vector<1x128xf32> to vector<8x128xf32>
    %105 = arith.addf %103, %104 : vector<8x128xf32>
    %cst_29 = arith.constant 5.000000e-01 : f32
    %106 = vector.broadcast %cst_29 : f32 to vector<8x128xf32>
    %107 = arith.mulf %106, %105 : vector<8x128xf32>
    %cst_30 = arith.constant 4.471500e-02 : f32
    %108 = vector.broadcast %cst_30 : f32 to vector<8x128xf32>
    %109 = arith.mulf %108, %105 : vector<8x128xf32>
    %110 = arith.mulf %109, %105 : vector<8x128xf32>
    %111 = arith.mulf %110, %105 : vector<8x128xf32>
    %112 = arith.addf %105, %111 : vector<8x128xf32>
    %cst_31 = arith.constant 0.797884583 : f32
    %113 = vector.broadcast %cst_31 : f32 to vector<8x128xf32>
    %114 = arith.mulf %113, %112 : vector<8x128xf32>
    %115 = math.tanh %114 : vector<8x128xf32>
    %cst_32 = arith.constant 1.000000e+00 : f32
    %116 = vector.broadcast %cst_32 : f32 to vector<8x128xf32>
    %117 = arith.addf %116, %115 : vector<8x128xf32>
    %118 = arith.mulf %107, %117 : vector<8x128xf32>
    %c0_33 = arith.constant 0 : index
    %119 = arith.index_cast %c0_i32_3 : i32 to index
    %c0_34 = arith.constant 0 : index
    %c0_35 = arith.constant 0 : index
    %120 = vector.load %arg5[%c0_33, %119, %c0_34, %c0_35] : memref<1x8x8x128xf32, #tpu.memory_space<vmem>>, vector<1x1x8x128xf32>
    %121 = vector.shape_cast %120 : vector<1x1x8x128xf32> to vector<8x128xf32>
    %122 = vector.shape_cast %118 : vector<8x128xf32> to vector<1x1x8x128xf32>
    tpu.vector_store %arg5[%c0_33, %119, %c0_34, %c0_35], %122 {strides = array<i32>} : memref<1x8x8x128xf32, #tpu.memory_space<vmem>>, vector<1x1x8x128xf32>,
    %c1_i32_36 = arith.constant 1 : i32
    %c0_37 = arith.constant 0 : index
    %123 = arith.index_cast %c1_i32_36 : i32 to index
    %c0_38 = arith.constant 0 : index
    %c0_39 = arith.constant 0 : index
    %124 = vector.load %arg2[%c0_37, %123, %c0_38, %c0_39] : memref<1x8x8x128xf32, #tpu.memory_space<vmem>>, vector<1x1x8x128xf32>
    %125 = vector.shape_cast %124 : vector<1x1x8x128xf32> to vector<8x128xf32>
    %c1_i32_40 = arith.constant 1 : i32
    %126 = arith.subi %c1_i32_36, %c1_i32_40 : i32
    %c0_i32_41 = arith.constant 0 : i32
    %127 = arith.maxsi %126, %c0_i32_41 : i32
    %c0_42 = arith.constant 0 : index
    %128 = arith.index_cast %127 : i32 to index
    %c0_43 = arith.constant 0 : index
    %c0_44 = arith.constant 0 : index
    %129 = vector.load %arg2[%c0_42, %128, %c0_43, %c0_44] : memref<1x8x8x128xf32, #tpu.memory_space<vmem>>, vector<1x1x8x128xf32>
    %130 = vector.shape_cast %129 : vector<1x1x8x128xf32> to vector<8x128xf32>
    %c1_i32_45 = arith.constant 1 : i32
    %131 = arith.addi %c1_i32_36, %c1_i32_45 : i32
    %c7_i32_46 = arith.constant 7 : i32
    %132 = arith.minsi %131, %c7_i32_46 : i32
    %c0_47 = arith.constant 0 : index
    %133 = arith.index_cast %132 : i32 to index
    %c0_48 = arith.constant 0 : index
    %c0_49 = arith.constant 0 : index
    %134 = vector.load %arg2[%c0_47, %133, %c0_48, %c0_49] : memref<1x8x8x128xf32, #tpu.memory_space<vmem>>, vector<1x1x8x128xf32>
    %135 = vector.shape_cast %134 : vector<1x1x8x128xf32> to vector<8x128xf32>
    %c0_i32_50 = arith.constant 0 : i32
    %136 = arith.cmpi sgt, %c1_i32_36, %c0_i32_50 : i32
    %137 = arith.extui %136 : i1 to i32
    %138 = arith.sitofp %137 : i32 to f32
    %c7_i32_51 = arith.constant 7 : i32
    %139 = arith.cmpi slt, %c1_i32_36, %c7_i32_51 : i32
    %140 = arith.extui %139 : i1 to i32
    %141 = arith.sitofp %140 : i32 to f32
    %142 = vector.extract_strided_slice %0 {offsets = [3, 0], sizes = [3, 128], strides = [1, 1]} : vector<9x128xf32> to vector<3x128xf32>
    %c1_i32_52 = arith.constant 1 : i32
    %143 = tpu.dynamic_rotate %125 by %c1_i32_52 dim 0 : vector<8x128xf32>, i32 -> vector<8x128xf32>
    %cst_53 = arith.constant 0.000000e+00 : f32
    %144 = vector.broadcast %cst_53 : f32 to vector<8x128xf32>
    %145 = arith.select %4, %144, %143 : vector<8x128xi1>, vector<8x128xf32>
    %c7_i32_54 = arith.constant 7 : i32
    %146 = tpu.dynamic_rotate %125 by %c7_i32_54 dim 0 : vector<8x128xf32>, i32 -> vector<8x128xf32>
    %cst_55 = arith.constant 0.000000e+00 : f32
    %147 = vector.broadcast %cst_55 : f32 to vector<8x128xf32>
    %148 = arith.select %6, %147, %146 : vector<8x128xi1>, vector<8x128xf32>
    %149 = vector.extract_strided_slice %142 {offsets = [0, 0], sizes = [1, 128], strides = [1, 1]} : vector<3x128xf32> to vector<1x128xf32>
    %150 = vector.shape_cast %149 : vector<1x128xf32> to vector<128xf32>
    %151 = vector.shape_cast %150 : vector<128xf32> to vector<1x128xf32>
    %152 = vector.broadcast %151 : vector<1x128xf32> to vector<8x128xf32>
    %153 = arith.mulf %145, %152 : vector<8x128xf32>
    %154 = vector.extract_strided_slice %142 {offsets = [1, 0], sizes = [1, 128], strides = [1, 1]} : vector<3x128xf32> to vector<1x128xf32>
    %155 = vector.shape_cast %154 : vector<1x128xf32> to vector<128xf32>
    %156 = vector.shape_cast %155 : vector<128xf32> to vector<1x128xf32>
    %157 = vector.broadcast %156 : vector<1x128xf32> to vector<8x128xf32>
    %158 = arith.mulf %125, %157 : vector<8x128xf32>
    %159 = arith.addf %153, %158 : vector<8x128xf32>
    %160 = vector.extract_strided_slice %142 {offsets = [2, 0], sizes = [1, 128], strides = [1, 1]} : vector<3x128xf32> to vector<1x128xf32>
    %161 = vector.shape_cast %160 : vector<1x128xf32> to vector<128xf32>
    %162 = vector.shape_cast %161 : vector<128xf32> to vector<1x128xf32>
    %163 = vector.broadcast %162 : vector<1x128xf32> to vector<8x128xf32>
    %164 = arith.mulf %148, %163 : vector<8x128xf32>
    %165 = arith.addf %159, %164 : vector<8x128xf32>
    %166 = vector.extract_strided_slice %0 {offsets = [0, 0], sizes = [3, 128], strides = [1, 1]} : vector<9x128xf32> to vector<3x128xf32>
    %167 = vector.broadcast %138 : f32 to vector<3x128xf32>
    %168 = arith.mulf %166, %167 : vector<3x128xf32>
    %c1_i32_56 = arith.constant 1 : i32
    %169 = tpu.dynamic_rotate %130 by %c1_i32_56 dim 0 : vector<8x128xf32>, i32 -> vector<8x128xf32>
    %cst_57 = arith.constant 0.000000e+00 : f32
    %170 = vector.broadcast %cst_57 : f32 to vector<8x128xf32>
    %171 = arith.select %4, %170, %169 : vector<8x128xi1>, vector<8x128xf32>
    %c7_i32_58 = arith.constant 7 : i32
    %172 = tpu.dynamic_rotate %130 by %c7_i32_58 dim 0 : vector<8x128xf32>, i32 -> vector<8x128xf32>
    %cst_59 = arith.constant 0.000000e+00 : f32
    %173 = vector.broadcast %cst_59 : f32 to vector<8x128xf32>
    %174 = arith.select %6, %173, %172 : vector<8x128xi1>, vector<8x128xf32>
    %175 = vector.extract_strided_slice %168 {offsets = [0, 0], sizes = [1, 128], strides = [1, 1]} : vector<3x128xf32> to vector<1x128xf32>
    %176 = vector.shape_cast %175 : vector<1x128xf32> to vector<128xf32>
    %177 = vector.shape_cast %176 : vector<128xf32> to vector<1x128xf32>
    %178 = vector.broadcast %177 : vector<1x128xf32> to vector<8x128xf32>
    %179 = arith.mulf %171, %178 : vector<8x128xf32>
    %180 = vector.extract_strided_slice %168 {offsets = [1, 0], sizes = [1, 128], strides = [1, 1]} : vector<3x128xf32> to vector<1x128xf32>
    %181 = vector.shape_cast %180 : vector<1x128xf32> to vector<128xf32>
    %182 = vector.shape_cast %181 : vector<128xf32> to vector<1x128xf32>
    %183 = vector.broadcast %182 : vector<1x128xf32> to vector<8x128xf32>
    %184 = arith.mulf %130, %183 : vector<8x128xf32>
    %185 = arith.addf %179, %184 : vector<8x128xf32>
    %186 = vector.extract_strided_slice %168 {offsets = [2, 0], sizes = [1, 128], strides = [1, 1]} : vector<3x128xf32> to vector<1x128xf32>
    %187 = vector.shape_cast %186 : vector<1x128xf32> to vector<128xf32>
    %188 = vector.shape_cast %187 : vector<128xf32> to vector<1x128xf32>
    %189 = vector.broadcast %188 : vector<1x128xf32> to vector<8x128xf32>
    %190 = arith.mulf %174, %189 : vector<8x128xf32>
    %191 = arith.addf %185, %190 : vector<8x128xf32>
    %192 = arith.addf %165, %191 : vector<8x128xf32>
    %193 = vector.extract_strided_slice %0 {offsets = [6, 0], sizes = [3, 128], strides = [1, 1]} : vector<9x128xf32> to vector<3x128xf32>
    %194 = vector.broadcast %141 : f32 to vector<3x128xf32>
    %195 = arith.mulf %193, %194 : vector<3x128xf32>
    %c1_i32_60 = arith.constant 1 : i32
    %196 = tpu.dynamic_rotate %135 by %c1_i32_60 dim 0 : vector<8x128xf32>, i32 -> vector<8x128xf32>
    %cst_61 = arith.constant 0.000000e+00 : f32
    %197 = vector.broadcast %cst_61 : f32 to vector<8x128xf32>
    %198 = arith.select %4, %197, %196 : vector<8x128xi1>, vector<8x128xf32>
    %c7_i32_62 = arith.constant 7 : i32
    %199 = tpu.dynamic_rotate %135 by %c7_i32_62 dim 0 : vector<8x128xf32>, i32 -> vector<8x128xf32>
    %cst_63 = arith.constant 0.000000e+00 : f32
    %200 = vector.broadcast %cst_63 : f32 to vector<8x128xf32>
    %201 = arith.select %6, %200, %199 : vector<8x128xi1>, vector<8x128xf32>
    %202 = vector.extract_strided_slice %195 {offsets = [0, 0], sizes = [1, 128], strides = [1, 1]} : vector<3x128xf32> to vector<1x128xf32>
    %203 = vector.shape_cast %202 : vector<1x128xf32> to vector<128xf32>
    %204 = vector.shape_cast %203 : vector<128xf32> to vector<1x128xf32>
    %205 = vector.broadcast %204 : vector<1x128xf32> to vector<8x128xf32>
    %206 = arith.mulf %198, %205 : vector<8x128xf32>
    %207 = vector.extract_strided_slice %195 {offsets = [1, 0], sizes = [1, 128], strides = [1, 1]} : vector<3x128xf32> to vector<1x128xf32>
    %208 = vector.shape_cast %207 : vector<1x128xf32> to vector<128xf32>
    %209 = vector.shape_cast %208 : vector<128xf32> to vector<1x128xf32>
    %210 = vector.broadcast %209 : vector<1x128xf32> to vector<8x128xf32>
    %211 = arith.mulf %135, %210 : vector<8x128xf32>
    %212 = arith.addf %206, %211 : vector<8x128xf32>
    %213 = vector.extract_strided_slice %195 {offsets = [2, 0], sizes = [1, 128], strides = [1, 1]} : vector<3x128xf32> to vector<1x128xf32>
    %214 = vector.shape_cast %213 : vector<1x128xf32> to vector<128xf32>
    %215 = vector.shape_cast %214 : vector<128xf32> to vector<1x128xf32>
    %216 = vector.broadcast %215 : vector<1x128xf32> to vector<8x128xf32>
    %217 = arith.mulf %201, %216 : vector<8x128xf32>
    %218 = arith.addf %212, %217 : vector<8x128xf32>
    %219 = arith.addf %192, %218 : vector<8x128xf32>
    %220 = vector.broadcast %1 : vector<1x128xf32> to vector<8x128xf32>
    %221 = arith.addf %219, %220 : vector<8x128xf32>
    %cst_64 = arith.constant 5.000000e-01 : f32
    %222 = vector.broadcast %cst_64 : f32 to vector<8x128xf32>
    %223 = arith.mulf %222, %221 : vector<8x128xf32>
    %cst_65 = arith.constant 4.471500e-02 : f32
    %224 = vector.broadcast %cst_65 : f32 to vector<8x128xf32>
    %225 = arith.mulf %224, %221 : vector<8x128xf32>
    %226 = arith.mulf %225, %221 : vector<8x128xf32>
    %227 = arith.mulf %226, %221 : vector<8x128xf32>
    %228 = arith.addf %221, %227 : vector<8x128xf32>
    %cst_66 = arith.constant 0.797884583 : f32
    %229 = vector.broadcast %cst_66 : f32 to vector<8x128xf32>
    %230 = arith.mulf %229, %228 : vector<8x128xf32>
    %231 = math.tanh %230 : vector<8x128xf32>
    %cst_67 = arith.constant 1.000000e+00 : f32
    %232 = vector.broadcast %cst_67 : f32 to vector<8x128xf32>
    %233 = arith.addf %232, %231 : vector<8x128xf32>
    %234 = arith.mulf %223, %233 : vector<8x128xf32>
    %c0_68 = arith.constant 0 : index
    %235 = arith.index_cast %c1_i32_36 : i32 to index
    %c0_69 = arith.constant 0 : index
    %c0_70 = arith.constant 0 : index
    %236 = vector.load %arg5[%c0_68, %235, %c0_69, %c0_70] : memref<1x8x8x128xf32, #tpu.memory_space<vmem>>, vector<1x1x8x128xf32>
    %237 = vector.shape_cast %236 : vector<1x1x8x128xf32> to vector<8x128xf32>
    %238 = vector.shape_cast %234 : vector<8x128xf32> to vector<1x1x8x128xf32>
    tpu.vector_store %arg5[%c0_68, %235, %c0_69, %c0_70], %238 {strides = array<i32>} : memref<1x8x8x128xf32, #tpu.memory_space<vmem>>, vector<1x1x8x128xf32>,
    %c2_i32 = arith.constant 2 : i32
    %c0_71 = arith.constant 0 : index
    %239 = arith.index_cast %c2_i32 : i32 to index
    %c0_72 = arith.constant 0 : index
    %c0_73 = arith.constant 0 : index
    %240 = vector.load %arg2[%c0_71, %239, %c0_72, %c0_73] : memref<1x8x8x128xf32, #tpu.memory_space<vmem>>, vector<1x1x8x128xf32>
    %241 = vector.shape_cast %240 : vector<1x1x8x128xf32> to vector<8x128xf32>
    %c1_i32_74 = arith.constant 1 : i32
    %242 = arith.subi %c2_i32, %c1_i32_74 : i32
    %c0_i32_75 = arith.constant 0 : i32
    %243 = arith.maxsi %242, %c0_i32_75 : i32
    %c0_76 = arith.constant 0 : index
    %244 = arith.index_cast %243 : i32 to index
    %c0_77 = arith.constant 0 : index
    %c0_78 = arith.constant 0 : index
    %245 = vector.load %arg2[%c0_76, %244, %c0_77, %c0_78] : memref<1x8x8x128xf32, #tpu.memory_space<vmem>>, vector<1x1x8x128xf32>
    %246 = vector.shape_cast %245 : vector<1x1x8x128xf32> to vector<8x128xf32>
    %c1_i32_79 = arith.constant 1 : i32
    %247 = arith.addi %c2_i32, %c1_i32_79 : i32
    %c7_i32_80 = arith.constant 7 : i32
    %248 = arith.minsi %247, %c7_i32_80 : i32
    %c0_81 = arith.constant 0 : index
    %249 = arith.index_cast %248 : i32 to index
    %c0_82 = arith.constant 0 : index
    %c0_83 = arith.constant 0 : index
    %250 = vector.load %arg2[%c0_81, %249, %c0_82, %c0_83] : memref<1x8x8x128xf32, #tpu.memory_space<vmem>>, vector<1x1x8x128xf32>
    %251 = vector.shape_cast %250 : vector<1x1x8x128xf32> to vector<8x128xf32>
    %c0_i32_84 = arith.constant 0 : i32
    %252 = arith.cmpi sgt, %c2_i32, %c0_i32_84 : i32
    %253 = arith.extui %252 : i1 to i32
    %254 = arith.sitofp %253 : i32 to f32
    %c7_i32_85 = arith.constant 7 : i32
    %255 = arith.cmpi slt, %c2_i32, %c7_i32_85 : i32
    %256 = arith.extui %255 : i1 to i32
    %257 = arith.sitofp %256 : i32 to f32
    %258 = vector.extract_strided_slice %0 {offsets = [3, 0], sizes = [3, 128], strides = [1, 1]} : vector<9x128xf32> to vector<3x128xf32>
    %c1_i32_86 = arith.constant 1 : i32
    %259 = tpu.dynamic_rotate %241 by %c1_i32_86 dim 0 : vector<8x128xf32>, i32 -> vector<8x128xf32>
    %cst_87 = arith.constant 0.000000e+00 : f32
    %260 = vector.broadcast %cst_87 : f32 to vector<8x128xf32>
    %261 = arith.select %4, %260, %259 : vector<8x128xi1>, vector<8x128xf32>
    %c7_i32_88 = arith.constant 7 : i32
    %262 = tpu.dynamic_rotate %241 by %c7_i32_88 dim 0 : vector<8x128xf32>, i32 -> vector<8x128xf32>
    %cst_89 = arith.constant 0.000000e+00 : f32
    %263 = vector.broadcast %cst_89 : f32 to vector<8x128xf32>
    %264 = arith.select %6, %263, %262 : vector<8x128xi1>, vector<8x128xf32>
    %265 = vector.extract_strided_slice %258 {offsets = [0, 0], sizes = [1, 128], strides = [1, 1]} : vector<3x128xf32> to vector<1x128xf32>
    %266 = vector.shape_cast %265 : vector<1x128xf32> to vector<128xf32>
    %267 = vector.shape_cast %266 : vector<128xf32> to vector<1x128xf32>
    %268 = vector.broadcast %267 : vector<1x128xf32> to vector<8x128xf32>
    %269 = arith.mulf %261, %268 : vector<8x128xf32>
    %270 = vector.extract_strided_slice %258 {offsets = [1, 0], sizes = [1, 128], strides = [1, 1]} : vector<3x128xf32> to vector<1x128xf32>
    %271 = vector.shape_cast %270 : vector<1x128xf32> to vector<128xf32>
    %272 = vector.shape_cast %271 : vector<128xf32> to vector<1x128xf32>
    %273 = vector.broadcast %272 : vector<1x128xf32> to vector<8x128xf32>
    %274 = arith.mulf %241, %273 : vector<8x128xf32>
    %275 = arith.addf %269, %274 : vector<8x128xf32>
    %276 = vector.extract_strided_slice %258 {offsets = [2, 0], sizes = [1, 128], strides = [1, 1]} : vector<3x128xf32> to vector<1x128xf32>
    %277 = vector.shape_cast %276 : vector<1x128xf32> to vector<128xf32>
    %278 = vector.shape_cast %277 : vector<128xf32> to vector<1x128xf32>
    %279 = vector.broadcast %278 : vector<1x128xf32> to vector<8x128xf32>
    %280 = arith.mulf %264, %279 : vector<8x128xf32>
    %281 = arith.addf %275, %280 : vector<8x128xf32>
    %282 = vector.extract_strided_slice %0 {offsets = [0, 0], sizes = [3, 128], strides = [1, 1]} : vector<9x128xf32> to vector<3x128xf32>
    %283 = vector.broadcast %254 : f32 to vector<3x128xf32>
    %284 = arith.mulf %282, %283 : vector<3x128xf32>
    %c1_i32_90 = arith.constant 1 : i32
    %285 = tpu.dynamic_rotate %246 by %c1_i32_90 dim 0 : vector<8x128xf32>, i32 -> vector<8x128xf32>
    %cst_91 = arith.constant 0.000000e+00 : f32
    %286 = vector.broadcast %cst_91 : f32 to vector<8x128xf32>
    %287 = arith.select %4, %286, %285 : vector<8x128xi1>, vector<8x128xf32>
    %c7_i32_92 = arith.constant 7 : i32
    %288 = tpu.dynamic_rotate %246 by %c7_i32_92 dim 0 : vector<8x128xf32>, i32 -> vector<8x128xf32>
    %cst_93 = arith.constant 0.000000e+00 : f32
    %289 = vector.broadcast %cst_93 : f32 to vector<8x128xf32>
    %290 = arith.select %6, %289, %288 : vector<8x128xi1>, vector<8x128xf32>
    %291 = vector.extract_strided_slice %284 {offsets = [0, 0], sizes = [1, 128], strides = [1, 1]} : vector<3x128xf32> to vector<1x128xf32>
    %292 = vector.shape_cast %291 : vector<1x128xf32> to vector<128xf32>
    %293 = vector.shape_cast %292 : vector<128xf32> to vector<1x128xf32>
    %294 = vector.broadcast %293 : vector<1x128xf32> to vector<8x128xf32>
    %295 = arith.mulf %287, %294 : vector<8x128xf32>
    %296 = vector.extract_strided_slice %284 {offsets = [1, 0], sizes = [1, 128], strides = [1, 1]} : vector<3x128xf32> to vector<1x128xf32>
    %297 = vector.shape_cast %296 : vector<1x128xf32> to vector<128xf32>
    %298 = vector.shape_cast %297 : vector<128xf32> to vector<1x128xf32>
    %299 = vector.broadcast %298 : vector<1x128xf32> to vector<8x128xf32>
    %300 = arith.mulf %246, %299 : vector<8x128xf32>
    %301 = arith.addf %295, %300 : vector<8x128xf32>
    %302 = vector.extract_strided_slice %284 {offsets = [2, 0], sizes = [1, 128], strides = [1, 1]} : vector<3x128xf32> to vector<1x128xf32>
    %303 = vector.shape_cast %302 : vector<1x128xf32> to vector<128xf32>
    %304 = vector.shape_cast %303 : vector<128xf32> to vector<1x128xf32>
    %305 = vector.broadcast %304 : vector<1x128xf32> to vector<8x128xf32>
    %306 = arith.mulf %290, %305 : vector<8x128xf32>
    %307 = arith.addf %301, %306 : vector<8x128xf32>
    %308 = arith.addf %281, %307 : vector<8x128xf32>
    %309 = vector.extract_strided_slice %0 {offsets = [6, 0], sizes = [3, 128], strides = [1, 1]} : vector<9x128xf32> to vector<3x128xf32>
    %310 = vector.broadcast %257 : f32 to vector<3x128xf32>
    %311 = arith.mulf %309, %310 : vector<3x128xf32>
    %c1_i32_94 = arith.constant 1 : i32
    %312 = tpu.dynamic_rotate %251 by %c1_i32_94 dim 0 : vector<8x128xf32>, i32 -> vector<8x128xf32>
    %cst_95 = arith.constant 0.000000e+00 : f32
    %313 = vector.broadcast %cst_95 : f32 to vector<8x128xf32>
    %314 = arith.select %4, %313, %312 : vector<8x128xi1>, vector<8x128xf32>
    %c7_i32_96 = arith.constant 7 : i32
    %315 = tpu.dynamic_rotate %251 by %c7_i32_96 dim 0 : vector<8x128xf32>, i32 -> vector<8x128xf32>
    %cst_97 = arith.constant 0.000000e+00 : f32
    %316 = vector.broadcast %cst_97 : f32 to vector<8x128xf32>
    %317 = arith.select %6, %316, %315 : vector<8x128xi1>, vector<8x128xf32>
    %318 = vector.extract_strided_slice %311 {offsets = [0, 0], sizes = [1, 128], strides = [1, 1]} : vector<3x128xf32> to vector<1x128xf32>
    %319 = vector.shape_cast %318 : vector<1x128xf32> to vector<128xf32>
    %320 = vector.shape_cast %319 : vector<128xf32> to vector<1x128xf32>
    %321 = vector.broadcast %320 : vector<1x128xf32> to vector<8x128xf32>
    %322 = arith.mulf %314, %321 : vector<8x128xf32>
    %323 = vector.extract_strided_slice %311 {offsets = [1, 0], sizes = [1, 128], strides = [1, 1]} : vector<3x128xf32> to vector<1x128xf32>
    %324 = vector.shape_cast %323 : vector<1x128xf32> to vector<128xf32>
    %325 = vector.shape_cast %324 : vector<128xf32> to vector<1x128xf32>
    %326 = vector.broadcast %325 : vector<1x128xf32> to vector<8x128xf32>
    %327 = arith.mulf %251, %326 : vector<8x128xf32>
    %328 = arith.addf %322, %327 : vector<8x128xf32>
    %329 = vector.extract_strided_slice %311 {offsets = [2, 0], sizes = [1, 128], strides = [1, 1]} : vector<3x128xf32> to vector<1x128xf32>
    %330 = vector.shape_cast %329 : vector<1x128xf32> to vector<128xf32>
    %331 = vector.shape_cast %330 : vector<128xf32> to vector<1x128xf32>
    %332 = vector.broadcast %331 : vector<1x128xf32> to vector<8x128xf32>
    %333 = arith.mulf %317, %332 : vector<8x128xf32>
    %334 = arith.addf %328, %333 : vector<8x128xf32>
    %335 = arith.addf %308, %334 : vector<8x128xf32>
    %336 = vector.broadcast %1 : vector<1x128xf32> to vector<8x128xf32>
    %337 = arith.addf %335, %336 : vector<8x128xf32>
    %cst_98 = arith.constant 5.000000e-01 : f32
    %338 = vector.broadcast %cst_98 : f32 to vector<8x128xf32>
    %339 = arith.mulf %338, %337 : vector<8x128xf32>
    %cst_99 = arith.constant 4.471500e-02 : f32
    %340 = vector.broadcast %cst_99 : f32 to vector<8x128xf32>
    %341 = arith.mulf %340, %337 : vector<8x128xf32>
    %342 = arith.mulf %341, %337 : vector<8x128xf32>
    %343 = arith.mulf %342, %337 : vector<8x128xf32>
    %344 = arith.addf %337, %343 : vector<8x128xf32>
    %cst_100 = arith.constant 0.797884583 : f32
    %345 = vector.broadcast %cst_100 : f32 to vector<8x128xf32>
    %346 = arith.mulf %345, %344 : vector<8x128xf32>
    %347 = math.tanh %346 : vector<8x128xf32>
    %cst_101 = arith.constant 1.000000e+00 : f32
    %348 = vector.broadcast %cst_101 : f32 to vector<8x128xf32>
    %349 = arith.addf %348, %347 : vector<8x128xf32>
    %350 = arith.mulf %339, %349 : vector<8x128xf32>
    %c0_102 = arith.constant 0 : index
    %351 = arith.index_cast %c2_i32 : i32 to index
    %c0_103 = arith.constant 0 : index
    %c0_104 = arith.constant 0 : index
    %352 = vector.load %arg5[%c0_102, %351, %c0_103, %c0_104] : memref<1x8x8x128xf32, #tpu.memory_space<vmem>>, vector<1x1x8x128xf32>
    %353 = vector.shape_cast %352 : vector<1x1x8x128xf32> to vector<8x128xf32>
    %354 = vector.shape_cast %350 : vector<8x128xf32> to vector<1x1x8x128xf32>
    tpu.vector_store %arg5[%c0_102, %351, %c0_103, %c0_104], %354 {strides = array<i32>} : memref<1x8x8x128xf32, #tpu.memory_space<vmem>>, vector<1x1x8x128xf32>,
    %c3_i32 = arith.constant 3 : i32
    %c0_105 = arith.constant 0 : index
    %355 = arith.index_cast %c3_i32 : i32 to index
    %c0_106 = arith.constant 0 : index
    %c0_107 = arith.constant 0 : index
    %356 = vector.load %arg2[%c0_105, %355, %c0_106, %c0_107] : memref<1x8x8x128xf32, #tpu.memory_space<vmem>>, vector<1x1x8x128xf32>
    %357 = vector.shape_cast %356 : vector<1x1x8x128xf32> to vector<8x128xf32>
    %c1_i32_108 = arith.constant 1 : i32
    %358 = arith.subi %c3_i32, %c1_i32_108 : i32
    %c0_i32_109 = arith.constant 0 : i32
    %359 = arith.maxsi %358, %c0_i32_109 : i32
    %c0_110 = arith.constant 0 : index
    %360 = arith.index_cast %359 : i32 to index
    %c0_111 = arith.constant 0 : index
    %c0_112 = arith.constant 0 : index
    %361 = vector.load %arg2[%c0_110, %360, %c0_111, %c0_112] : memref<1x8x8x128xf32, #tpu.memory_space<vmem>>, vector<1x1x8x128xf32>
    %362 = vector.shape_cast %361 : vector<1x1x8x128xf32> to vector<8x128xf32>
    %c1_i32_113 = arith.constant 1 : i32
    %363 = arith.addi %c3_i32, %c1_i32_113 : i32
    %c7_i32_114 = arith.constant 7 : i32
    %364 = arith.minsi %363, %c7_i32_114 : i32
    %c0_115 = arith.constant 0 : index
    %365 = arith.index_cast %364 : i32 to index
    %c0_116 = arith.constant 0 : index
    %c0_117 = arith.constant 0 : index
    %366 = vector.load %arg2[%c0_115, %365, %c0_116, %c0_117] : memref<1x8x8x128xf32, #tpu.memory_space<vmem>>, vector<1x1x8x128xf32>
    %367 = vector.shape_cast %366 : vector<1x1x8x128xf32> to vector<8x128xf32>
    %c0_i32_118 = arith.constant 0 : i32
    %368 = arith.cmpi sgt, %c3_i32, %c0_i32_118 : i32
    %369 = arith.extui %368 : i1 to i32
    %370 = arith.sitofp %369 : i32 to f32
    %c7_i32_119 = arith.constant 7 : i32
    %371 = arith.cmpi slt, %c3_i32, %c7_i32_119 : i32
    %372 = arith.extui %371 : i1 to i32
    %373 = arith.sitofp %372 : i32 to f32
    %374 = vector.extract_strided_slice %0 {offsets = [3, 0], sizes = [3, 128], strides = [1, 1]} : vector<9x128xf32> to vector<3x128xf32>
    %c1_i32_120 = arith.constant 1 : i32
    %375 = tpu.dynamic_rotate %357 by %c1_i32_120 dim 0 : vector<8x128xf32>, i32 -> vector<8x128xf32>
    %cst_121 = arith.constant 0.000000e+00 : f32
    %376 = vector.broadcast %cst_121 : f32 to vector<8x128xf32>
    %377 = arith.select %4, %376, %375 : vector<8x128xi1>, vector<8x128xf32>
    %c7_i32_122 = arith.constant 7 : i32
    %378 = tpu.dynamic_rotate %357 by %c7_i32_122 dim 0 : vector<8x128xf32>, i32 -> vector<8x128xf32>
    %cst_123 = arith.constant 0.000000e+00 : f32
    %379 = vector.broadcast %cst_123 : f32 to vector<8x128xf32>
    %380 = arith.select %6, %379, %378 : vector<8x128xi1>, vector<8x128xf32>
    %381 = vector.extract_strided_slice %374 {offsets = [0, 0], sizes = [1, 128], strides = [1, 1]} : vector<3x128xf32> to vector<1x128xf32>
    %382 = vector.shape_cast %381 : vector<1x128xf32> to vector<128xf32>
    %383 = vector.shape_cast %382 : vector<128xf32> to vector<1x128xf32>
    %384 = vector.broadcast %383 : vector<1x128xf32> to vector<8x128xf32>
    %385 = arith.mulf %377, %384 : vector<8x128xf32>
    %386 = vector.extract_strided_slice %374 {offsets = [1, 0], sizes = [1, 128], strides = [1, 1]} : vector<3x128xf32> to vector<1x128xf32>
    %387 = vector.shape_cast %386 : vector<1x128xf32> to vector<128xf32>
    %388 = vector.shape_cast %387 : vector<128xf32> to vector<1x128xf32>
    %389 = vector.broadcast %388 : vector<1x128xf32> to vector<8x128xf32>
    %390 = arith.mulf %357, %389 : vector<8x128xf32>
    %391 = arith.addf %385, %390 : vector<8x128xf32>
    %392 = vector.extract_strided_slice %374 {offsets = [2, 0], sizes = [1, 128], strides = [1, 1]} : vector<3x128xf32> to vector<1x128xf32>
    %393 = vector.shape_cast %392 : vector<1x128xf32> to vector<128xf32>
    %394 = vector.shape_cast %393 : vector<128xf32> to vector<1x128xf32>
    %395 = vector.broadcast %394 : vector<1x128xf32> to vector<8x128xf32>
    %396 = arith.mulf %380, %395 : vector<8x128xf32>
    %397 = arith.addf %391, %396 : vector<8x128xf32>
    %398 = vector.extract_strided_slice %0 {offsets = [0, 0], sizes = [3, 128], strides = [1, 1]} : vector<9x128xf32> to vector<3x128xf32>
    %399 = vector.broadcast %370 : f32 to vector<3x128xf32>
    %400 = arith.mulf %398, %399 : vector<3x128xf32>
    %c1_i32_124 = arith.constant 1 : i32
    %401 = tpu.dynamic_rotate %362 by %c1_i32_124 dim 0 : vector<8x128xf32>, i32 -> vector<8x128xf32>
    %cst_125 = arith.constant 0.000000e+00 : f32
    %402 = vector.broadcast %cst_125 : f32 to vector<8x128xf32>
    %403 = arith.select %4, %402, %401 : vector<8x128xi1>, vector<8x128xf32>
    %c7_i32_126 = arith.constant 7 : i32
    %404 = tpu.dynamic_rotate %362 by %c7_i32_126 dim 0 : vector<8x128xf32>, i32 -> vector<8x128xf32>
    %cst_127 = arith.constant 0.000000e+00 : f32
    %405 = vector.broadcast %cst_127 : f32 to vector<8x128xf32>
    %406 = arith.select %6, %405, %404 : vector<8x128xi1>, vector<8x128xf32>
    %407 = vector.extract_strided_slice %400 {offsets = [0, 0], sizes = [1, 128], strides = [1, 1]} : vector<3x128xf32> to vector<1x128xf32>
    %408 = vector.shape_cast %407 : vector<1x128xf32> to vector<128xf32>
    %409 = vector.shape_cast %408 : vector<128xf32> to vector<1x128xf32>
    %410 = vector.broadcast %409 : vector<1x128xf32> to vector<8x128xf32>
    %411 = arith.mulf %403, %410 : vector<8x128xf32>
    %412 = vector.extract_strided_slice %400 {offsets = [1, 0], sizes = [1, 128], strides = [1, 1]} : vector<3x128xf32> to vector<1x128xf32>
    %413 = vector.shape_cast %412 : vector<1x128xf32> to vector<128xf32>
    %414 = vector.shape_cast %413 : vector<128xf32> to vector<1x128xf32>
    %415 = vector.broadcast %414 : vector<1x128xf32> to vector<8x128xf32>
    %416 = arith.mulf %362, %415 : vector<8x128xf32>
    %417 = arith.addf %411, %416 : vector<8x128xf32>
    %418 = vector.extract_strided_slice %400 {offsets = [2, 0], sizes = [1, 128], strides = [1, 1]} : vector<3x128xf32> to vector<1x128xf32>
    %419 = vector.shape_cast %418 : vector<1x128xf32> to vector<128xf32>
    %420 = vector.shape_cast %419 : vector<128xf32> to vector<1x128xf32>
    %421 = vector.broadcast %420 : vector<1x128xf32> to vector<8x128xf32>
    %422 = arith.mulf %406, %421 : vector<8x128xf32>
    %423 = arith.addf %417, %422 : vector<8x128xf32>
    %424 = arith.addf %397, %423 : vector<8x128xf32>
    %425 = vector.extract_strided_slice %0 {offsets = [6, 0], sizes = [3, 128], strides = [1, 1]} : vector<9x128xf32> to vector<3x128xf32>
    %426 = vector.broadcast %373 : f32 to vector<3x128xf32>
    %427 = arith.mulf %425, %426 : vector<3x128xf32>
    %c1_i32_128 = arith.constant 1 : i32
    %428 = tpu.dynamic_rotate %367 by %c1_i32_128 dim 0 : vector<8x128xf32>, i32 -> vector<8x128xf32>
    %cst_129 = arith.constant 0.000000e+00 : f32
    %429 = vector.broadcast %cst_129 : f32 to vector<8x128xf32>
    %430 = arith.select %4, %429, %428 : vector<8x128xi1>, vector<8x128xf32>
    %c7_i32_130 = arith.constant 7 : i32
    %431 = tpu.dynamic_rotate %367 by %c7_i32_130 dim 0 : vector<8x128xf32>, i32 -> vector<8x128xf32>
    %cst_131 = arith.constant 0.000000e+00 : f32
    %432 = vector.broadcast %cst_131 : f32 to vector<8x128xf32>
    %433 = arith.select %6, %432, %431 : vector<8x128xi1>, vector<8x128xf32>
    %434 = vector.extract_strided_slice %427 {offsets = [0, 0], sizes = [1, 128], strides = [1, 1]} : vector<3x128xf32> to vector<1x128xf32>
    %435 = vector.shape_cast %434 : vector<1x128xf32> to vector<128xf32>
    %436 = vector.shape_cast %435 : vector<128xf32> to vector<1x128xf32>
    %437 = vector.broadcast %436 : vector<1x128xf32> to vector<8x128xf32>
    %438 = arith.mulf %430, %437 : vector<8x128xf32>
    %439 = vector.extract_strided_slice %427 {offsets = [1, 0], sizes = [1, 128], strides = [1, 1]} : vector<3x128xf32> to vector<1x128xf32>
    %440 = vector.shape_cast %439 : vector<1x128xf32> to vector<128xf32>
    %441 = vector.shape_cast %440 : vector<128xf32> to vector<1x128xf32>
    %442 = vector.broadcast %441 : vector<1x128xf32> to vector<8x128xf32>
    %443 = arith.mulf %367, %442 : vector<8x128xf32>
    %444 = arith.addf %438, %443 : vector<8x128xf32>
    %445 = vector.extract_strided_slice %427 {offsets = [2, 0], sizes = [1, 128], strides = [1, 1]} : vector<3x128xf32> to vector<1x128xf32>
    %446 = vector.shape_cast %445 : vector<1x128xf32> to vector<128xf32>
    %447 = vector.shape_cast %446 : vector<128xf32> to vector<1x128xf32>
    %448 = vector.broadcast %447 : vector<1x128xf32> to vector<8x128xf32>
    %449 = arith.mulf %433, %448 : vector<8x128xf32>
    %450 = arith.addf %444, %449 : vector<8x128xf32>
    %451 = arith.addf %424, %450 : vector<8x128xf32>
    %452 = vector.broadcast %1 : vector<1x128xf32> to vector<8x128xf32>
    %453 = arith.addf %451, %452 : vector<8x128xf32>
    %cst_132 = arith.constant 5.000000e-01 : f32
    %454 = vector.broadcast %cst_132 : f32 to vector<8x128xf32>
    %455 = arith.mulf %454, %453 : vector<8x128xf32>
    %cst_133 = arith.constant 4.471500e-02 : f32
    %456 = vector.broadcast %cst_133 : f32 to vector<8x128xf32>
    %457 = arith.mulf %456, %453 : vector<8x128xf32>
    %458 = arith.mulf %457, %453 : vector<8x128xf32>
    %459 = arith.mulf %458, %453 : vector<8x128xf32>
    %460 = arith.addf %453, %459 : vector<8x128xf32>
    %cst_134 = arith.constant 0.797884583 : f32
    %461 = vector.broadcast %cst_134 : f32 to vector<8x128xf32>
    %462 = arith.mulf %461, %460 : vector<8x128xf32>
    %463 = math.tanh %462 : vector<8x128xf32>
    %cst_135 = arith.constant 1.000000e+00 : f32
    %464 = vector.broadcast %cst_135 : f32 to vector<8x128xf32>
    %465 = arith.addf %464, %463 : vector<8x128xf32>
    %466 = arith.mulf %455, %465 : vector<8x128xf32>
    %c0_136 = arith.constant 0 : index
    %467 = arith.index_cast %c3_i32 : i32 to index
    %c0_137 = arith.constant 0 : index
    %c0_138 = arith.constant 0 : index
    %468 = vector.load %arg5[%c0_136, %467, %c0_137, %c0_138] : memref<1x8x8x128xf32, #tpu.memory_space<vmem>>, vector<1x1x8x128xf32>
    %469 = vector.shape_cast %468 : vector<1x1x8x128xf32> to vector<8x128xf32>
    %470 = vector.shape_cast %466 : vector<8x128xf32> to vector<1x1x8x128xf32>
    tpu.vector_store %arg5[%c0_136, %467, %c0_137, %c0_138], %470 {strides = array<i32>} : memref<1x8x8x128xf32, #tpu.memory_space<vmem>>, vector<1x1x8x128xf32>,
    %c4_i32 = arith.constant 4 : i32
    %c0_139 = arith.constant 0 : index
    %471 = arith.index_cast %c4_i32 : i32 to index
    %c0_140 = arith.constant 0 : index
    %c0_141 = arith.constant 0 : index
    %472 = vector.load %arg2[%c0_139, %471, %c0_140, %c0_141] : memref<1x8x8x128xf32, #tpu.memory_space<vmem>>, vector<1x1x8x128xf32>
    %473 = vector.shape_cast %472 : vector<1x1x8x128xf32> to vector<8x128xf32>
    %c1_i32_142 = arith.constant 1 : i32
    %474 = arith.subi %c4_i32, %c1_i32_142 : i32
    %c0_i32_143 = arith.constant 0 : i32
    %475 = arith.maxsi %474, %c0_i32_143 : i32
    %c0_144 = arith.constant 0 : index
    %476 = arith.index_cast %475 : i32 to index
    %c0_145 = arith.constant 0 : index
    %c0_146 = arith.constant 0 : index
    %477 = vector.load %arg2[%c0_144, %476, %c0_145, %c0_146] : memref<1x8x8x128xf32, #tpu.memory_space<vmem>>, vector<1x1x8x128xf32>
    %478 = vector.shape_cast %477 : vector<1x1x8x128xf32> to vector<8x128xf32>
    %c1_i32_147 = arith.constant 1 : i32
    %479 = arith.addi %c4_i32, %c1_i32_147 : i32
    %c7_i32_148 = arith.constant 7 : i32
    %480 = arith.minsi %479, %c7_i32_148 : i32
    %c0_149 = arith.constant 0 : index
    %481 = arith.index_cast %480 : i32 to index
    %c0_150 = arith.constant 0 : index
    %c0_151 = arith.constant 0 : index
    %482 = vector.load %arg2[%c0_149, %481, %c0_150, %c0_151] : memref<1x8x8x128xf32, #tpu.memory_space<vmem>>, vector<1x1x8x128xf32>
    %483 = vector.shape_cast %482 : vector<1x1x8x128xf32> to vector<8x128xf32>
    %c0_i32_152 = arith.constant 0 : i32
    %484 = arith.cmpi sgt, %c4_i32, %c0_i32_152 : i32
    %485 = arith.extui %484 : i1 to i32
    %486 = arith.sitofp %485 : i32 to f32
    %c7_i32_153 = arith.constant 7 : i32
    %487 = arith.cmpi slt, %c4_i32, %c7_i32_153 : i32
    %488 = arith.extui %487 : i1 to i32
    %489 = arith.sitofp %488 : i32 to f32
    %490 = vector.extract_strided_slice %0 {offsets = [3, 0], sizes = [3, 128], strides = [1, 1]} : vector<9x128xf32> to vector<3x128xf32>
    %c1_i32_154 = arith.constant 1 : i32
    %491 = tpu.dynamic_rotate %473 by %c1_i32_154 dim 0 : vector<8x128xf32>, i32 -> vector<8x128xf32>
    %cst_155 = arith.constant 0.000000e+00 : f32
    %492 = vector.broadcast %cst_155 : f32 to vector<8x128xf32>
    %493 = arith.select %4, %492, %491 : vector<8x128xi1>, vector<8x128xf32>
    %c7_i32_156 = arith.constant 7 : i32
    %494 = tpu.dynamic_rotate %473 by %c7_i32_156 dim 0 : vector<8x128xf32>, i32 -> vector<8x128xf32>
    %cst_157 = arith.constant 0.000000e+00 : f32
    %495 = vector.broadcast %cst_157 : f32 to vector<8x128xf32>
    %496 = arith.select %6, %495, %494 : vector<8x128xi1>, vector<8x128xf32>
    %497 = vector.extract_strided_slice %490 {offsets = [0, 0], sizes = [1, 128], strides = [1, 1]} : vector<3x128xf32> to vector<1x128xf32>
    %498 = vector.shape_cast %497 : vector<1x128xf32> to vector<128xf32>
    %499 = vector.shape_cast %498 : vector<128xf32> to vector<1x128xf32>
    %500 = vector.broadcast %499 : vector<1x128xf32> to vector<8x128xf32>
    %501 = arith.mulf %493, %500 : vector<8x128xf32>
    %502 = vector.extract_strided_slice %490 {offsets = [1, 0], sizes = [1, 128], strides = [1, 1]} : vector<3x128xf32> to vector<1x128xf32>
    %503 = vector.shape_cast %502 : vector<1x128xf32> to vector<128xf32>
    %504 = vector.shape_cast %503 : vector<128xf32> to vector<1x128xf32>
    %505 = vector.broadcast %504 : vector<1x128xf32> to vector<8x128xf32>
    %506 = arith.mulf %473, %505 : vector<8x128xf32>
    %507 = arith.addf %501, %506 : vector<8x128xf32>
    %508 = vector.extract_strided_slice %490 {offsets = [2, 0], sizes = [1, 128], strides = [1, 1]} : vector<3x128xf32> to vector<1x128xf32>
    %509 = vector.shape_cast %508 : vector<1x128xf32> to vector<128xf32>
    %510 = vector.shape_cast %509 : vector<128xf32> to vector<1x128xf32>
    %511 = vector.broadcast %510 : vector<1x128xf32> to vector<8x128xf32>
    %512 = arith.mulf %496, %511 : vector<8x128xf32>
    %513 = arith.addf %507, %512 : vector<8x128xf32>
    %514 = vector.extract_strided_slice %0 {offsets = [0, 0], sizes = [3, 128], strides = [1, 1]} : vector<9x128xf32> to vector<3x128xf32>
    %515 = vector.broadcast %486 : f32 to vector<3x128xf32>
    %516 = arith.mulf %514, %515 : vector<3x128xf32>
    %c1_i32_158 = arith.constant 1 : i32
    %517 = tpu.dynamic_rotate %478 by %c1_i32_158 dim 0 : vector<8x128xf32>, i32 -> vector<8x128xf32>
    %cst_159 = arith.constant 0.000000e+00 : f32
    %518 = vector.broadcast %cst_159 : f32 to vector<8x128xf32>
    %519 = arith.select %4, %518, %517 : vector<8x128xi1>, vector<8x128xf32>
    %c7_i32_160 = arith.constant 7 : i32
    %520 = tpu.dynamic_rotate %478 by %c7_i32_160 dim 0 : vector<8x128xf32>, i32 -> vector<8x128xf32>
    %cst_161 = arith.constant 0.000000e+00 : f32
    %521 = vector.broadcast %cst_161 : f32 to vector<8x128xf32>
    %522 = arith.select %6, %521, %520 : vector<8x128xi1>, vector<8x128xf32>
    %523 = vector.extract_strided_slice %516 {offsets = [0, 0], sizes = [1, 128], strides = [1, 1]} : vector<3x128xf32> to vector<1x128xf32>
    %524 = vector.shape_cast %523 : vector<1x128xf32> to vector<128xf32>
    %525 = vector.shape_cast %524 : vector<128xf32> to vector<1x128xf32>
    %526 = vector.broadcast %525 : vector<1x128xf32> to vector<8x128xf32>
    %527 = arith.mulf %519, %526 : vector<8x128xf32>
    %528 = vector.extract_strided_slice %516 {offsets = [1, 0], sizes = [1, 128], strides = [1, 1]} : vector<3x128xf32> to vector<1x128xf32>
    %529 = vector.shape_cast %528 : vector<1x128xf32> to vector<128xf32>
    %530 = vector.shape_cast %529 : vector<128xf32> to vector<1x128xf32>
    %531 = vector.broadcast %530 : vector<1x128xf32> to vector<8x128xf32>
    %532 = arith.mulf %478, %531 : vector<8x128xf32>
    %533 = arith.addf %527, %532 : vector<8x128xf32>
    %534 = vector.extract_strided_slice %516 {offsets = [2, 0], sizes = [1, 128], strides = [1, 1]} : vector<3x128xf32> to vector<1x128xf32>
    %535 = vector.shape_cast %534 : vector<1x128xf32> to vector<128xf32>
    %536 = vector.shape_cast %535 : vector<128xf32> to vector<1x128xf32>
    %537 = vector.broadcast %536 : vector<1x128xf32> to vector<8x128xf32>
    %538 = arith.mulf %522, %537 : vector<8x128xf32>
    %539 = arith.addf %533, %538 : vector<8x128xf32>
    %540 = arith.addf %513, %539 : vector<8x128xf32>
    %541 = vector.extract_strided_slice %0 {offsets = [6, 0], sizes = [3, 128], strides = [1, 1]} : vector<9x128xf32> to vector<3x128xf32>
    %542 = vector.broadcast %489 : f32 to vector<3x128xf32>
    %543 = arith.mulf %541, %542 : vector<3x128xf32>
    %c1_i32_162 = arith.constant 1 : i32
    %544 = tpu.dynamic_rotate %483 by %c1_i32_162 dim 0 : vector<8x128xf32>, i32 -> vector<8x128xf32>
    %cst_163 = arith.constant 0.000000e+00 : f32
    %545 = vector.broadcast %cst_163 : f32 to vector<8x128xf32>
    %546 = arith.select %4, %545, %544 : vector<8x128xi1>, vector<8x128xf32>
    %c7_i32_164 = arith.constant 7 : i32
    %547 = tpu.dynamic_rotate %483 by %c7_i32_164 dim 0 : vector<8x128xf32>, i32 -> vector<8x128xf32>
    %cst_165 = arith.constant 0.000000e+00 : f32
    %548 = vector.broadcast %cst_165 : f32 to vector<8x128xf32>
    %549 = arith.select %6, %548, %547 : vector<8x128xi1>, vector<8x128xf32>
    %550 = vector.extract_strided_slice %543 {offsets = [0, 0], sizes = [1, 128], strides = [1, 1]} : vector<3x128xf32> to vector<1x128xf32>
    %551 = vector.shape_cast %550 : vector<1x128xf32> to vector<128xf32>
    %552 = vector.shape_cast %551 : vector<128xf32> to vector<1x128xf32>
    %553 = vector.broadcast %552 : vector<1x128xf32> to vector<8x128xf32>
    %554 = arith.mulf %546, %553 : vector<8x128xf32>
    %555 = vector.extract_strided_slice %543 {offsets = [1, 0], sizes = [1, 128], strides = [1, 1]} : vector<3x128xf32> to vector<1x128xf32>
    %556 = vector.shape_cast %555 : vector<1x128xf32> to vector<128xf32>
    %557 = vector.shape_cast %556 : vector<128xf32> to vector<1x128xf32>
    %558 = vector.broadcast %557 : vector<1x128xf32> to vector<8x128xf32>
    %559 = arith.mulf %483, %558 : vector<8x128xf32>
    %560 = arith.addf %554, %559 : vector<8x128xf32>
    %561 = vector.extract_strided_slice %543 {offsets = [2, 0], sizes = [1, 128], strides = [1, 1]} : vector<3x128xf32> to vector<1x128xf32>
    %562 = vector.shape_cast %561 : vector<1x128xf32> to vector<128xf32>
    %563 = vector.shape_cast %562 : vector<128xf32> to vector<1x128xf32>
    %564 = vector.broadcast %563 : vector<1x128xf32> to vector<8x128xf32>
    %565 = arith.mulf %549, %564 : vector<8x128xf32>
    %566 = arith.addf %560, %565 : vector<8x128xf32>
    %567 = arith.addf %540, %566 : vector<8x128xf32>
    %568 = vector.broadcast %1 : vector<1x128xf32> to vector<8x128xf32>
    %569 = arith.addf %567, %568 : vector<8x128xf32>
    %cst_166 = arith.constant 5.000000e-01 : f32
    %570 = vector.broadcast %cst_166 : f32 to vector<8x128xf32>
    %571 = arith.mulf %570, %569 : vector<8x128xf32>
    %cst_167 = arith.constant 4.471500e-02 : f32
    %572 = vector.broadcast %cst_167 : f32 to vector<8x128xf32>
    %573 = arith.mulf %572, %569 : vector<8x128xf32>
    %574 = arith.mulf %573, %569 : vector<8x128xf32>
    %575 = arith.mulf %574, %569 : vector<8x128xf32>
    %576 = arith.addf %569, %575 : vector<8x128xf32>
    %cst_168 = arith.constant 0.797884583 : f32
    %577 = vector.broadcast %cst_168 : f32 to vector<8x128xf32>
    %578 = arith.mulf %577, %576 : vector<8x128xf32>
    %579 = math.tanh %578 : vector<8x128xf32>
    %cst_169 = arith.constant 1.000000e+00 : f32
    %580 = vector.broadcast %cst_169 : f32 to vector<8x128xf32>
    %581 = arith.addf %580, %579 : vector<8x128xf32>
    %582 = arith.mulf %571, %581 : vector<8x128xf32>
    %c0_170 = arith.constant 0 : index
    %583 = arith.index_cast %c4_i32 : i32 to index
    %c0_171 = arith.constant 0 : index
    %c0_172 = arith.constant 0 : index
    %584 = vector.load %arg5[%c0_170, %583, %c0_171, %c0_172] : memref<1x8x8x128xf32, #tpu.memory_space<vmem>>, vector<1x1x8x128xf32>
    %585 = vector.shape_cast %584 : vector<1x1x8x128xf32> to vector<8x128xf32>
    %586 = vector.shape_cast %582 : vector<8x128xf32> to vector<1x1x8x128xf32>
    tpu.vector_store %arg5[%c0_170, %583, %c0_171, %c0_172], %586 {strides = array<i32>} : memref<1x8x8x128xf32, #tpu.memory_space<vmem>>, vector<1x1x8x128xf32>,
    %c5_i32 = arith.constant 5 : i32
    %c0_173 = arith.constant 0 : index
    %587 = arith.index_cast %c5_i32 : i32 to index
    %c0_174 = arith.constant 0 : index
    %c0_175 = arith.constant 0 : index
    %588 = vector.load %arg2[%c0_173, %587, %c0_174, %c0_175] : memref<1x8x8x128xf32, #tpu.memory_space<vmem>>, vector<1x1x8x128xf32>
    %589 = vector.shape_cast %588 : vector<1x1x8x128xf32> to vector<8x128xf32>
    %c1_i32_176 = arith.constant 1 : i32
    %590 = arith.subi %c5_i32, %c1_i32_176 : i32
    %c0_i32_177 = arith.constant 0 : i32
    %591 = arith.maxsi %590, %c0_i32_177 : i32
    %c0_178 = arith.constant 0 : index
    %592 = arith.index_cast %591 : i32 to index
    %c0_179 = arith.constant 0 : index
    %c0_180 = arith.constant 0 : index
    %593 = vector.load %arg2[%c0_178, %592, %c0_179, %c0_180] : memref<1x8x8x128xf32, #tpu.memory_space<vmem>>, vector<1x1x8x128xf32>
    %594 = vector.shape_cast %593 : vector<1x1x8x128xf32> to vector<8x128xf32>
    %c1_i32_181 = arith.constant 1 : i32
    %595 = arith.addi %c5_i32, %c1_i32_181 : i32
    %c7_i32_182 = arith.constant 7 : i32
    %596 = arith.minsi %595, %c7_i32_182 : i32
    %c0_183 = arith.constant 0 : index
    %597 = arith.index_cast %596 : i32 to index
    %c0_184 = arith.constant 0 : index
    %c0_185 = arith.constant 0 : index
    %598 = vector.load %arg2[%c0_183, %597, %c0_184, %c0_185] : memref<1x8x8x128xf32, #tpu.memory_space<vmem>>, vector<1x1x8x128xf32>
    %599 = vector.shape_cast %598 : vector<1x1x8x128xf32> to vector<8x128xf32>
    %c0_i32_186 = arith.constant 0 : i32
    %600 = arith.cmpi sgt, %c5_i32, %c0_i32_186 : i32
    %601 = arith.extui %600 : i1 to i32
    %602 = arith.sitofp %601 : i32 to f32
    %c7_i32_187 = arith.constant 7 : i32
    %603 = arith.cmpi slt, %c5_i32, %c7_i32_187 : i32
    %604 = arith.extui %603 : i1 to i32
    %605 = arith.sitofp %604 : i32 to f32
    %606 = vector.extract_strided_slice %0 {offsets = [3, 0], sizes = [3, 128], strides = [1, 1]} : vector<9x128xf32> to vector<3x128xf32>
    %c1_i32_188 = arith.constant 1 : i32
    %607 = tpu.dynamic_rotate %589 by %c1_i32_188 dim 0 : vector<8x128xf32>, i32 -> vector<8x128xf32>
    %cst_189 = arith.constant 0.000000e+00 : f32
    %608 = vector.broadcast %cst_189 : f32 to vector<8x128xf32>
    %609 = arith.select %4, %608, %607 : vector<8x128xi1>, vector<8x128xf32>
    %c7_i32_190 = arith.constant 7 : i32
    %610 = tpu.dynamic_rotate %589 by %c7_i32_190 dim 0 : vector<8x128xf32>, i32 -> vector<8x128xf32>
    %cst_191 = arith.constant 0.000000e+00 : f32
    %611 = vector.broadcast %cst_191 : f32 to vector<8x128xf32>
    %612 = arith.select %6, %611, %610 : vector<8x128xi1>, vector<8x128xf32>
    %613 = vector.extract_strided_slice %606 {offsets = [0, 0], sizes = [1, 128], strides = [1, 1]} : vector<3x128xf32> to vector<1x128xf32>
    %614 = vector.shape_cast %613 : vector<1x128xf32> to vector<128xf32>
    %615 = vector.shape_cast %614 : vector<128xf32> to vector<1x128xf32>
    %616 = vector.broadcast %615 : vector<1x128xf32> to vector<8x128xf32>
    %617 = arith.mulf %609, %616 : vector<8x128xf32>
    %618 = vector.extract_strided_slice %606 {offsets = [1, 0], sizes = [1, 128], strides = [1, 1]} : vector<3x128xf32> to vector<1x128xf32>
    %619 = vector.shape_cast %618 : vector<1x128xf32> to vector<128xf32>
    %620 = vector.shape_cast %619 : vector<128xf32> to vector<1x128xf32>
    %621 = vector.broadcast %620 : vector<1x128xf32> to vector<8x128xf32>
    %622 = arith.mulf %589, %621 : vector<8x128xf32>
    %623 = arith.addf %617, %622 : vector<8x128xf32>
    %624 = vector.extract_strided_slice %606 {offsets = [2, 0], sizes = [1, 128], strides = [1, 1]} : vector<3x128xf32> to vector<1x128xf32>
    %625 = vector.shape_cast %624 : vector<1x128xf32> to vector<128xf32>
    %626 = vector.shape_cast %625 : vector<128xf32> to vector<1x128xf32>
    %627 = vector.broadcast %626 : vector<1x128xf32> to vector<8x128xf32>
    %628 = arith.mulf %612, %627 : vector<8x128xf32>
    %629 = arith.addf %623, %628 : vector<8x128xf32>
    %630 = vector.extract_strided_slice %0 {offsets = [0, 0], sizes = [3, 128], strides = [1, 1]} : vector<9x128xf32> to vector<3x128xf32>
    %631 = vector.broadcast %602 : f32 to vector<3x128xf32>
    %632 = arith.mulf %630, %631 : vector<3x128xf32>
    %c1_i32_192 = arith.constant 1 : i32
    %633 = tpu.dynamic_rotate %594 by %c1_i32_192 dim 0 : vector<8x128xf32>, i32 -> vector<8x128xf32>
    %cst_193 = arith.constant 0.000000e+00 : f32
    %634 = vector.broadcast %cst_193 : f32 to vector<8x128xf32>
    %635 = arith.select %4, %634, %633 : vector<8x128xi1>, vector<8x128xf32>
    %c7_i32_194 = arith.constant 7 : i32
    %636 = tpu.dynamic_rotate %594 by %c7_i32_194 dim 0 : vector<8x128xf32>, i32 -> vector<8x128xf32>
    %cst_195 = arith.constant 0.000000e+00 : f32
    %637 = vector.broadcast %cst_195 : f32 to vector<8x128xf32>
    %638 = arith.select %6, %637, %636 : vector<8x128xi1>, vector<8x128xf32>
    %639 = vector.extract_strided_slice %632 {offsets = [0, 0], sizes = [1, 128], strides = [1, 1]} : vector<3x128xf32> to vector<1x128xf32>
    %640 = vector.shape_cast %639 : vector<1x128xf32> to vector<128xf32>
    %641 = vector.shape_cast %640 : vector<128xf32> to vector<1x128xf32>
    %642 = vector.broadcast %641 : vector<1x128xf32> to vector<8x128xf32>
    %643 = arith.mulf %635, %642 : vector<8x128xf32>
    %644 = vector.extract_strided_slice %632 {offsets = [1, 0], sizes = [1, 128], strides = [1, 1]} : vector<3x128xf32> to vector<1x128xf32>
    %645 = vector.shape_cast %644 : vector<1x128xf32> to vector<128xf32>
    %646 = vector.shape_cast %645 : vector<128xf32> to vector<1x128xf32>
    %647 = vector.broadcast %646 : vector<1x128xf32> to vector<8x128xf32>
    %648 = arith.mulf %594, %647 : vector<8x128xf32>
    %649 = arith.addf %643, %648 : vector<8x128xf32>
    %650 = vector.extract_strided_slice %632 {offsets = [2, 0], sizes = [1, 128], strides = [1, 1]} : vector<3x128xf32> to vector<1x128xf32>
    %651 = vector.shape_cast %650 : vector<1x128xf32> to vector<128xf32>
    %652 = vector.shape_cast %651 : vector<128xf32> to vector<1x128xf32>
    %653 = vector.broadcast %652 : vector<1x128xf32> to vector<8x128xf32>
    %654 = arith.mulf %638, %653 : vector<8x128xf32>
    %655 = arith.addf %649, %654 : vector<8x128xf32>
    %656 = arith.addf %629, %655 : vector<8x128xf32>
    %657 = vector.extract_strided_slice %0 {offsets = [6, 0], sizes = [3, 128], strides = [1, 1]} : vector<9x128xf32> to vector<3x128xf32>
    %658 = vector.broadcast %605 : f32 to vector<3x128xf32>
    %659 = arith.mulf %657, %658 : vector<3x128xf32>
    %c1_i32_196 = arith.constant 1 : i32
    %660 = tpu.dynamic_rotate %599 by %c1_i32_196 dim 0 : vector<8x128xf32>, i32 -> vector<8x128xf32>
    %cst_197 = arith.constant 0.000000e+00 : f32
    %661 = vector.broadcast %cst_197 : f32 to vector<8x128xf32>
    %662 = arith.select %4, %661, %660 : vector<8x128xi1>, vector<8x128xf32>
    %c7_i32_198 = arith.constant 7 : i32
    %663 = tpu.dynamic_rotate %599 by %c7_i32_198 dim 0 : vector<8x128xf32>, i32 -> vector<8x128xf32>
    %cst_199 = arith.constant 0.000000e+00 : f32
    %664 = vector.broadcast %cst_199 : f32 to vector<8x128xf32>
    %665 = arith.select %6, %664, %663 : vector<8x128xi1>, vector<8x128xf32>
    %666 = vector.extract_strided_slice %659 {offsets = [0, 0], sizes = [1, 128], strides = [1, 1]} : vector<3x128xf32> to vector<1x128xf32>
    %667 = vector.shape_cast %666 : vector<1x128xf32> to vector<128xf32>
    %668 = vector.shape_cast %667 : vector<128xf32> to vector<1x128xf32>
    %669 = vector.broadcast %668 : vector<1x128xf32> to vector<8x128xf32>
    %670 = arith.mulf %662, %669 : vector<8x128xf32>
    %671 = vector.extract_strided_slice %659 {offsets = [1, 0], sizes = [1, 128], strides = [1, 1]} : vector<3x128xf32> to vector<1x128xf32>
    %672 = vector.shape_cast %671 : vector<1x128xf32> to vector<128xf32>
    %673 = vector.shape_cast %672 : vector<128xf32> to vector<1x128xf32>
    %674 = vector.broadcast %673 : vector<1x128xf32> to vector<8x128xf32>
    %675 = arith.mulf %599, %674 : vector<8x128xf32>
    %676 = arith.addf %670, %675 : vector<8x128xf32>
    %677 = vector.extract_strided_slice %659 {offsets = [2, 0], sizes = [1, 128], strides = [1, 1]} : vector<3x128xf32> to vector<1x128xf32>
    %678 = vector.shape_cast %677 : vector<1x128xf32> to vector<128xf32>
    %679 = vector.shape_cast %678 : vector<128xf32> to vector<1x128xf32>
    %680 = vector.broadcast %679 : vector<1x128xf32> to vector<8x128xf32>
    %681 = arith.mulf %665, %680 : vector<8x128xf32>
    %682 = arith.addf %676, %681 : vector<8x128xf32>
    %683 = arith.addf %656, %682 : vector<8x128xf32>
    %684 = vector.broadcast %1 : vector<1x128xf32> to vector<8x128xf32>
    %685 = arith.addf %683, %684 : vector<8x128xf32>
    %cst_200 = arith.constant 5.000000e-01 : f32
    %686 = vector.broadcast %cst_200 : f32 to vector<8x128xf32>
    %687 = arith.mulf %686, %685 : vector<8x128xf32>
    %cst_201 = arith.constant 4.471500e-02 : f32
    %688 = vector.broadcast %cst_201 : f32 to vector<8x128xf32>
    %689 = arith.mulf %688, %685 : vector<8x128xf32>
    %690 = arith.mulf %689, %685 : vector<8x128xf32>
    %691 = arith.mulf %690, %685 : vector<8x128xf32>
    %692 = arith.addf %685, %691 : vector<8x128xf32>
    %cst_202 = arith.constant 0.797884583 : f32
    %693 = vector.broadcast %cst_202 : f32 to vector<8x128xf32>
    %694 = arith.mulf %693, %692 : vector<8x128xf32>
    %695 = math.tanh %694 : vector<8x128xf32>
    %cst_203 = arith.constant 1.000000e+00 : f32
    %696 = vector.broadcast %cst_203 : f32 to vector<8x128xf32>
    %697 = arith.addf %696, %695 : vector<8x128xf32>
    %698 = arith.mulf %687, %697 : vector<8x128xf32>
    %c0_204 = arith.constant 0 : index
    %699 = arith.index_cast %c5_i32 : i32 to index
    %c0_205 = arith.constant 0 : index
    %c0_206 = arith.constant 0 : index
    %700 = vector.load %arg5[%c0_204, %699, %c0_205, %c0_206] : memref<1x8x8x128xf32, #tpu.memory_space<vmem>>, vector<1x1x8x128xf32>
    %701 = vector.shape_cast %700 : vector<1x1x8x128xf32> to vector<8x128xf32>
    %702 = vector.shape_cast %698 : vector<8x128xf32> to vector<1x1x8x128xf32>
    tpu.vector_store %arg5[%c0_204, %699, %c0_205, %c0_206], %702 {strides = array<i32>} : memref<1x8x8x128xf32, #tpu.memory_space<vmem>>, vector<1x1x8x128xf32>,
    %c6_i32 = arith.constant 6 : i32
    %c0_207 = arith.constant 0 : index
    %703 = arith.index_cast %c6_i32 : i32 to index
    %c0_208 = arith.constant 0 : index
    %c0_209 = arith.constant 0 : index
    %704 = vector.load %arg2[%c0_207, %703, %c0_208, %c0_209] : memref<1x8x8x128xf32, #tpu.memory_space<vmem>>, vector<1x1x8x128xf32>
    %705 = vector.shape_cast %704 : vector<1x1x8x128xf32> to vector<8x128xf32>
    %c1_i32_210 = arith.constant 1 : i32
    %706 = arith.subi %c6_i32, %c1_i32_210 : i32
    %c0_i32_211 = arith.constant 0 : i32
    %707 = arith.maxsi %706, %c0_i32_211 : i32
    %c0_212 = arith.constant 0 : index
    %708 = arith.index_cast %707 : i32 to index
    %c0_213 = arith.constant 0 : index
    %c0_214 = arith.constant 0 : index
    %709 = vector.load %arg2[%c0_212, %708, %c0_213, %c0_214] : memref<1x8x8x128xf32, #tpu.memory_space<vmem>>, vector<1x1x8x128xf32>
    %710 = vector.shape_cast %709 : vector<1x1x8x128xf32> to vector<8x128xf32>
    %c1_i32_215 = arith.constant 1 : i32
    %711 = arith.addi %c6_i32, %c1_i32_215 : i32
    %c7_i32_216 = arith.constant 7 : i32
    %712 = arith.minsi %711, %c7_i32_216 : i32
    %c0_217 = arith.constant 0 : index
    %713 = arith.index_cast %712 : i32 to index
    %c0_218 = arith.constant 0 : index
    %c0_219 = arith.constant 0 : index
    %714 = vector.load %arg2[%c0_217, %713, %c0_218, %c0_219] : memref<1x8x8x128xf32, #tpu.memory_space<vmem>>, vector<1x1x8x128xf32>
    %715 = vector.shape_cast %714 : vector<1x1x8x128xf32> to vector<8x128xf32>
    %c0_i32_220 = arith.constant 0 : i32
    %716 = arith.cmpi sgt, %c6_i32, %c0_i32_220 : i32
    %717 = arith.extui %716 : i1 to i32
    %718 = arith.sitofp %717 : i32 to f32
    %c7_i32_221 = arith.constant 7 : i32
    %719 = arith.cmpi slt, %c6_i32, %c7_i32_221 : i32
    %720 = arith.extui %719 : i1 to i32
    %721 = arith.sitofp %720 : i32 to f32
    %722 = vector.extract_strided_slice %0 {offsets = [3, 0], sizes = [3, 128], strides = [1, 1]} : vector<9x128xf32> to vector<3x128xf32>
    %c1_i32_222 = arith.constant 1 : i32
    %723 = tpu.dynamic_rotate %705 by %c1_i32_222 dim 0 : vector<8x128xf32>, i32 -> vector<8x128xf32>
    %cst_223 = arith.constant 0.000000e+00 : f32
    %724 = vector.broadcast %cst_223 : f32 to vector<8x128xf32>
    %725 = arith.select %4, %724, %723 : vector<8x128xi1>, vector<8x128xf32>
    %c7_i32_224 = arith.constant 7 : i32
    %726 = tpu.dynamic_rotate %705 by %c7_i32_224 dim 0 : vector<8x128xf32>, i32 -> vector<8x128xf32>
    %cst_225 = arith.constant 0.000000e+00 : f32
    %727 = vector.broadcast %cst_225 : f32 to vector<8x128xf32>
    %728 = arith.select %6, %727, %726 : vector<8x128xi1>, vector<8x128xf32>
    %729 = vector.extract_strided_slice %722 {offsets = [0, 0], sizes = [1, 128], strides = [1, 1]} : vector<3x128xf32> to vector<1x128xf32>
    %730 = vector.shape_cast %729 : vector<1x128xf32> to vector<128xf32>
    %731 = vector.shape_cast %730 : vector<128xf32> to vector<1x128xf32>
    %732 = vector.broadcast %731 : vector<1x128xf32> to vector<8x128xf32>
    %733 = arith.mulf %725, %732 : vector<8x128xf32>
    %734 = vector.extract_strided_slice %722 {offsets = [1, 0], sizes = [1, 128], strides = [1, 1]} : vector<3x128xf32> to vector<1x128xf32>
    %735 = vector.shape_cast %734 : vector<1x128xf32> to vector<128xf32>
    %736 = vector.shape_cast %735 : vector<128xf32> to vector<1x128xf32>
    %737 = vector.broadcast %736 : vector<1x128xf32> to vector<8x128xf32>
    %738 = arith.mulf %705, %737 : vector<8x128xf32>
    %739 = arith.addf %733, %738 : vector<8x128xf32>
    %740 = vector.extract_strided_slice %722 {offsets = [2, 0], sizes = [1, 128], strides = [1, 1]} : vector<3x128xf32> to vector<1x128xf32>
    %741 = vector.shape_cast %740 : vector<1x128xf32> to vector<128xf32>
    %742 = vector.shape_cast %741 : vector<128xf32> to vector<1x128xf32>
    %743 = vector.broadcast %742 : vector<1x128xf32> to vector<8x128xf32>
    %744 = arith.mulf %728, %743 : vector<8x128xf32>
    %745 = arith.addf %739, %744 : vector<8x128xf32>
    %746 = vector.extract_strided_slice %0 {offsets = [0, 0], sizes = [3, 128], strides = [1, 1]} : vector<9x128xf32> to vector<3x128xf32>
    %747 = vector.broadcast %718 : f32 to vector<3x128xf32>
    %748 = arith.mulf %746, %747 : vector<3x128xf32>
    %c1_i32_226 = arith.constant 1 : i32
    %749 = tpu.dynamic_rotate %710 by %c1_i32_226 dim 0 : vector<8x128xf32>, i32 -> vector<8x128xf32>
    %cst_227 = arith.constant 0.000000e+00 : f32
    %750 = vector.broadcast %cst_227 : f32 to vector<8x128xf32>
    %751 = arith.select %4, %750, %749 : vector<8x128xi1>, vector<8x128xf32>
    %c7_i32_228 = arith.constant 7 : i32
    %752 = tpu.dynamic_rotate %710 by %c7_i32_228 dim 0 : vector<8x128xf32>, i32 -> vector<8x128xf32>
    %cst_229 = arith.constant 0.000000e+00 : f32
    %753 = vector.broadcast %cst_229 : f32 to vector<8x128xf32>
    %754 = arith.select %6, %753, %752 : vector<8x128xi1>, vector<8x128xf32>
    %755 = vector.extract_strided_slice %748 {offsets = [0, 0], sizes = [1, 128], strides = [1, 1]} : vector<3x128xf32> to vector<1x128xf32>
    %756 = vector.shape_cast %755 : vector<1x128xf32> to vector<128xf32>
    %757 = vector.shape_cast %756 : vector<128xf32> to vector<1x128xf32>
    %758 = vector.broadcast %757 : vector<1x128xf32> to vector<8x128xf32>
    %759 = arith.mulf %751, %758 : vector<8x128xf32>
    %760 = vector.extract_strided_slice %748 {offsets = [1, 0], sizes = [1, 128], strides = [1, 1]} : vector<3x128xf32> to vector<1x128xf32>
    %761 = vector.shape_cast %760 : vector<1x128xf32> to vector<128xf32>
    %762 = vector.shape_cast %761 : vector<128xf32> to vector<1x128xf32>
    %763 = vector.broadcast %762 : vector<1x128xf32> to vector<8x128xf32>
    %764 = arith.mulf %710, %763 : vector<8x128xf32>
    %765 = arith.addf %759, %764 : vector<8x128xf32>
    %766 = vector.extract_strided_slice %748 {offsets = [2, 0], sizes = [1, 128], strides = [1, 1]} : vector<3x128xf32> to vector<1x128xf32>
    %767 = vector.shape_cast %766 : vector<1x128xf32> to vector<128xf32>
    %768 = vector.shape_cast %767 : vector<128xf32> to vector<1x128xf32>
    %769 = vector.broadcast %768 : vector<1x128xf32> to vector<8x128xf32>
    %770 = arith.mulf %754, %769 : vector<8x128xf32>
    %771 = arith.addf %765, %770 : vector<8x128xf32>
    %772 = arith.addf %745, %771 : vector<8x128xf32>
    %773 = vector.extract_strided_slice %0 {offsets = [6, 0], sizes = [3, 128], strides = [1, 1]} : vector<9x128xf32> to vector<3x128xf32>
    %774 = vector.broadcast %721 : f32 to vector<3x128xf32>
    %775 = arith.mulf %773, %774 : vector<3x128xf32>
    %c1_i32_230 = arith.constant 1 : i32
    %776 = tpu.dynamic_rotate %715 by %c1_i32_230 dim 0 : vector<8x128xf32>, i32 -> vector<8x128xf32>
    %cst_231 = arith.constant 0.000000e+00 : f32
    %777 = vector.broadcast %cst_231 : f32 to vector<8x128xf32>
    %778 = arith.select %4, %777, %776 : vector<8x128xi1>, vector<8x128xf32>
    %c7_i32_232 = arith.constant 7 : i32
    %779 = tpu.dynamic_rotate %715 by %c7_i32_232 dim 0 : vector<8x128xf32>, i32 -> vector<8x128xf32>
    %cst_233 = arith.constant 0.000000e+00 : f32
    %780 = vector.broadcast %cst_233 : f32 to vector<8x128xf32>
    %781 = arith.select %6, %780, %779 : vector<8x128xi1>, vector<8x128xf32>
    %782 = vector.extract_strided_slice %775 {offsets = [0, 0], sizes = [1, 128], strides = [1, 1]} : vector<3x128xf32> to vector<1x128xf32>
    %783 = vector.shape_cast %782 : vector<1x128xf32> to vector<128xf32>
    %784 = vector.shape_cast %783 : vector<128xf32> to vector<1x128xf32>
    %785 = vector.broadcast %784 : vector<1x128xf32> to vector<8x128xf32>
    %786 = arith.mulf %778, %785 : vector<8x128xf32>
    %787 = vector.extract_strided_slice %775 {offsets = [1, 0], sizes = [1, 128], strides = [1, 1]} : vector<3x128xf32> to vector<1x128xf32>
    %788 = vector.shape_cast %787 : vector<1x128xf32> to vector<128xf32>
    %789 = vector.shape_cast %788 : vector<128xf32> to vector<1x128xf32>
    %790 = vector.broadcast %789 : vector<1x128xf32> to vector<8x128xf32>
    %791 = arith.mulf %715, %790 : vector<8x128xf32>
    %792 = arith.addf %786, %791 : vector<8x128xf32>
    %793 = vector.extract_strided_slice %775 {offsets = [2, 0], sizes = [1, 128], strides = [1, 1]} : vector<3x128xf32> to vector<1x128xf32>
    %794 = vector.shape_cast %793 : vector<1x128xf32> to vector<128xf32>
    %795 = vector.shape_cast %794 : vector<128xf32> to vector<1x128xf32>
    %796 = vector.broadcast %795 : vector<1x128xf32> to vector<8x128xf32>
    %797 = arith.mulf %781, %796 : vector<8x128xf32>
    %798 = arith.addf %792, %797 : vector<8x128xf32>
    %799 = arith.addf %772, %798 : vector<8x128xf32>
    %800 = vector.broadcast %1 : vector<1x128xf32> to vector<8x128xf32>
    %801 = arith.addf %799, %800 : vector<8x128xf32>
    %cst_234 = arith.constant 5.000000e-01 : f32
    %802 = vector.broadcast %cst_234 : f32 to vector<8x128xf32>
    %803 = arith.mulf %802, %801 : vector<8x128xf32>
    %cst_235 = arith.constant 4.471500e-02 : f32
    %804 = vector.broadcast %cst_235 : f32 to vector<8x128xf32>
    %805 = arith.mulf %804, %801 : vector<8x128xf32>
    %806 = arith.mulf %805, %801 : vector<8x128xf32>
    %807 = arith.mulf %806, %801 : vector<8x128xf32>
    %808 = arith.addf %801, %807 : vector<8x128xf32>
    %cst_236 = arith.constant 0.797884583 : f32
    %809 = vector.broadcast %cst_236 : f32 to vector<8x128xf32>
    %810 = arith.mulf %809, %808 : vector<8x128xf32>
    %811 = math.tanh %810 : vector<8x128xf32>
    %cst_237 = arith.constant 1.000000e+00 : f32
    %812 = vector.broadcast %cst_237 : f32 to vector<8x128xf32>
    %813 = arith.addf %812, %811 : vector<8x128xf32>
    %814 = arith.mulf %803, %813 : vector<8x128xf32>
    %c0_238 = arith.constant 0 : index
    %815 = arith.index_cast %c6_i32 : i32 to index
    %c0_239 = arith.constant 0 : index
    %c0_240 = arith.constant 0 : index
    %816 = vector.load %arg5[%c0_238, %815, %c0_239, %c0_240] : memref<1x8x8x128xf32, #tpu.memory_space<vmem>>, vector<1x1x8x128xf32>
    %817 = vector.shape_cast %816 : vector<1x1x8x128xf32> to vector<8x128xf32>
    %818 = vector.shape_cast %814 : vector<8x128xf32> to vector<1x1x8x128xf32>
    tpu.vector_store %arg5[%c0_238, %815, %c0_239, %c0_240], %818 {strides = array<i32>} : memref<1x8x8x128xf32, #tpu.memory_space<vmem>>, vector<1x1x8x128xf32>,
    %c7_i32_241 = arith.constant 7 : i32
    %c0_242 = arith.constant 0 : index
    %819 = arith.index_cast %c7_i32_241 : i32 to index
    %c0_243 = arith.constant 0 : index
    %c0_244 = arith.constant 0 : index
    %820 = vector.load %arg2[%c0_242, %819, %c0_243, %c0_244] : memref<1x8x8x128xf32, #tpu.memory_space<vmem>>, vector<1x1x8x128xf32>
    %821 = vector.shape_cast %820 : vector<1x1x8x128xf32> to vector<8x128xf32>
    %c1_i32_245 = arith.constant 1 : i32
    %822 = arith.subi %c7_i32_241, %c1_i32_245 : i32
    %c0_i32_246 = arith.constant 0 : i32
    %823 = arith.maxsi %822, %c0_i32_246 : i32
    %c0_247 = arith.constant 0 : index
    %824 = arith.index_cast %823 : i32 to index
    %c0_248 = arith.constant 0 : index
    %c0_249 = arith.constant 0 : index
    %825 = vector.load %arg2[%c0_247, %824, %c0_248, %c0_249] : memref<1x8x8x128xf32, #tpu.memory_space<vmem>>, vector<1x1x8x128xf32>
    %826 = vector.shape_cast %825 : vector<1x1x8x128xf32> to vector<8x128xf32>
    %c1_i32_250 = arith.constant 1 : i32
    %827 = arith.addi %c7_i32_241, %c1_i32_250 : i32
    %c7_i32_251 = arith.constant 7 : i32
    %828 = arith.minsi %827, %c7_i32_251 : i32
    %c0_252 = arith.constant 0 : index
    %829 = arith.index_cast %828 : i32 to index
    %c0_253 = arith.constant 0 : index
    %c0_254 = arith.constant 0 : index
    %830 = vector.load %arg2[%c0_252, %829, %c0_253, %c0_254] : memref<1x8x8x128xf32, #tpu.memory_space<vmem>>, vector<1x1x8x128xf32>
    %831 = vector.shape_cast %830 : vector<1x1x8x128xf32> to vector<8x128xf32>
    %c0_i32_255 = arith.constant 0 : i32
    %832 = arith.cmpi sgt, %c7_i32_241, %c0_i32_255 : i32
    %833 = arith.extui %832 : i1 to i32
    %834 = arith.sitofp %833 : i32 to f32
    %c7_i32_256 = arith.constant 7 : i32
    %835 = arith.cmpi slt, %c7_i32_241, %c7_i32_256 : i32
    %836 = arith.extui %835 : i1 to i32
    %837 = arith.sitofp %836 : i32 to f32
    %838 = vector.extract_strided_slice %0 {offsets = [3, 0], sizes = [3, 128], strides = [1, 1]} : vector<9x128xf32> to vector<3x128xf32>
    %c1_i32_257 = arith.constant 1 : i32
    %839 = tpu.dynamic_rotate %821 by %c1_i32_257 dim 0 : vector<8x128xf32>, i32 -> vector<8x128xf32>
    %cst_258 = arith.constant 0.000000e+00 : f32
    %840 = vector.broadcast %cst_258 : f32 to vector<8x128xf32>
    %841 = arith.select %4, %840, %839 : vector<8x128xi1>, vector<8x128xf32>
    %c7_i32_259 = arith.constant 7 : i32
    %842 = tpu.dynamic_rotate %821 by %c7_i32_259 dim 0 : vector<8x128xf32>, i32 -> vector<8x128xf32>
    %cst_260 = arith.constant 0.000000e+00 : f32
    %843 = vector.broadcast %cst_260 : f32 to vector<8x128xf32>
    %844 = arith.select %6, %843, %842 : vector<8x128xi1>, vector<8x128xf32>
    %845 = vector.extract_strided_slice %838 {offsets = [0, 0], sizes = [1, 128], strides = [1, 1]} : vector<3x128xf32> to vector<1x128xf32>
    %846 = vector.shape_cast %845 : vector<1x128xf32> to vector<128xf32>
    %847 = vector.shape_cast %846 : vector<128xf32> to vector<1x128xf32>
    %848 = vector.broadcast %847 : vector<1x128xf32> to vector<8x128xf32>
    %849 = arith.mulf %841, %848 : vector<8x128xf32>
    %850 = vector.extract_strided_slice %838 {offsets = [1, 0], sizes = [1, 128], strides = [1, 1]} : vector<3x128xf32> to vector<1x128xf32>
    %851 = vector.shape_cast %850 : vector<1x128xf32> to vector<128xf32>
    %852 = vector.shape_cast %851 : vector<128xf32> to vector<1x128xf32>
    %853 = vector.broadcast %852 : vector<1x128xf32> to vector<8x128xf32>
    %854 = arith.mulf %821, %853 : vector<8x128xf32>
    %855 = arith.addf %849, %854 : vector<8x128xf32>
    %856 = vector.extract_strided_slice %838 {offsets = [2, 0], sizes = [1, 128], strides = [1, 1]} : vector<3x128xf32> to vector<1x128xf32>
    %857 = vector.shape_cast %856 : vector<1x128xf32> to vector<128xf32>
    %858 = vector.shape_cast %857 : vector<128xf32> to vector<1x128xf32>
    %859 = vector.broadcast %858 : vector<1x128xf32> to vector<8x128xf32>
    %860 = arith.mulf %844, %859 : vector<8x128xf32>
    %861 = arith.addf %855, %860 : vector<8x128xf32>
    %862 = vector.extract_strided_slice %0 {offsets = [0, 0], sizes = [3, 128], strides = [1, 1]} : vector<9x128xf32> to vector<3x128xf32>
    %863 = vector.broadcast %834 : f32 to vector<3x128xf32>
    %864 = arith.mulf %862, %863 : vector<3x128xf32>
    %c1_i32_261 = arith.constant 1 : i32
    %865 = tpu.dynamic_rotate %826 by %c1_i32_261 dim 0 : vector<8x128xf32>, i32 -> vector<8x128xf32>
    %cst_262 = arith.constant 0.000000e+00 : f32
    %866 = vector.broadcast %cst_262 : f32 to vector<8x128xf32>
    %867 = arith.select %4, %866, %865 : vector<8x128xi1>, vector<8x128xf32>
    %c7_i32_263 = arith.constant 7 : i32
    %868 = tpu.dynamic_rotate %826 by %c7_i32_263 dim 0 : vector<8x128xf32>, i32 -> vector<8x128xf32>
    %cst_264 = arith.constant 0.000000e+00 : f32
    %869 = vector.broadcast %cst_264 : f32 to vector<8x128xf32>
    %870 = arith.select %6, %869, %868 : vector<8x128xi1>, vector<8x128xf32>
    %871 = vector.extract_strided_slice %864 {offsets = [0, 0], sizes = [1, 128], strides = [1, 1]} : vector<3x128xf32> to vector<1x128xf32>
    %872 = vector.shape_cast %871 : vector<1x128xf32> to vector<128xf32>
    %873 = vector.shape_cast %872 : vector<128xf32> to vector<1x128xf32>
    %874 = vector.broadcast %873 : vector<1x128xf32> to vector<8x128xf32>
    %875 = arith.mulf %867, %874 : vector<8x128xf32>
    %876 = vector.extract_strided_slice %864 {offsets = [1, 0], sizes = [1, 128], strides = [1, 1]} : vector<3x128xf32> to vector<1x128xf32>
    %877 = vector.shape_cast %876 : vector<1x128xf32> to vector<128xf32>
    %878 = vector.shape_cast %877 : vector<128xf32> to vector<1x128xf32>
    %879 = vector.broadcast %878 : vector<1x128xf32> to vector<8x128xf32>
    %880 = arith.mulf %826, %879 : vector<8x128xf32>
    %881 = arith.addf %875, %880 : vector<8x128xf32>
    %882 = vector.extract_strided_slice %864 {offsets = [2, 0], sizes = [1, 128], strides = [1, 1]} : vector<3x128xf32> to vector<1x128xf32>
    %883 = vector.shape_cast %882 : vector<1x128xf32> to vector<128xf32>
    %884 = vector.shape_cast %883 : vector<128xf32> to vector<1x128xf32>
    %885 = vector.broadcast %884 : vector<1x128xf32> to vector<8x128xf32>
    %886 = arith.mulf %870, %885 : vector<8x128xf32>
    %887 = arith.addf %881, %886 : vector<8x128xf32>
    %888 = arith.addf %861, %887 : vector<8x128xf32>
    %889 = vector.extract_strided_slice %0 {offsets = [6, 0], sizes = [3, 128], strides = [1, 1]} : vector<9x128xf32> to vector<3x128xf32>
    %890 = vector.broadcast %837 : f32 to vector<3x128xf32>
    %891 = arith.mulf %889, %890 : vector<3x128xf32>
    %c1_i32_265 = arith.constant 1 : i32
    %892 = tpu.dynamic_rotate %831 by %c1_i32_265 dim 0 : vector<8x128xf32>, i32 -> vector<8x128xf32>
    %cst_266 = arith.constant 0.000000e+00 : f32
    %893 = vector.broadcast %cst_266 : f32 to vector<8x128xf32>
    %894 = arith.select %4, %893, %892 : vector<8x128xi1>, vector<8x128xf32>
    %c7_i32_267 = arith.constant 7 : i32
    %895 = tpu.dynamic_rotate %831 by %c7_i32_267 dim 0 : vector<8x128xf32>, i32 -> vector<8x128xf32>
    %cst_268 = arith.constant 0.000000e+00 : f32
    %896 = vector.broadcast %cst_268 : f32 to vector<8x128xf32>
    %897 = arith.select %6, %896, %895 : vector<8x128xi1>, vector<8x128xf32>
    %898 = vector.extract_strided_slice %891 {offsets = [0, 0], sizes = [1, 128], strides = [1, 1]} : vector<3x128xf32> to vector<1x128xf32>
    %899 = vector.shape_cast %898 : vector<1x128xf32> to vector<128xf32>
    %900 = vector.shape_cast %899 : vector<128xf32> to vector<1x128xf32>
    %901 = vector.broadcast %900 : vector<1x128xf32> to vector<8x128xf32>
    %902 = arith.mulf %894, %901 : vector<8x128xf32>
    %903 = vector.extract_strided_slice %891 {offsets = [1, 0], sizes = [1, 128], strides = [1, 1]} : vector<3x128xf32> to vector<1x128xf32>
    %904 = vector.shape_cast %903 : vector<1x128xf32> to vector<128xf32>
    %905 = vector.shape_cast %904 : vector<128xf32> to vector<1x128xf32>
    %906 = vector.broadcast %905 : vector<1x128xf32> to vector<8x128xf32>
    %907 = arith.mulf %831, %906 : vector<8x128xf32>
    %908 = arith.addf %902, %907 : vector<8x128xf32>
    %909 = vector.extract_strided_slice %891 {offsets = [2, 0], sizes = [1, 128], strides = [1, 1]} : vector<3x128xf32> to vector<1x128xf32>
    %910 = vector.shape_cast %909 : vector<1x128xf32> to vector<128xf32>
    %911 = vector.shape_cast %910 : vector<128xf32> to vector<1x128xf32>
    %912 = vector.broadcast %911 : vector<1x128xf32> to vector<8x128xf32>
    %913 = arith.mulf %897, %912 : vector<8x128xf32>
    %914 = arith.addf %908, %913 : vector<8x128xf32>
    %915 = arith.addf %888, %914 : vector<8x128xf32>
    %916 = vector.broadcast %1 : vector<1x128xf32> to vector<8x128xf32>
    %917 = arith.addf %915, %916 : vector<8x128xf32>
    %cst_269 = arith.constant 5.000000e-01 : f32
    %918 = vector.broadcast %cst_269 : f32 to vector<8x128xf32>
    %919 = arith.mulf %918, %917 : vector<8x128xf32>
    %cst_270 = arith.constant 4.471500e-02 : f32
    %920 = vector.broadcast %cst_270 : f32 to vector<8x128xf32>
    %921 = arith.mulf %920, %917 : vector<8x128xf32>
    %922 = arith.mulf %921, %917 : vector<8x128xf32>
    %923 = arith.mulf %922, %917 : vector<8x128xf32>
    %924 = arith.addf %917, %923 : vector<8x128xf32>
    %cst_271 = arith.constant 0.797884583 : f32
    %925 = vector.broadcast %cst_271 : f32 to vector<8x128xf32>
    %926 = arith.mulf %925, %924 : vector<8x128xf32>
    %927 = math.tanh %926 : vector<8x128xf32>
    %cst_272 = arith.constant 1.000000e+00 : f32
    %928 = vector.broadcast %cst_272 : f32 to vector<8x128xf32>
    %929 = arith.addf %928, %927 : vector<8x128xf32>
    %930 = arith.mulf %919, %929 : vector<8x128xf32>
    %c0_273 = arith.constant 0 : index
    %931 = arith.index_cast %c7_i32_241 : i32 to index
    %c0_274 = arith.constant 0 : index
    %c0_275 = arith.constant 0 : index
    %932 = vector.load %arg5[%c0_273, %931, %c0_274, %c0_275] : memref<1x8x8x128xf32, #tpu.memory_space<vmem>>, vector<1x1x8x128xf32>
    %933 = vector.shape_cast %932 : vector<1x1x8x128xf32> to vector<8x128xf32>
    %934 = vector.shape_cast %930 : vector<8x128xf32> to vector<1x1x8x128xf32>
    tpu.vector_store %arg5[%c0_273, %931, %c0_274, %c0_275], %934 {strides = array<i32>} : memref<1x8x8x128xf32, #tpu.memory_space<vmem>>, vector<1x1x8x128xf32>,
    %c8_i32 = arith.constant 8 : i32
    return
  }
  func.func @transform_0(%arg0: i32, %arg1: i32) -> (i32, i32, i32, i32) {
    %c0_i32 = arith.constant 0 : i32
    %c0_i32_0 = arith.constant 0 : i32
    %c0_i32_1 = arith.constant 0 : i32
    return %arg0, %c0_i32, %c0_i32_0, %arg1 : i32, i32, i32, i32
  }
  func.func @transform_1(%arg0: i32, %arg1: i32) -> (i32, i32) {
    %c0_i32 = arith.constant 0 : i32
    %c0_i32_0 = arith.constant 0 : i32
    return %c0_i32, %arg1 : i32, i32
  }
  func.func @transform_2(%arg0: i32, %arg1: i32) -> (i32, i32) {
    %c0_i32 = arith.constant 0 : i32
    %c0_i32_0 = arith.constant 0 : i32
    return %c0_i32, %arg1 : i32, i32
  }
  func.func @transform_3(%arg0: i32, %arg1: i32) -> (i32, i32, i32, i32) {
    %c0_i32 = arith.constant 0 : i32
    %c0_i32_0 = arith.constant 0 : i32
    %c0_i32_1 = arith.constant 0 : i32
    return %arg0, %c0_i32, %c0_i32_0, %arg1 : i32, i32, i32, i32
  }
}

</mosaic_0001>

<bundles_post_ra>
// kernel: _lambda_.5
= control target key start
LH: loop header
LB: loop body
LE: loop exit
PB: predicated region body
PF: predicated region fallthrough
CT: control target
= control target key end

     0   :  { %s657_s0 = inlined_call_operand.vmem [shape: f32[128,256], index: 0, kind: input, shape index: {}]   ;;  %s658_s1 = inlined_call_operand.vmem [shape: f32[256,64], index: 1, kind: input, shape index: {}]   ;;  %s659_s2 = inlined_call_operand.vmem [shape: f32[1,64], index: 2, kind: input, shape index: {}]   ;;  %s660_s3 = inlined_call_operand.hbm [shape: f32[128,64], index: 3, kind: output, shape index: {}]  }
   0x1   :  { %v78_v0 = vld [vmem:[%s658_s1 + $0xf8] sm:$0xff]  ;;  %v77_v2 = vld [vmem:[%s658_s1 + $0xf0] sm:$0xff]  ;;  %v76_v4 = vld [vmem:[%s658_s1 + $0xe8] sm:$0xff] }
   0x2   :  { %v62_v1 = vld [vmem:[%s658_s1 + $0x78] sm:$0xff]  ;;  %265 = vmatprep.subr.mxu0 %v78_v0  ;;  %345 = vmatprep.subr.mxu1 %v78_v0  ;;  %v61_v3 = vld [vmem:[%s658_s1 + $0x70] sm:$0xff]  ;;  %v60_v5 = vld [vmem:[%s658_s1 + $0x68] sm:$0xff] }
   0x3   :  { %266 = vmatpush3.msra.mxu0 %v62_v1  ;;  %361 = vmatpush3.msra.mxu1 %v62_v1  ;;  %v75_v6 = vld [vmem:[%s658_s1 + $0xe0] sm:$0xff]  ;;  %v74_v8 = vld [vmem:[%s658_s1 + $0xd8] sm:$0xff]  ;;  %v73_v10 = vld [vmem:[%s658_s1 + $0xd0] sm:$0xff] }
   0x4   :  { %267 = vmatprep.subr.mxu0 %v77_v2  ;;  %346 = vmatprep.subr.mxu1 %v77_v2  ;;  %v59_v7 = vld [vmem:[%s658_s1 + $0x60] sm:$0xff]  ;;  %v58_v9 = vld [vmem:[%s658_s1 + $0x58] sm:$0xff]  ;;  %v57_v11 = vld [vmem:[%s658_s1 + $0x50] sm:$0xff] }
   0x5   :  { %268 = vmatpush3.msra.mxu0 %v61_v3  ;;  %362 = vmatpush3.msra.mxu1 %v61_v3  ;;  %v72_v12 = vld [vmem:[%s658_s1 + $0xc8] sm:$0xff]  ;;  %v71_v14 = vld [vmem:[%s658_s1 + $0xc0] sm:$0xff]  ;;  %v70_v16 = vld [vmem:[%s658_s1 + $0xb8] sm:$0xff] }
   0x6   :  { %269 = vmatprep.subr.mxu0 %v76_v4  ;;  %347 = vmatprep.subr.mxu1 %v76_v4  ;;  %v56_v13 = vld [vmem:[%s658_s1 + $0x48] sm:$0xff]  ;;  %v55_v15 = vld [vmem:[%s658_s1 + $0x40] sm:$0xff]  ;;  %v54_v17 = vld [vmem:[%s658_s1 + $0x38] sm:$0xff] }
   0x7   :  { %270 = vmatpush3.msra.mxu0 %v60_v5  ;;  %363 = vmatpush3.msra.mxu1 %v60_v5  ;;  %v69_v18 = vld [vmem:[%s658_s1 + $0xb0] sm:$0xff]  ;;  %v68_v20 = vld [vmem:[%s658_s1 + $0xa8] sm:$0xff]  ;;  %v67_v22 = vld [vmem:[%s658_s1 + $0xa0] sm:$0xff] }
   0x8   :  { %271 = vmatprep.subr.mxu0 %v75_v6  ;;  %348 = vmatprep.subr.mxu1 %v75_v6  ;;  %v53_v19 = vld [vmem:[%s658_s1 + $0x30] sm:$0xff]  ;;  %v52_v21 = vld [vmem:[%s658_s1 + $0x28] sm:$0xff]  ;;  %v51_v23 = vld [vmem:[%s658_s1 + $0x20] sm:$0xff] }
   0x9   :  { %272 = vmatpush3.msra.mxu0 %v59_v7  ;;  %364 = vmatpush3.msra.mxu1 %v59_v7 }
   0xa   :  { %273 = vmatprep.subr.mxu0 %v74_v8  ;;  %349 = vmatprep.subr.mxu1 %v74_v8 }
   0xb   :  { %274 = vmatpush3.msra.mxu0 %v58_v9  ;;  %365 = vmatpush3.msra.mxu1 %v58_v9 }
   0xc   :  { %275 = vmatprep.subr.mxu0 %v73_v10  ;;  %350 = vmatprep.subr.mxu1 %v73_v10 }
   0xd   :  { %276 = vmatpush3.msra.mxu0 %v57_v11  ;;  %366 = vmatpush3.msra.mxu1 %v57_v11 }
   0xe   :  { %277 = vmatprep.subr.mxu0 %v72_v12  ;;  %351 = vmatprep.subr.mxu1 %v72_v12 }
   0xf   :  { %278 = vmatpush3.msra.mxu0 %v56_v13  ;;  %367 = vmatpush3.msra.mxu1 %v56_v13 }
  0x10   :  { %279 = vmatprep.subr.mxu0 %v71_v14  ;;  %352 = vmatprep.subr.mxu1 %v71_v14 }
  0x11   :  { %280 = vmatpush3.msra.mxu0 %v55_v15  ;;  %368 = vmatpush3.msra.mxu1 %v55_v15 }
  0x12   :  { %281 = vmatprep.subr.mxu0 %v70_v16  ;;  %353 = vmatprep.subr.mxu1 %v70_v16 }
  0x13   :  { %282 = vmatpush3.msra.mxu0 %v54_v17  ;;  %369 = vmatpush3.msra.mxu1 %v54_v17 }
  0x14   :  { %283 = vmatprep.subr.mxu0 %v69_v18  ;;  %354 = vmatprep.subr.mxu1 %v69_v18 }
  0x15   :  { %284 = vmatpush3.msra.mxu0 %v53_v19  ;;  %370 = vmatpush3.msra.mxu1 %v53_v19 }
  0x16   :  { %285 = vmatprep.subr.mxu0 %v68_v20  ;;  %355 = vmatprep.subr.mxu1 %v68_v20 }
  0x17   :  { %8 = vsyncpa [#allocation3], 0  ;;  %286 = vmatpush3.msra.mxu0 %v52_v21  ;;  %371 = vmatpush3.msra.mxu1 %v52_v21  ;;  %v66_v24 = vld [vmem:[%s658_s1 + $0x98] sm:$0xff]  ;;  %v65_v26 = vld [vmem:[%s658_s1 + $0x90] sm:$0xff]  ;;  %vm231_vm0 = vcmask 523264  }
  0x18   :  { %287 = vmatprep.subr.mxu0 %v67_v22  ;;  %356 = vmatprep.subr.mxu1 %v67_v22  ;;  %v50_v25 = vld [vmem:[%s658_s1 + $0x18] sm:$0xff]  ;;  %v49_v27 = vld [vmem:[%s658_s1 + $0x10] sm:$0xff]  ;;  %v64_v28 = vld [vmem:[%s658_s1 + $0x88] sm:$0xff] }
  0x19   :  { %288 = vmatpush3.msra.mxu0 %v51_v23  ;;  %372 = vmatpush3.msra.mxu1 %v51_v23  ;;  %v48_v29 = vld [vmem:[%s658_s1 + $0x8] sm:$0xff]  ;;  %v63_v30 = vld [vmem:[%s658_s1 + $0x80] sm:$0xff]  ;;  %v18_v36 = vld [vmem:[%s657_s0 + $0x18] sm:$0xff] }
  0x1a   :  { %289 = vmatprep.subr.mxu0 %v66_v24  ;;  %357 = vmatprep.subr.mxu1 %v66_v24  ;;  %v47_v31 = vld [vmem:[%s658_s1] sm:$0xff]  ;;  %v16_v32 = vld [vmem:[%s657_s0 + $0x8] sm:$0xff]  ;;  %v34_v37 = vld [vmem:[%s657_s0 + $0x98] sm:$0xff] }
  0x1b   :  { %290 = vmatpush3.msra.mxu0 %v50_v25  ;;  %373 = vmatpush3.msra.mxu1 %v50_v25  ;;  %v32_v33 = vld [vmem:[%s657_s0 + $0x88] sm:$0xff]  ;;  %v15_v34 = vld [vmem:[%s657_s0] sm:$0xff]  ;;  %v17_v38 = vld [vmem:[%s657_s0 + $0x10] sm:$0xff] }
  0x1c   :  { %291 = vmatprep.subr.mxu0 %v65_v26  ;;  %358 = vmatprep.subr.mxu1 %v65_v26  ;;  %v31_v35 = vld [vmem:[%s657_s0 + $0x80] sm:$0xff]  ;;  %v33_v39 = vld [vmem:[%s657_s0 + $0x90] sm:$0xff]  ;;  %v20_v40 = vld [vmem:[%s657_s0 + $0x28] sm:$0xff] }
  0x1d   :  { %292 = vmatpush3.msra.mxu0 %v49_v27  ;;  %374 = vmatpush3.msra.mxu1 %v49_v27  ;;  %v36_v41 = vld [vmem:[%s657_s0 + $0xa8] sm:$0xff]  ;;  %v19_v42 = vld [vmem:[%s657_s0 + $0x20] sm:$0xff]  ;;  %v22_v44 = vld [vmem:[%s657_s0 + $0x38] sm:$0xff] }
  0x1e   :  { %293 = vmatprep.subr.mxu0 %v64_v28  ;;  %359 = vmatprep.subr.mxu1 %v64_v28  ;;  %v35_v43 = vld [vmem:[%s657_s0 + $0xa0] sm:$0xff]  ;;  %v38_v45 = vld [vmem:[%s657_s0 + $0xb8] sm:$0xff]  ;;  %v21_v46 = vld [vmem:[%s657_s0 + $0x30] sm:$0xff] }
  0x1f   :  { %294 = vmatpush3.msra.mxu0 %v48_v29  ;;  %375 = vmatpush3.msra.mxu1 %v48_v29  ;;  %v37_v47 = vld [vmem:[%s657_s0 + $0xb0] sm:$0xff]  ;;  %v24_v48 = vld [vmem:[%s657_s0 + $0x48] sm:$0xff]  ;;  %v23_v50 = vld [vmem:[%s657_s0 + $0x40] sm:$0xff] }
  0x20   :  { %295 = vmatprep.subr.mxu0 %v63_v30  ;;  %360 = vmatprep.subr.mxu1 %v63_v30  ;;  %v40_v49 = vld [vmem:[%s657_s0 + $0xc8] sm:$0xff]  ;;  %v39_v51 = vld [vmem:[%s657_s0 + $0xc0] sm:$0xff]  ;;  %v26_v52 = vld [vmem:[%s657_s0 + $0x58] sm:$0xff] }
  0x21   :  { %296 = vmatpush3.msra.mxu0 %v47_v31  ;;  %376 = vmatpush3.msra.mxu1 %v47_v31  ;;  %v42_v53 = vld [vmem:[%s657_s0 + $0xd8] sm:$0xff]  ;;  %v25_v54 = vld [vmem:[%s657_s0 + $0x50] sm:$0xff]  ;;  %v28_v56 = vld [vmem:[%s657_s0 + $0x68] sm:$0xff] }
  0x22   :  { %150 = vmatprep.mubr.f32.mxu0 %v16_v32  ;;  %190 = vmatprep.mubr.f32.mxu1 %v32_v33  ;;  %v41_v55 = vld [vmem:[%s657_s0 + $0xd0] sm:$0xff]  ;;  %v44_v57 = vld [vmem:[%s657_s0 + $0xe8] sm:$0xff]  ;;  %v27_v58 = vld [vmem:[%s657_s0 + $0x60] sm:$0xff] }
  0x23   :  { %151 = vmatmul.mubr.f32.vlgmr.msra.gmra.mxu0 %v15_v34  ;;  %191 = vmatmul.mubr.f32.vlgmr.msra.gmra.mxu1 %v31_v35  ;;  %v43_v59 = vld [vmem:[%s657_s0 + $0xe0] sm:$0xff]  ;;  %v30_v60 = vld [vmem:[%s657_s0 + $0x78] sm:$0xff]  ;;  %v29_v62 = vld [vmem:[%s657_s0 + $0x70] sm:$0xff] }
  0x24   :  { %155 = vmatprep.mubr.f32.mxu0 %v18_v36  ;;  %195 = vmatprep.mubr.f32.mxu1 %v34_v37  ;;  %v46_v61 = vld [vmem:[%s657_s0 + $0xf8] sm:$0xff]  ;;  %v45_v63 = vld [vmem:[%s657_s0 + $0xf0] sm:$0xff]  ;;  %v620_v2 = vld [vmem:[%s659_s2] ss:$0 sm:$0xff]  ;;  %s402_s0 = smov [#allocation2]  }
  0x25   :  { %s253_s2 = sshll.u32 %s402_s0, 4  ;;  %s254_s2 = int_to_ptr.vmem [resolvable:$true] %s253_s2 }
  0x26   :  { %s380_s4 = scalar_lea.vmem %s254_s2, 2048  ;;  %p385_p1 = scmp.lt.s32.totalorder %s254_s2, %s254_s2 }
  0x27   :  { %156 = vmatmul.mubr.f32.gmra.mxu0 %v17_v38  ;;  %196 = vmatmul.mubr.f32.gmra.mxu1 %v33_v39  ;;  %p381_p0 = scmp.ne.s32.totalorder %s254_s2, %s380_s4  ;;  %p386_p2 = scmp.lt.s32.totalorder %s380_s4, %s380_s4 }
  0x28   :  { %160 = vmatprep.mubr.f32.mxu0 %v20_v40  ;;  %200 = vmatprep.mubr.f32.mxu1 %v36_v41 }
  0x29   :  { %p387_p3 = por %p386_p2, %p385_p1 }
  0x2b   :  { %161 = vmatmul.mubr.f32.gmra.mxu0 %v19_v42  ;;  %201 = vmatmul.mubr.f32.gmra.mxu1 %v35_v43  ;;  %p388_p4 = pnand %p387_p3, %p381_p0 }
  0x2c   :  { %165 = vmatprep.mubr.f32.mxu0 %v22_v44  ;;  %205 = vmatprep.mubr.f32.mxu1 %v38_v45 }
  0x2f   :  { %166 = vmatmul.mubr.f32.gmra.mxu0 %v21_v46  ;;  %206 = vmatmul.mubr.f32.gmra.mxu1 %v37_v47 }
  0x30   :  { %170 = vmatprep.mubr.f32.mxu0 %v24_v48  ;;  %210 = vmatprep.mubr.f32.mxu1 %v40_v49 }
  0x33   :  { %171 = vmatmul.mubr.f32.gmra.mxu0 %v23_v50  ;;  %211 = vmatmul.mubr.f32.gmra.mxu1 %v39_v51 }
  0x34   :  { %175 = vmatprep.mubr.f32.mxu0 %v26_v52  ;;  %215 = vmatprep.mubr.f32.mxu1 %v42_v53 }
  0x37   :  { %176 = vmatmul.mubr.f32.gmra.mxu0 %v25_v54  ;;  %216 = vmatmul.mubr.f32.gmra.mxu1 %v41_v55 }
  0x38   :  { %180 = vmatprep.mubr.f32.mxu0 %v28_v56  ;;  %220 = vmatprep.mubr.f32.mxu1 %v44_v57 }
  0x3b   :  { %181 = vmatmul.mubr.f32.gmra.mxu0 %v27_v58  ;;  %221 = vmatmul.mubr.f32.gmra.mxu1 %v43_v59 }
  0x3c   :  { %185 = vmatprep.mubr.f32.mxu0 %v30_v60  ;;  %225 = vmatprep.mubr.f32.mxu1 %v46_v61 }
  0x3f   :  { %186 = vmatmul.mubr.f32.gmra.mxu0 %v29_v62  ;;  %226 = vmatmul.mubr.f32.gmra.mxu1 %v45_v63 }
  0xe3   :  { %v297_v0 = vpop.f32.mrf.mxu0  ;;  %v321_v1 = vpop.f32.mrf.mxu1 }
  0xe5   :  { %v298_v3 = vpop.f32.mrf.mxu0  ;;  %v322_v4 = vpop.f32.mrf.mxu1 }
  0xe6   :  { %v299_v5 = vadd.f32 %v298_v3, %v297_v0  ;;  %v323_v6 = vadd.f32 %v322_v4, %v321_v1 }
  0xe7   :  { %v300_v7 = vpop.f32.mrf.mxu0  ;;  %v324_v8 = vpop.f32.mrf.mxu1 }
  0xe8   :  { %v153_v9 = vadd.f32 %v299_v5, %v620_v2  ;;  %v193_v10 = vadd.f32 %v323_v6, %v620_v2 }
  0xe9   :  { %v301_v11 = vpop.f32.mrf.mxu0  ;;  %v325_v12 = vpop.f32.mrf.mxu1 }
  0xea   :  { %232 = vst.msk [vmem:[#allocation2] sm:$0xff] %vm231_vm0, %v153_v9  ;;  %240 = vst.msk [vmem:[#allocation2 + $0x40] sm:$0xff] %vm231_vm0, %v193_v10  ;;  %v302_v13 = vadd.f32 %v301_v11, %v300_v7  ;;  %v326_v14 = vadd.f32 %v325_v12, %v324_v8 }
  0xeb   :  { %v303_v15 = vpop.f32.mrf.mxu0  ;;  %v327_v16 = vpop.f32.mrf.mxu1 }
  0xec   :  { %v158_v17 = vadd.f32 %v302_v13, %v620_v2  ;;  %v198_v18 = vadd.f32 %v326_v14, %v620_v2 }
  0xed   :  { %v304_v19 = vpop.f32.mrf.mxu0  ;;  %v328_v20 = vpop.f32.mrf.mxu1 }
  0xee   :  { %233 = vst.msk [vmem:[#allocation2 + $0x8] sm:$0xff] %vm231_vm0, %v158_v17  ;;  %241 = vst.msk [vmem:[#allocation2 + $0x48] sm:$0xff] %vm231_vm0, %v198_v18  ;;  %v305_v21 = vadd.f32 %v304_v19, %v303_v15  ;;  %v329_v22 = vadd.f32 %v328_v20, %v327_v16 }
  0xef   :  { %v306_v23 = vpop.f32.mrf.mxu0  ;;  %v330_v24 = vpop.f32.mrf.mxu1 }
  0xf0   :  { %v163_v25 = vadd.f32 %v305_v21, %v620_v2  ;;  %v203_v26 = vadd.f32 %v329_v22, %v620_v2 }
  0xf1   :  { %v307_v27 = vpop.f32.mrf.mxu0  ;;  %v331_v28 = vpop.f32.mrf.mxu1 }
  0xf2   :  { %234 = vst.msk [vmem:[#allocation2 + $0x10] sm:$0xff] %vm231_vm0, %v163_v25  ;;  %242 = vst.msk [vmem:[#allocation2 + $0x50] sm:$0xff] %vm231_vm0, %v203_v26  ;;  %v308_v29 = vadd.f32 %v307_v27, %v306_v23  ;;  %v332_v30 = vadd.f32 %v331_v28, %v330_v24 }
  0xf3   :  { %v309_v31 = vpop.f32.mrf.mxu0  ;;  %v333_v32 = vpop.f32.mrf.mxu1 }
  0xf4   :  { %v168_v33 = vadd.f32 %v308_v29, %v620_v2  ;;  %v208_v34 = vadd.f32 %v332_v30, %v620_v2 }
  0xf5   :  { %v310_v35 = vpop.f32.mrf.mxu0  ;;  %v334_v36 = vpop.f32.mrf.mxu1 }
  0xf6   :  { %235 = vst.msk [vmem:[#allocation2 + $0x18] sm:$0xff] %vm231_vm0, %v168_v33  ;;  %243 = vst.msk [vmem:[#allocation2 + $0x58] sm:$0xff] %vm231_vm0, %v208_v34  ;;  %v311_v37 = vadd.f32 %v310_v35, %v309_v31  ;;  %v335_v38 = vadd.f32 %v334_v36, %v333_v32 }
  0xf7   :  { %v312_v39 = vpop.f32.mrf.mxu0  ;;  %v336_v40 = vpop.f32.mrf.mxu1 }
  0xf8   :  { %v173_v41 = vadd.f32 %v311_v37, %v620_v2  ;;  %v213_v42 = vadd.f32 %v335_v38, %v620_v2 }
  0xf9   :  { %v313_v43 = vpop.f32.mrf.mxu0  ;;  %v337_v44 = vpop.f32.mrf.mxu1 }
  0xfa   :  { %236 = vst.msk [vmem:[#allocation2 + $0x20] sm:$0xff] %vm231_vm0, %v173_v41  ;;  %244 = vst.msk [vmem:[#allocation2 + $0x60] sm:$0xff] %vm231_vm0, %v213_v42  ;;  %v314_v45 = vadd.f32 %v313_v43, %v312_v39  ;;  %v338_v46 = vadd.f32 %v337_v44, %v336_v40 }
  0xfb   :  { %v315_v47 = vpop.f32.mrf.mxu0  ;;  %v339_v48 = vpop.f32.mrf.mxu1 }
  0xfc   :  { %v178_v49 = vadd.f32 %v314_v45, %v620_v2  ;;  %v218_v50 = vadd.f32 %v338_v46, %v620_v2 }
  0xfd   :  { %v316_v51 = vpop.f32.mrf.mxu0  ;;  %v340_v52 = vpop.f32.mrf.mxu1 }
  0xfe   :  { %237 = vst.msk [vmem:[#allocation2 + $0x28] sm:$0xff] %vm231_vm0, %v178_v49  ;;  %245 = vst.msk [vmem:[#allocation2 + $0x68] sm:$0xff] %vm231_vm0, %v218_v50  ;;  %v317_v53 = vadd.f32 %v316_v51, %v315_v47  ;;  %v341_v54 = vadd.f32 %v340_v52, %v339_v48 }
  0xff   :  { %v318_v55 = vpop.f32.mrf.mxu0  ;;  %v342_v56 = vpop.f32.mrf.mxu1 }
 0x100   :  { %v183_v57 = vadd.f32 %v317_v53, %v620_v2  ;;  %v223_v58 = vadd.f32 %v341_v54, %v620_v2 }
 0x101   :  { %v319_v59 = vpop.f32.mrf.mxu0  ;;  %v343_v60 = vpop.f32.mrf.mxu1 }
 0x102   :  { %238 = vst.msk [vmem:[#allocation2 + $0x30] sm:$0xff] %vm231_vm0, %v183_v57  ;;  %246 = vst.msk [vmem:[#allocation2 + $0x70] sm:$0xff] %vm231_vm0, %v223_v58  ;;  %v320_v61 = vadd.f32 %v319_v59, %v318_v55  ;;  %v344_v62 = vadd.f32 %v343_v60, %v342_v56 }
 0x104   :  { %v188_v63 = vadd.f32 %v320_v61, %v620_v2  ;;  %v228_v0 = vadd.f32 %v344_v62, %v620_v2 }
 0x106   :  { %239 = vst.msk [vmem:[#allocation2 + $0x38] sm:$0xff] %vm231_vm0, %v188_v63  ;;  %247 = vst.msk [vmem:[#allocation2 + $0x78] sm:$0xff] %vm231_vm0, %v228_v0 }
 0x107   :  { %391 = shalt.err (!%p388_p4)
}
 0x108   :  { %s403_s5 = smov 128   ;;  %s404_s6 = smov 8  }
 0x109   :  { %259 = dma.vmem_to_hbm [thread:$0]  %s254_s2, 2048, %s660_s3, [#allocation3], %s403_s5, %s403_s5, %s404_s6  }
 0x10a   :  { %400 = dma.done.wait [#allocation3], 2048  }
 0x10b   :  { %401 = vsyncadd [#allocation3], 4294965248 }
 0x10c   :  { %263 = vsyncpa [#allocation3], 1 }

// kernel: _lambda_.3
= control target key start
LH: loop header
LB: loop body
LE: loop exit
PB: predicated region body
PF: predicated region fallthrough
CT: control target
= control target key end

     0   :  { %8 = vsyncpa [#allocation3], 0  ;;  %s1509_s0 = inlined_call_operand.hbm [shape: f32[128,64], index: 0, kind: input, shape index: {}]   ;;  %s1510_s1 = inlined_call_operand.hbm [shape: f32[64,256], index: 1, kind: input, shape index: {}]   ;;  %s1511_s2 = inlined_call_operand.vmem [shape: f32[1,256], index: 2, kind: input, shape index: {}]   ;;  %s1512_s3 = inlined_call_operand.vmem [shape: f32[128,256], index: 3, kind: output, shape index: {}]  }
   0x1   :  { %9 = vsyncpa [#allocation5], 0 }
   0x2   :  { %11 = vsyncpa [#allocation5 + $0x1], 0  ;;  %s1170_s12 = smov 0   ;;  %s1172_s13 = smov 0  }
   0x3   :  { %s1174_s14 = smov 0   ;;  %s1176_s15 = smov 0  }
   0x4   :  { %s1178_s16 = smov 0   ;;  %s1180_s17 = smov 0  }
   0x5 LB: > { %1517 = sst [smem:[#allocation9_spill]] %s1143_s17  ;;  %s822_s18 = sadd.s32 4294967295, %s1143_s17   ;;  %s1143_s17 = sphi %s1180_s17, %s17_s17   ;;  %s1139_s16 = sphi %s1178_s16, %s1533_s16   ;;  %s1135_s15 = sphi %s1176_s15, %s1532_s15   ;;  %s1131_s14 = sphi %s1174_s14, %s1531_s14   ;;  %s1127_s13 = sphi %s1172_s13, %s1530_s13   ;;  %s1123_s12 = sphi %s1170_s12, %s1529_s12  }
   0x6   : > { %p69_p0 = scmp.ne.s32.totalorder %s1131_s14, %s1127_s13  ;;  %p70_p1 = scmp.eq.s32.totalorder %s1143_s17, 0 }
   0x7   : > { %p75_p2 = scmp.ne.s32.totalorder %s1127_s13, %s1123_s12  ;;  %p1203_p3 = scmp.eq.s32.totalorder %s822_s18, 0 }
   0x8   : > { %p127_p4 = scmp.eq.s32.totalorder %s822_s18, 1  ;;  %p71_p5 = por %p70_p1, %p69_p0 }
   0x9   : > { %s1518_s19 = scalar_select %p1203_p3, 1, 0 }
   0xa   : > { %p824_p6 = scmp.ge.s32.totalorder %s1143_s17, 1  ;;  %p1210_p7 = por %p1203_p3, %p75_p2 }
   0xb   : > { %p1214_p8 = por %p127_p4, %p69_p0  ;;  %p140_p9 = scmp.lt.s32.totalorder %s1143_s17, 3 }
   0xc   : > { %s1519_s20 = scalar_select %p1210_p7, 1, 0 }
   0xd   : > { %s1520_s21 = scalar_select %p1214_p8, 1, 0 }
   0xe   : > { %p1219_p10 = pnand %p824_p6, %p140_p9  ;;  %s1145_s23 = smov [#allocation2]  }
   0xf   : > { %s155_s24 = sshll.u32 %s1145_s23, 4  ;;  %p949_p12 = scmp.lt.s32.totalorder %s1143_s17, 2  ;;  %s156_s24 = int_to_ptr.vmem [resolvable:$true] %s155_s24 }
  0x10   : > { %p940_p11 = pneg %p1219_p10  ;;  %s26_s27 = sadd.s32 1, %s1139_s16 }
  0x11   : > { %p1232_p0 = pnand %p949_p12, %p71_p5  ;;  %p1237_p1 = scmp.ge.s32.totalorder %s26_s27, 2 }
  0x12   : > { %p1228_p13 = pnand %p940_p11, %p1203_p3  ;;  %s1046_s29 = scalar_lea.vmem %s156_s24, 2048 }
  0x13   : > { %p1047_p4 = scmp.ne.s32.totalorder %s156_s24, %s1046_s29  ;;  %p1054_p11 = scmp.lt.s32.totalorder %s156_s24, %s156_s24 }
  0x14   : > { %p1037_p2 = pneg %p1228_p13  ;;  %p1055_p8 = scmp.lt.s32.totalorder %s1046_s29, %s1046_s29 }
  0x16   : > { %p1049_p6 = pnand %p1047_p4, %p1037_p2  ;;  %p1056_p7 = por %p1055_p8, %p1054_p11 }
  0x18   : > { %p1050_p9 = pneg %p1049_p6 }
  0x1a   : > { %p1057_p3 = pnand %p1056_p7, %p1050_p9 }
  0x1c   : > { %1060 = shalt.err (!%p1057_p3)
}
  0x1d   : > { %s1146_s30 = smov 128   ;;  %s1147_s4 = smov 8  }
  0x1e   : > { %943 = dma.hbm_to_vmem [thread:$0]  (!%p1228_p13), %s1509_s0, 2048, %s156_s24, [#allocation3], %s1146_s30, %s1146_s30, %s1147_s4  }
  0x1f   : > { %s62_s7 = sadd.s32 1, %s1131_s14  ;;  %s1535_s27 = smov (%p1237_p1, %s26_s27), 0 }
  0x20   : > { %s169_s8 = sand.u32 1, %s1131_s14   ;;  %s828_s9 = sshll.u32 %s1139_s16, 7 }
  0x21   : > { %s59_s10 = ssub.s32 %s1139_s16, %s1535_s27  ;;  %s827_s11 = sshll.u32 %s169_s8, 6 }
  0x22   : > { %p60_p3 = scmp.eq.s32.totalorder %s59_s10, 0  ;;  %s178_s23 = scalar_lea.hbm %s1510_s1, %s828_s9 }
  0x23   : > { %s173_s29 = scalar_lea.vmem [#allocation4], %s827_s11  ;;  %s170_s24 = scalar_lea.sflag [#allocation5], %s169_s8 }
  0x24   : > { %s1264_s25 = scalar_select %p60_p3, %s1131_s14, %s62_s7  }
  0x25   : > { %s179_s17 = sshll.u32 %s173_s29, 4  ;;  %p1063_p5 = pneg %p1232_p0  ;;  %s180_s17 = int_to_ptr.vmem [resolvable:$true] %s179_s17 }
  0x26   : > { %s1074_s28 = scalar_lea.vmem %s180_s17, 1024  ;;  %s1148_s5 = smov [#allocation4]  }
  0x27   : > { %p1075_p7 = scmp.ne.s32.totalorder %s180_s17, %s1074_s28  ;;  %s1079_s6 = sshll.u32 %s1148_s5, 4  ;;  %s1080_s6 = int_to_ptr.vmem [resolvable:$false] %s1079_s6 }
  0x28   : > { %s1081_s10 = scalar_lea.vmem %s1080_s6, 2048  ;;  %p1082_p13 = scmp.lt.s32.totalorder %s180_s17, %s1080_s6 }
  0x29   : > { %p1077_p8 = pnand %p1075_p7, %p1063_p5  ;;  %p1083_p1 = scmp.lt.s32.totalorder %s1081_s10, %s1074_s28 }
  0x2b   : > { %p1078_p12 = pneg %p1077_p8  ;;  %p1084_p2 = por %p1083_p1, %p1082_p13 }
  0x2d   : > { %p1085_p4 = pnand %p1084_p2, %p1078_p12 }
  0x2f   : > { %1088 = shalt.err (!%p1085_p4)
}
  0x30   : > { %s1149_s7 = smov 256   ;;  %197 = sbr.rel (%p1219_p10) target bundleno = 336 (0x150), region = 32 }
  0x31   : > { %947 = dma.hbm_to_vmem [thread:$0]  (!%p1232_p0), %s178_s23, 1024, %s180_s17, %s170_s24, %s1149_s7, %s1146_s30, %s1147_s4  }
  0x32   : > { %p1525_p6 = scmp.ne.s32.totalorder (!%p1219_p10), %s1518_s19, 0 }
  0x35   : > { %1114 = dma.done.wait (%p1525_p6), [#allocation3], 2048  }
  0x36   : > { %1116 = vsyncadd (%p1525_p6), [#allocation3], 4294965248  ;;  %s1279_s8 = sand.u32 1, %s1127_s13   ;;  %p1526_p0 = scmp.ne.s32.totalorder %s1519_s20, 0 }
  0x37   : > { %s831_s9 = sshll.u32 %s1279_s8, 6  ;;  %s204_s26 = scalar_lea.sflag [#allocation5], %s1279_s8 }
  0x38   : > { %s1283_s11 = scalar_lea.vmem [#allocation4], %s831_s9 }
  0x39   : > { %1118 = dma.done.wait (%p1526_p0), %s204_s26, 1024  }
  0x3a   : > { %1120 = vsyncadd (%p1526_p0), %s204_s26, 4294966272  ;;  %v260_v0 = vld [vmem:[%s1283_s11 + $0x38] sm:$0xff]  ;;  %v259_v1 = vld [vmem:[%s1283_s11 + $0x30] sm:$0xff]  ;;  %vm268_vm0 = vcmask 523264   ;;  %p233_p10 = scmp.lt.s32.totalorder %s1135_s15, 1  ;;  %s832_s30 = sshll.u32 %s1279_s8, 7 }
  0x3b   : > { %878 = vmatprep.subr.mxu0 %v260_v0  ;;  %918 = vmatprep.subr.mxu1 %v260_v0  ;;  %v258_v2 = vld [vmem:[%s1283_s11 + $0x28] sm:$0xff]  ;;  %v257_v3 = vld [vmem:[%s1283_s11 + $0x20] sm:$0xff]  ;;  %v256_v4 = vld [vmem:[%s1283_s11 + $0x18] sm:$0xff]  ;;  %s1428_s4 = scalar_lea.vmem [#allocation6], %s832_s30  ;;  %p1527_p9 = scmp.ne.s32.totalorder %s1520_s21, 0 }
  0x3c   : > { %879 = vmatpush3.msra.mxu0 %v260_v0  ;;  %926 = vmatpush3.msra.mxu1 %v260_v0  ;;  %v255_v5 = vld [vmem:[%s1283_s11 + $0x10] sm:$0xff]  ;;  %v254_v6 = vld [vmem:[%s1283_s11 + $0x8] sm:$0xff]  ;;  %v253_v7 = vld [vmem:[%s1283_s11] sm:$0xff]  ;;  %s234_s17 = scalar_select %p233_p10, %s1135_s15, 1 }
  0x3d   : > { %880 = vmatprep.subr.mxu0 %v259_v1  ;;  %919 = vmatprep.subr.mxu1 %v259_v1  ;;  %v237_v8 = vld [vmem:[#allocation2] sm:$0xff]  ;;  %v238_v10 = vld [vmem:[#allocation2 + $0x8] sm:$0xff]  ;;  %v239_v12 = vld [vmem:[#allocation2 + $0x10] sm:$0xff]  ;;  %s851_s12 = sshll.u32 (%p1527_p9), %s1135_s15, 3 }
  0x3e   : > { %881 = vmatpush3.msra.mxu0 %v259_v1  ;;  %927 = vmatpush3.msra.mxu1 %v259_v1  ;;  %v245_v9 = vld [vmem:[#allocation2 + $0x40] sm:$0xff]  ;;  %v246_v11 = vld [vmem:[#allocation2 + $0x48] sm:$0xff]  ;;  %v247_v13 = vld [vmem:[#allocation2 + $0x50] sm:$0xff]  ;;  %s235_s22 = scalar_lea.vmem %s1511_s2, %s234_s17  ;;  %s633_s29 = scalar_lea.vmem (%p1527_p9), %s1512_s3, %s851_s12 }
  0x3f   : > { %882 = vmatprep.subr.mxu0 %v258_v2  ;;  %920 = vmatprep.subr.mxu1 %v258_v2  ;;  %v240_v14 = vld [vmem:[#allocation2 + $0x18] sm:$0xff]  ;;  %v241_v16 = vld [vmem:[#allocation2 + $0x20] sm:$0xff]  ;;  %v242_v18 = vld [vmem:[#allocation2 + $0x28] sm:$0xff] }
  0x40   : > { %883 = vmatpush3.msra.mxu0 %v258_v2  ;;  %928 = vmatpush3.msra.mxu1 %v258_v2  ;;  %v248_v15 = vld [vmem:[#allocation2 + $0x58] sm:$0xff]  ;;  %v249_v17 = vld [vmem:[#allocation2 + $0x60] sm:$0xff]  ;;  %v250_v19 = vld [vmem:[#allocation2 + $0x68] sm:$0xff] }
  0x41   : > { %884 = vmatprep.subr.mxu0 %v257_v3  ;;  %921 = vmatprep.subr.mxu1 %v257_v3  ;;  %v243_v20 = vld [vmem:[#allocation2 + $0x30] sm:$0xff]  ;;  %v244_v22 = vld [vmem:[#allocation2 + $0x38] sm:$0xff]  ;;  %v1318_v24 = vld [vmem:[%s235_s22] ss:$0 sm:$0xff] }
  0x42   : > { %885 = vmatpush3.msra.mxu0 %v257_v3  ;;  %929 = vmatpush3.msra.mxu1 %v257_v3  ;;  %v251_v21 = vld [vmem:[#allocation2 + $0x70] sm:$0xff]  ;;  %v252_v23 = vld [vmem:[#allocation2 + $0x78] sm:$0xff] }
  0x43   : > { %886 = vmatprep.subr.mxu0 %v256_v4  ;;  %922 = vmatprep.subr.mxu1 %v256_v4 }
  0x44   : > { %887 = vmatpush3.msra.mxu0 %v256_v4  ;;  %930 = vmatpush3.msra.mxu1 %v256_v4 }
  0x45   : > { %888 = vmatprep.subr.mxu0 %v255_v5  ;;  %923 = vmatprep.subr.mxu1 %v255_v5 }
  0x46   : > { %889 = vmatpush3.msra.mxu0 %v255_v5  ;;  %931 = vmatpush3.msra.mxu1 %v255_v5 }
  0x47   : > { %890 = vmatprep.subr.mxu0 %v254_v6  ;;  %924 = vmatprep.subr.mxu1 %v254_v6 }
  0x48   : > { %891 = vmatpush3.msra.mxu0 %v254_v6  ;;  %932 = vmatpush3.msra.mxu1 %v254_v6 }
  0x49   : > { %892 = vmatprep.subr.mxu0 %v253_v7  ;;  %925 = vmatprep.subr.mxu1 %v253_v7 }
  0x4a   : > { %893 = vmatpush3.msra.mxu0 %v253_v7  ;;  %933 = vmatpush3.msra.mxu1 %v253_v7 }
  0x4b   : > { %894 = vmatprep.mubr.msk.f32.mxu0 %vm268_vm0, %v237_v8  ;;  %906 = vmatprep.mubr.msk.f32.mxu1 %vm268_vm0, %v245_v9 }
  0x4c   : > { %895 = vmatmul.mubr.msk.f32.vlgmr.msra.gmra.mxu0 %vm268_vm0, %v238_v10  ;;  %907 = vmatmul.mubr.msk.f32.vlgmr.msra.gmra.mxu1 %vm268_vm0, %v246_v11 }
  0x4d   : > { %897 = vmatprep.mubr.msk.f32.mxu0 %vm268_vm0, %v239_v12  ;;  %909 = vmatprep.mubr.msk.f32.mxu1 %vm268_vm0, %v247_v13 }
  0x50   : > { %898 = vmatmul.mubr.msk.f32.gmra.mxu0 %vm268_vm0, %v240_v14  ;;  %910 = vmatmul.mubr.msk.f32.gmra.mxu1 %vm268_vm0, %v248_v15 }
  0x51   : > { %900 = vmatprep.mubr.msk.f32.mxu0 %vm268_vm0, %v241_v16  ;;  %912 = vmatprep.mubr.msk.f32.mxu1 %vm268_vm0, %v249_v17 }
  0x54   : > { %901 = vmatmul.mubr.msk.f32.gmra.mxu0 %vm268_vm0, %v242_v18  ;;  %913 = vmatmul.mubr.msk.f32.gmra.mxu1 %vm268_vm0, %v250_v19 }
  0x55   : > { %903 = vmatprep.mubr.msk.f32.mxu0 %vm268_vm0, %v243_v20  ;;  %915 = vmatprep.mubr.msk.f32.mxu1 %vm268_vm0, %v251_v21 }
  0x58   : > { %904 = vmatmul.mubr.msk.f32.gmra.mxu0 %vm268_vm0, %v244_v22  ;;  %916 = vmatmul.mubr.msk.f32.gmra.mxu1 %vm268_vm0, %v252_v23 }
 0x10c   : > { %v896_v25 = vpop.f32.mrf.mxu0  ;;  %v908_v26 = vpop.f32.mrf.mxu1 }
 0x10d   : > { %v1321_v27 = vadd.f32 %v896_v25, %v1318_v24  ;;  %v1324_v28 = vadd.f32 %v908_v26, %v1318_v24 }
 0x10e   : > { %v383_v29 = vpop.f32.mrf.mxu0  ;;  %v423_v30 = vpop.f32.mrf.mxu1 }
 0x10f   : > { %v479_v31 = vmul.f32 0.044715, %v1321_v27  ;;  %v487_v32 = vmul.f32 0.044715, %v1324_v28  ;;  %v1329_v33 = vadd.f32 %v1318_v24, %v383_v29  ;;  %v1332_v34 = vadd.f32 %v1318_v24, %v423_v30 }
 0x110   : > { %v899_v35 = vpop.f32.mrf.mxu0  ;;  %v911_v36 = vpop.f32.mrf.mxu1  ;;  %v463_v25 = vmul.f32 0.5, %v1321_v27 }
 0x111   : > { %v495_v37 = vmul.f32 %v479_v31, %v1321_v27  ;;  %v503_v38 = vmul.f32 %v487_v32, %v1324_v28  ;;  %v1337_v39 = vadd.f32 %v899_v35, %v1318_v24  ;;  %v1340_v40 = vadd.f32 %v911_v36, %v1318_v24 }
 0x112   : > { %v478_v41 = vmul.f32 0.044715, %v1329_v33  ;;  %v486_v42 = vmul.f32 0.044715, %v1332_v34  ;;  %v393_v43 = vpop.f32.mrf.mxu0  ;;  %v433_v44 = vpop.f32.mrf.mxu1 }
 0x113   : > { %v511_v45 = vmul.f32 %v495_v37, %v1321_v27  ;;  %v519_v46 = vmul.f32 %v503_v38, %v1324_v28  ;;  %v481_v47 = vmul.f32 0.044715, %v1337_v39  ;;  %v489_v50 = vmul.f32 0.044715, %v1340_v40 }
 0x114   : > { %v494_v48 = vmul.f32 %v478_v41, %v1329_v33  ;;  %v502_v49 = vmul.f32 %v486_v42, %v1332_v34  ;;  %v1354_v54 = vadd.f32 %v1318_v24, %v393_v43  ;;  %v902_v55 = vpop.f32.mrf.mxu0  ;;  %v1360_v59 = vadd.f32 %v1318_v24, %v433_v44  ;;  %v914_v60 = vpop.f32.mrf.mxu1 }
 0x115   : > { %v527_v51 = vadd.f32 %v511_v45, %v1321_v27  ;;  %v535_v52 = vadd.f32 %v519_v46, %v1324_v28  ;;  %v497_v53 = vmul.f32 %v481_v47, %v1337_v39  ;;  %v505_v58 = vmul.f32 %v489_v50, %v1340_v40 }
 0x116   : > { %v510_v56 = vmul.f32 %v494_v48, %v1329_v33  ;;  %v518_v57 = vmul.f32 %v502_v49, %v1332_v34  ;;  %v480_v3 = vmul.f32 0.044715, %v1354_v54  ;;  %v488_v5 = vmul.f32 0.044715, %v1360_v59  ;;  %v403_v6 = vpop.f32.mrf.mxu0  ;;  %v443_v10 = vpop.f32.mrf.mxu1 }
 0x117   : > { %v543_v61 = vmul.f32 0.7978846, %v527_v51  ;;  %v551_v62 = vmul.f32 0.7978846, %v535_v52  ;;  %v513_v63 = vmul.f32 %v497_v53, %v1337_v39  ;;  %v521_v2 = vmul.f32 %v505_v58, %v1340_v40 }
 0x118   : > { %v526_v0 = vadd.f32 %v510_v56, %v1329_v33  ;;  %v534_v1 = vadd.f32 %v518_v57, %v1332_v34  ;;  %v496_v12 = vmul.f32 %v480_v3, %v1354_v54  ;;  %v504_v13 = vmul.f32 %v488_v5, %v1360_v59  ;;  %v905_v22 = vpop.f32.mrf.mxu0  ;;  %v917_v23 = vpop.f32.mrf.mxu1 }
 0x119   : > { %1003 = vtanh.f32 %v543_v61  ;;  %v529_v4 = vadd.f32 %v513_v63, %v1337_v39  ;;  %v537_v9 = vadd.f32 %v521_v2, %v1340_v40  ;;  %v1373_v14 = vadd.f32 %v902_v55, %v1318_v24 }
 0x11a   : > { %1005 = vtanh.f32 %v551_v62  ;;  %v542_v7 = vmul.f32 0.7978846, %v526_v0  ;;  %v550_v8 = vmul.f32 0.7978846, %v534_v1  ;;  %v1376_v16 = vadd.f32 %v914_v60, %v1318_v24  ;;  %v413_v53 = vpop.f32.mrf.mxu0 }
 0x11b   : > { %v545_v11 = vmul.f32 0.7978846, %v529_v4  ;;  %v553_v15 = vmul.f32 0.7978846, %v537_v9  ;;  %v1379_v17 = vadd.f32 %v1318_v24, %v403_v6  ;;  %v512_v18 = vmul.f32 %v496_v12, %v1354_v54 }
 0x11c   : > { %1007 = vtanh.f32 %v542_v7  ;;  %v520_v19 = vmul.f32 %v504_v13, %v1360_v59  ;;  %v483_v20 = vmul.f32 0.044715, %v1373_v14  ;;  %v491_v21 = vmul.f32 0.044715, %v1376_v16 }
 0x11d   : > { %1009 = vtanh.f32 %v550_v8  ;;  %v528_v26 = vadd.f32 %v512_v18, %v1354_v54  ;;  %v482_v32 = vmul.f32 0.044715, %v1379_v17  ;;  %v1392_v35 = vadd.f32 %v1318_v24, %v443_v10 }
 0x11e   : > { %1011 = vtanh.f32 %v545_v11  ;;  %v536_v29 = vadd.f32 %v520_v19, %v1360_v59  ;;  %v499_v30 = vmul.f32 %v483_v20, %v1373_v14  ;;  %v507_v31 = vmul.f32 %v491_v21, %v1376_v16 }
 0x11f   : > { %1013 = vtanh.f32 %v553_v15  ;;  %v544_v36 = vmul.f32 0.7978846, %v528_v26  ;;  %v1395_v38 = vadd.f32 %v905_v22, %v1318_v24  ;;  %v1398_v27 = vadd.f32 %v917_v23, %v1318_v24 }
 0x120   : > { %v552_v37 = vmul.f32 0.7978846, %v536_v29  ;;  %v471_v41 = vmul.f32 0.5, %v1324_v28  ;;  %v515_v42 = vmul.f32 %v499_v30, %v1373_v14  ;;  %v523_v43 = vmul.f32 %v507_v31, %v1376_v16 }
 0x121   : > { %v498_v44 = vmul.f32 %v482_v32, %v1379_v17  ;;  %v462_v45 = vmul.f32 0.5, %v1329_v33  ;;  %1015 = vtanh.f32 %v544_v36  ;;  %v490_v46 = vmul.f32 0.044715, %v1392_v35 }
 0x122   : > { %v485_v47 = vmul.f32 0.044715, %v1395_v38  ;;  %1017 = vtanh.f32 %v552_v37  ;;  %v531_v48 = vadd.f32 %v515_v42, %v1373_v14  ;;  %v539_v49 = vadd.f32 %v523_v43, %v1376_v16 }
 0x123   : > { %v514_v28 = vmul.f32 %v498_v44, %v1379_v17  ;;  %v470_v50 = vmul.f32 0.5, %v1332_v34  ;;  %v506_v51 = vmul.f32 %v490_v46, %v1392_v35  ;;  %v493_v33 = vmul.f32 0.044715, %v1398_v27 }
 0x124   : > { %v501_v52 = vmul.f32 %v485_v47, %v1395_v38  ;;  %v465_v56 = vmul.f32 0.5, %v1337_v39  ;;  %v547_v57 = vmul.f32 0.7978846, %v531_v48  ;;  %v555_v58 = vmul.f32 0.7978846, %v539_v49  ;;  %v453_v39 = vpop.f32.mrf.mxu1 }
 0x125   : > { %v530_v60 = vadd.f32 %v514_v28, %v1379_v17  ;;  %v522_v63 = vmul.f32 %v506_v51, %v1392_v35  ;;  %v509_v0 = vmul.f32 %v493_v33, %v1398_v27  ;;  %v1421_v3 = vadd.f32 %v1318_v24, %v413_v53 }
 0x126   : > { %v1004_v55 = vpop.eup %1003  ;;  %v517_v34 = vmul.f32 %v501_v52, %v1395_v38  ;;  %1019 = vtanh.f32 %v547_v57  ;;  %v1432_v19 = vadd.f32 %v1318_v24, %v453_v39  ;;  %v473_v29 = vmul.f32 0.5, %v1340_v40 }
 0x127   : > { %v1006_v61 = vpop.eup %1005  ;;  %v575_v62 = vadd.f32 1.0, %v1004_v55  ;;  %v546_v2 = vmul.f32 0.7978846, %v530_v60  ;;  %1021 = vtanh.f32 %v555_v58  ;;  %v538_v6 = vadd.f32 %v522_v63, %v1392_v35 }
 0x128   : > { %v583_v1 = vadd.f32 1.0, %v1006_v61  ;;  %v533_v7 = vadd.f32 %v517_v34, %v1395_v38  ;;  %v525_v11 = vmul.f32 %v509_v0, %v1398_v27  ;;  %v492_v37 = vmul.f32 0.044715, %v1432_v19 }
 0x129   : > { %v1008_v4 = vpop.eup %1007  ;;  %v591_v5 = vmul.f32 %v575_v62, %v463_v25  ;;  %1023 = vtanh.f32 %v546_v2  ;;  %v554_v15 = vmul.f32 0.7978846, %v538_v6  ;;  %v484_v25 = vmul.f32 0.044715, %v1421_v3 }
 0x12a   : > { %v1010_v8 = vpop.eup %1009  ;;  %v599_v9 = vmul.f32 %v583_v1, %v471_v41  ;;  %v574_v10 = vadd.f32 1.0, %v1008_v4  ;;  %v549_v18 = vmul.f32 0.7978846, %v533_v7  ;;  %v541_v23 = vadd.f32 %v525_v11, %v1398_v27 }
 0x12b   : > { %v1012_v12 = vpop.eup %1011  ;;  %607 = vst [vmem:[%s1428_s4 + $0x8] sm:$0xff] %v591_v5  ;;  %v582_v13 = vadd.f32 1.0, %v1010_v8  ;;  %1025 = vtanh.f32 %v554_v15  ;;  %v500_v32 = vmul.f32 %v484_v25, %v1421_v3  ;;  %v464_v43 = vmul.f32 0.5, %v1354_v54 }
 0x12c   : > { %v1014_v20 = vpop.eup %1013  ;;  %615 = vst [vmem:[%s1428_s4 + $0x48] sm:$0xff] %v599_v9  ;;  %v590_v21 = vmul.f32 %v574_v10, %v462_v45  ;;  %v577_v22 = vadd.f32 1.0, %v1012_v12  ;;  %1027 = vtanh.f32 %v549_v18  ;;  %v557_v24 = vmul.f32 0.7978846, %v541_v23 }
 0x12d   : > { %v598_v26 = vmul.f32 %v582_v13, %v470_v50  ;;  %v585_v30 = vadd.f32 1.0, %v1014_v20  ;;  %v516_v42 = vmul.f32 %v500_v32, %v1421_v3  ;;  %v508_v45 = vmul.f32 %v492_v37, %v1432_v19 }
 0x12e   : > { %606 = vst [vmem:[%s1428_s4] sm:$0xff] %v590_v21  ;;  %v593_v31 = vmul.f32 %v577_v22, %v465_v56  ;;  %v1016_v41 = vpop.eup %1015  ;;  %1029 = vtanh.f32 %v557_v24  ;;  %v472_v46 = vmul.f32 0.5, %v1360_v59  ;;  %v467_v54 = vmul.f32 0.5, %v1373_v14 }
 0x12f   : > { %614 = vst [vmem:[%s1428_s4 + $0x40] sm:$0xff] %v598_v26  ;;  %v601_v36 = vmul.f32 %v585_v30, %v473_v29  ;;  %v1018_v40 = vpop.eup %1017  ;;  %v576_v44 = vadd.f32 1.0, %v1016_v41  ;;  %v532_v48 = vadd.f32 %v516_v42, %v1421_v3  ;;  %v524_v28 = vmul.f32 %v508_v45, %v1432_v19 }
 0x130   : > { %609 = vst [vmem:[%s1428_s4 + $0x18] sm:$0xff] %v593_v31  ;;  %v584_v47 = vadd.f32 1.0, %v1018_v40  ;;  %v475_v56 = vmul.f32 0.5, %v1376_v16  ;;  %v466_v61 = vmul.f32 0.5, %v1379_v17  ;;  %v474_v1 = vmul.f32 0.5, %v1392_v35 }
 0x131   : > { %617 = vst [vmem:[%s1428_s4 + $0x58] sm:$0xff] %v601_v36  ;;  %v592_v49 = vmul.f32 %v576_v44, %v464_v43  ;;  %v548_v51 = vmul.f32 0.7978846, %v532_v48  ;;  %v540_v33 = vadd.f32 %v524_v28, %v1432_v19  ;;  %v469_v16 = vmul.f32 0.5, %v1395_v38 }
 0x132   : > { %v600_v50 = vmul.f32 %v584_v47, %v472_v46  ;;  %v477_v6 = vmul.f32 0.5, %v1398_v27  ;;  %v468_v35 = vmul.f32 0.5, %v1421_v3  ;;  %v476_v38 = vmul.f32 0.5, %v1432_v19  ;;  %v694_v3 = vld [vmem:[%s1428_s4 + $0x8] sm:$0xff] (%p1527_p9) }
 0x133   : > { %v1020_v52 = vpop.eup %1019  ;;  %608 = vst [vmem:[%s1428_s4 + $0x10] sm:$0xff] %v592_v49  ;;  %1031 = vtanh.f32 %v548_v51  ;;  %v556_v58 = vmul.f32 0.7978846, %v540_v33  ;;  %695 = vst [vmem:[%s633_s29 + $0x10] sm:$0xff] (%p1527_p9), %v694_v3  ;;  %v710_v26 = vld [vmem:[%s1428_s4 + $0x48] sm:$0xff] (%p1527_p9) }
 0x134   : > { %v1022_v53 = vpop.eup %1021  ;;  %616 = vst [vmem:[%s1428_s4 + $0x50] sm:$0xff] %v600_v50  ;;  %v579_v55 = vadd.f32 1.0, %v1020_v52  ;;  %711 = vst [vmem:[%s633_s29 + $0x90] sm:$0xff] (%p1527_p9), %v710_v26 }
 0x135   : > { %v587_v57 = vadd.f32 1.0, %v1022_v53  ;;  %1033 = vtanh.f32 %v556_v58  ;;  %v692_v27 = vld [vmem:[%s1428_s4] sm:$0xff] (%p1527_p9) }
 0x136   : > { %v1024_v59 = vpop.eup %1023  ;;  %v595_v60 = vmul.f32 %v579_v55, %v467_v54  ;;  %693 = vst [vmem:[%s633_s29] sm:$0xff] (%p1527_p9), %v692_v27  ;;  %v708_v25 = vld [vmem:[%s1428_s4 + $0x40] sm:$0xff] (%p1527_p9) }
 0x137   : > { %v578_v62 = vadd.f32 1.0, %v1024_v59  ;;  %v603_v63 = vmul.f32 %v587_v57, %v475_v56  ;;  %v698_v19 = vld [vmem:[%s1428_s4 + $0x18] sm:$0xff] (%p1527_p9)  ;;  %709 = vst [vmem:[%s633_s29 + $0x80] sm:$0xff] (%p1527_p9), %v708_v25 }
 0x138   : > { %v1026_v34 = vpop.eup %1025  ;;  %611 = vst [vmem:[%s1428_s4 + $0x28] sm:$0xff] %v595_v60  ;;  %699 = vst [vmem:[%s633_s29 + $0x30] sm:$0xff] (%p1527_p9), %v698_v19  ;;  %v714_v30 = vld [vmem:[%s1428_s4 + $0x58] sm:$0xff] (%p1527_p9) }
 0x139   : > { %v594_v14 = vmul.f32 %v578_v62, %v466_v61  ;;  %v1028_v0 = vpop.eup %1027  ;;  %619 = vst [vmem:[%s1428_s4 + $0x68] sm:$0xff] %v603_v63  ;;  %v586_v2 = vadd.f32 1.0, %v1026_v34  ;;  %715 = vst [vmem:[%s633_s29 + $0xb0] sm:$0xff] (%p1527_p9), %v714_v30 }
 0x13a   : > { %v581_v39 = vadd.f32 1.0, %v1028_v0  ;;  %v696_v18 = vld [vmem:[%s1428_s4 + $0x10] sm:$0xff] (%p1527_p9) }
 0x13b   : > { %610 = vst [vmem:[%s1428_s4 + $0x20] sm:$0xff] %v594_v14  ;;  %v1030_v4 = vpop.eup %1029  ;;  %v602_v17 = vmul.f32 %v586_v2, %v474_v1  ;;  %697 = vst [vmem:[%s633_s29 + $0x20] sm:$0xff] (%p1527_p9), %v696_v18  ;;  %v712_v29 = vld [vmem:[%s1428_s4 + $0x50] sm:$0xff] (%p1527_p9) }
 0x13c   : > { %v597_v5 = vmul.f32 %v581_v39, %v469_v16  ;;  %v589_v7 = vadd.f32 1.0, %v1030_v4  ;;  %713 = vst [vmem:[%s633_s29 + $0xa0] sm:$0xff] (%p1527_p9), %v712_v29 }
 0x13d   : > { %618 = vst [vmem:[%s1428_s4 + $0x60] sm:$0xff] %v602_v17 }
 0x13e   : > { %613 = vst [vmem:[%s1428_s4 + $0x38] sm:$0xff] %v597_v5  ;;  %v605_v8 = vmul.f32 %v589_v7, %v477_v6 }
 0x13f   : > { %v702_v21 = vld [vmem:[%s1428_s4 + $0x28] sm:$0xff] (%p1527_p9) }
 0x140   : > { %621 = vst [vmem:[%s1428_s4 + $0x78] sm:$0xff] %v605_v8  ;;  %v1032_v9 = vpop.eup %1031  ;;  %703 = vst [vmem:[%s633_s29 + $0x50] sm:$0xff] (%p1527_p9), %v702_v21  ;;  %v718_v24 = vld [vmem:[%s1428_s4 + $0x68] sm:$0xff] (%p1527_p9) }
 0x141   : > { %v580_v10 = vadd.f32 1.0, %v1032_v9  ;;  %719 = vst [vmem:[%s633_s29 + $0xd0] sm:$0xff] (%p1527_p9), %v718_v24 }
 0x142   : > { %v1034_v11 = vpop.eup %1033  ;;  %v700_v20 = vld [vmem:[%s1428_s4 + $0x20] sm:$0xff] (%p1527_p9) }
 0x143   : > { %v596_v12 = vmul.f32 %v580_v10, %v468_v35  ;;  %v588_v13 = vadd.f32 1.0, %v1034_v11  ;;  %628 = sbr.rel (!%p1527_p9) target bundleno = 336 (0x150), region = 44  ;;  %701 = vst [vmem:[%s633_s29 + $0x40] sm:$0xff] (%p1527_p9), %v700_v20 }
 0x144   : > { %v716_v31 = vld [vmem:[%s1428_s4 + $0x60] sm:$0xff] (%p1527_p9) }
 0x145   : > { %612 = vst [vmem:[%s1428_s4 + $0x30] sm:$0xff] %v596_v12  ;;  %v604_v15 = vmul.f32 %v588_v13, %v476_v38  ;;  %v706_v23 = vld [vmem:[%s1428_s4 + $0x38] sm:$0xff] (%p1527_p9)  ;;  %717 = vst [vmem:[%s633_s29 + $0xc0] sm:$0xff] (%p1527_p9), %v716_v31 }
 0x146   : > { %707 = vst [vmem:[%s633_s29 + $0x70] sm:$0xff] (%p1527_p9), %v706_v23 }
 0x147   : > { %620 = vst [vmem:[%s1428_s4 + $0x70] sm:$0xff] %v604_v15  ;;  %v722_v36 = vld [vmem:[%s1428_s4 + $0x78] sm:$0xff] (%p1527_p9) }
 0x148   : > { %723 = vst [vmem:[%s633_s29 + $0xf0] sm:$0xff] %v722_v36 }
 0x14c   : > { %v704_v22 = vld [vmem:[%s1428_s4 + $0x30] sm:$0xff] }
 0x14d   : > { %705 = vst [vmem:[%s633_s29 + $0x60] sm:$0xff] %v704_v22 }
 0x14e   : > { %v720_v32 = vld [vmem:[%s1428_s4 + $0x70] sm:$0xff] }
 0x14f   : > { %721 = vst [vmem:[%s633_s29 + $0xe0] sm:$0xff] %v720_v32 }
 0x150 PF: > { %s1528_s15 = sld [smem:[#allocation9_spill]]  ;;  %s1529_s12 = smov %s1127_s13 }
 0x151   : > { %s1530_s13 = smov %s1131_s14  ;;  %s1531_s14 = smov %s1264_s25 }
 0x156   : > { %s17_s17 = sadd.s32 1, %s1528_s15   ;;  %s1532_s15 = smov %s1139_s16 }
 0x157   : > { %p14_p11 = scmp.ge.s32.totalorder %s17_s17, 4   ;;  %s1533_s16 = smov %s1535_s27 }
 0x159   :  { %16 = sbr.rel (!%p14_p11) target bundleno = 5 (0x5), region = 119 }
 0x15e   :  { %739 = vsyncpa [#allocation3], 1 }
 0x15f   :  { %741 = vsyncpa [#allocation3 + $0x1], 1 }
 0x160   :  { %742 = vsyncpa [#allocation5], 1 }
 0x161   :  { %744 = vsyncpa [#allocation5 + $0x1], 1 }

// kernel: _lambda_.4
= control target key start
LH: loop header
LB: loop body
LE: loop exit
PB: predicated region body
PF: predicated region fallthrough
CT: control target
= control target key end

     0   :  { %s1139_s12 = smov 0   ;;  %s1141_s13 = smov 0   ;;  %s1563_s0 = inlined_call_operand.vmem [shape: f32[2,8,8,256], index: 0, kind: input, shape index: {}]   ;;  %s1564_s1 = inlined_call_operand.vmem [shape: f32[9,256], index: 1, kind: input, shape index: {}]   ;;  %s1565_s2 = inlined_call_operand.vmem [shape: f32[1,256], index: 2, kind: input, shape index: {}]   ;;  %s1566_s3 = inlined_call_operand.vmem [shape: f32[2,8,8,256], index: 3, kind: output, shape index: {}]  }
   0x1   :  { %s1143_s14 = smov 0   ;;  %s1145_s15 = smov 0  }
   0x2   :  { %s1147_s16 = smov 0   ;;  %s1149_s17 = smov 0  }
   0x3   :  { %s1151_s18 = smov 0   ;;  %s1153_s19 = smov 0  }
   0x4   :  { %s1155_s20 = smov 0  }
   0x5 LB: > { %s913_s21 = sadd.s32 4294967295, %s1117_s20   ;;  %s22_s22 = sadd.s32 1, %s1109_s18  ;;  %s1117_s20 = sphi %s1155_s20, %s13_s20   ;;  %s1113_s19 = sphi %s1153_s19, %s1577_s19   ;;  %s1109_s18 = sphi %s1151_s18, %s1576_s18   ;;  %s1105_s17 = sphi %s1149_s17, %s1575_s17   ;;  %s1101_s16 = sphi %s1147_s16, %s1574_s16   ;;  %s1097_s15 = sphi %s1145_s15, %s1573_s15   ;;  %s1093_s14 = sphi %s1143_s14, %s1572_s14   ;;  %s1089_s13 = sphi %s1141_s13, %s1571_s13   ;;  %s1085_s12 = sphi %s1139_s12, %s1570_s12  }
   0x6   : > { %p23_p0 = scmp.ge.s32.totalorder %s22_s22, 2  ;;  %s25_s23 = sadd.s32 1, %s1113_s19 }
   0x7   : > { %s34_s24 = sadd.s32 1, %s1097_s15  ;;  %p41_p1 = scmp.ne.s32.totalorder %s1097_s15, %s1093_s14 }
   0x8   : > { %s1579_s22 = smov (%p23_p0, %s22_s22), 0  ;;  %s1581_s23 = smov (!%p23_p0, %s25_s23), %s1113_s19 }
   0x9   : > { %s30_s25 = ssub.s32 %s1109_s18, %s1579_s22  ;;  %p42_p2 = scmp.eq.s32.totalorder %s1117_s20, 0 }
   0xa   : > { %p27_p3 = scmp.ge.s32.totalorder %s1581_s23, 2  ;;  %p58_p4 = scmp.eq.s32.totalorder %s30_s25, 0 }
   0xb   : > { %p1199_p5 = por %p42_p2, %p41_p1  ;;  %s60_s27 = sadd.s32 1, %s1089_s13 }
   0xc   : > { %s1583_s23 = smov (%p27_p3, %s1581_s23), 0  ;;  %p67_p6 = scmp.ne.s32.totalorder %s1089_s13, %s1085_s12 }
   0xd   : > { %s1207_s28 = scalar_select %p58_p4, %s1089_s13, %s60_s27  }
   0xe   : > { %s29_s29 = ssub.s32 %s1113_s19, %s1583_s23  ;;  %p125_p7 = scmp.eq.s32.totalorder %s913_s21, 3 }
   0xf   : > { %s31_s30 = sor.u32 %s30_s25, %s29_s29  ;;  %p1213_p9 = por %p67_p6, %p42_p2 }
  0x10   : > { %p32_p8 = scmp.eq.s32.totalorder %s31_s30, 0  ;;  %p1220_p10 = por %p125_p7, %p41_p1 }
  0x11   : > { %p916_p11 = scmp.ge.s32.totalorder %s1117_s20, 4 }
  0x12   : > { %s1225_s6 = scalar_select %p32_p8, %s1097_s15, %s34_s24  }
  0x13   : > { %147 = sbr.rel (%p916_p11) target bundleno = 39 (0x27), region = 16 }
  0x18   : > { %150 = sbr.rel (!%p1199_p5) target bundleno = 34 (0x22), region = 20  ;;  %s152_s7 = sand.u32 (%p1199_p5), 1, %s1097_s15  }
  0x19   : > { %s918_s8 = sshll.u32 (%p1199_p5), %s1113_s19, 4  ;;  %s917_s9 = sshll.u32 (%p1199_p5), %s152_s7, 6 }
  0x1a   : > { %s156_s10 = sadd.s32 (%p1199_p5), %s1109_s18, %s918_s8  ;;  %s154_s24 = scalar_lea.vmem (%p1199_p5), [#allocation2], %s917_s9 }
  0x1b   : > { %s919_s11 = sshll.u32 (%p1199_p5), %s156_s10, 3 }
  0x1c   : > { %s158_s27 = scalar_lea.vmem (%p1199_p5), %s1563_s0, %s919_s11 }
  0x1d   : > { %v201_v0 = vld [vmem:[%s158_s27] sm:$0xff]  ;;  %v203_v1 = vld [vmem:[%s158_s27 + $0x10] sm:$0xff] }
  0x1e   : > { %v205_v2 = vld [vmem:[%s158_s27 + $0x20] sm:$0xff]  ;;  %202 = vst [vmem:[%s154_s24] sm:$0xff] %v201_v0  ;;  %204 = vst [vmem:[%s154_s24 + $0x8] sm:$0xff] %v203_v1  ;;  %v207_v3 = vld [vmem:[%s158_s27 + $0x30] sm:$0xff] }
  0x1f   : > { %206 = vst [vmem:[%s154_s24 + $0x10] sm:$0xff] %v205_v2  ;;  %v209_v4 = vld [vmem:[%s158_s27 + $0x40] sm:$0xff]  ;;  %v211_v5 = vld [vmem:[%s158_s27 + $0x50] sm:$0xff]  ;;  %208 = vst [vmem:[%s154_s24 + $0x18] sm:$0xff] %v207_v3 }
  0x20   : > { %210 = vst [vmem:[%s154_s24 + $0x20] sm:$0xff] %v209_v4  ;;  %212 = vst [vmem:[%s154_s24 + $0x28] sm:$0xff] %v211_v5  ;;  %v213_v6 = vld [vmem:[%s158_s27 + $0x60] sm:$0xff]  ;;  %v215_v7 = vld [vmem:[%s158_s27 + $0x70] sm:$0xff] }
  0x21   : > { %214 = vst [vmem:[%s154_s24 + $0x30] sm:$0xff] %v213_v6  ;;  %216 = vst [vmem:[%s154_s24 + $0x38] sm:$0xff] %v215_v7 }
  0x22 PF: > { %222 = sbr.rel (!%p1213_p9) target bundleno = 39 (0x27), region = 58  ;;  %s224_s26 = sand.u32 (%p1213_p9), 1, %s1089_s13  }
  0x23   : > { %s921_s29 = sshll.u32 (%p1213_p9), %s1109_s18, 3  ;;  %s920_s30 = sshll.u32 (%p1213_p9), %s224_s26, 4 }
  0x24   : > { %s228_s9 = scalar_lea.vmem (%p1213_p9), %s1564_s1, %s921_s29  ;;  %s226_s10 = scalar_lea.vmem (%p1213_p9), [#allocation3], %s920_s30 }
  0x25   : > { %v259_v8 = vld [vmem:[%s228_s9] sm:$0xff] (%p1213_p9)  ;;  %v261_v9 = vld [vmem:[%s228_s9 + $0x10] sm:$0xff] (%p1213_p9) }
  0x26   : > { %260 = vst [vmem:[%s226_s10] sm:$0xff] (%p1213_p9), %v259_v8  ;;  %262 = vst [vmem:[%s226_s10 + $0x8] sm:$0xff] (%p1213_p9), %v261_v9 }
  0x27 PF: > { %p922_p12 = scmp.ge.s32.totalorder %s1117_s20, 1  ;;  %p273_p13 = scmp.lt.s32.totalorder %s1117_s20, 5 }
  0x29   : > { %p274_p0 = pnand %p922_p12, %p273_p13 }
  0x2a   : > { %s280_s4 = sand.u32 (!%p274_p0), 1, %s1093_s14   ;;  %s287_s11 = sand.u32 (!%p274_p0), 1, %s1085_s12  }
  0x2b   : > { %277 = sbr.rel (%p274_p0) target bundleno = 156 (0x9c), region = 100  ;;  %s1247_s21 = sshll.u32 (!%p274_p0), %s280_s4, 6 }
  0x2c   : > { %s1249_s25 = sshll.u32 (!%p274_p0), %s287_s11, 4  ;;  %s1257_s24 = scalar_lea.vmem (!%p274_p0), [#allocation2], %s1247_s21 }
  0x2d   : > { %s289_s27 = scalar_lea.vmem (!%p274_p0), [#allocation3], %s1249_s25  ;;  %p316_p1 = scmp.lt.s32.totalorder (!%p274_p0), %s1101_s16, 1 }
  0x2e   : > { %s1481_s30 = scalar_lea.vmem (!%p274_p0), [#allocation4], %s1247_s21 }
  0x30   : > { %v322_v10 = vlaneseq  ;;  %v319_v12 = vld [vmem:[%s289_s27] sm:$0xff]  ;;  %v1263_v16 = vld [vmem:[%s1257_s24 + $0x8] sm:$0xff]  ;;  %s1317_s12 = scalar_select %p316_p1, %s1101_s16, 1 }
  0x31   : > { %v326_v13 = vld [vmem:[%s1257_s24] sm:$0xff]  ;;  %v1268_v20 = vmul.f32 0.0, %v319_v12  ;;  %v369_v31 = vrot.slane %v1263_v16, 7  ;;  %v371_v32 = vrot.slane %v1263_v16, 1  ;;  %v1301_v41 = vld [vmem:[%s289_s27 + $0x8] sm:$0x1] }
  0x32   : > { %v1251_v11 = vshrl.u32 %v322_v10, 7  ;;  %v329_v14 = vrot.slane %v326_v13, 7  ;;  %v331_v15 = vrot.slane %v326_v13, 1  ;;  %v929_v56 = vld [vmem:[%s1257_s24 + $0x10] sm:$0xff]  ;;  %s318_s29 = scalar_lea.vmem %s1565_s2, %s1317_s12  ;;  %s955_s7 = sshll.u32 (%p1220_p10), %s1105_s17, 4 }
  0x33   : > { %v443_v4 = vrot.slane %v929_v56, 7  ;;  %v445_v5 = vrot.slane %v929_v56, 1  ;;  %s750_s8 = sadd.s32 (%p1220_p10), %s1101_s16, %s955_s7 }
  0x34   : > { %vm324_vm0 = vcmp.eq.s32.totalorder %v1251_v11, 0  ;;  %vm325_vm1 = vcmp.eq.s32.totalorder %v1251_v11, 7  ;;  %v335_v17 = vsub.s32 3, %v1251_v11  ;;  %v340_v18 = vsub.s32 4, %v1251_v11  ;;  %s956_s5 = sshll.u32 (%p1220_p10), %s750_s8, 3 }
  0x35   : > { %v346_v19 = vsub.s32 5, %v1251_v11  ;;  %v330_v21 = vsel %vm324_vm0, 0.0, %v329_v14  ;;  %v332_v22 = vsel %vm325_vm1, 0.0, %v331_v15  ;;  %v1275_v23 = vsub.s32 0, %v1251_v11  ;;  %v1353_v15 = vld [vmem:[%s1257_s24 + $0x18] sm:$0xff]  ;;  %s752_s4 = scalar_lea.vmem (%p1220_p10), %s1566_s3, %s956_s5 }
  0x36   : > { %v358_v24 = vsub.s32 1, %v1251_v11  ;;  %v1278_v25 = vrot.slane %v319_v12, %v335_v17  ;;  %v1280_v26 = vrot.slane %v319_v12, %v340_v18  ;;  %v364_v28 = vsub.s32 2, %v1251_v11  ;;  %v1357_v18 = vld [vmem:[%s318_s29] ss:$0 sm:$0xff] }
  0x37   : > { %v1282_v27 = vrot.slane %v319_v12, %v346_v19  ;;  %v354_v29 = vrot.slane %v1268_v20, %v1275_v23  ;;  %v370_v39 = vsel %vm324_vm0, 0.0, %v369_v31  ;;  %v372_v40 = vsel %vm325_vm1, 0.0, %v371_v32 }
  0x38   : > { %v359_v30 = vrot.slane %v1268_v20, %v358_v24  ;;  %v337_v33 = vmul.f32 %v1278_v25, %v330_v21  ;;  %v342_v34 = vmul.f32 %v1280_v26, %v326_v13  ;;  %v365_v36 = vrot.slane %v1268_v20, %v364_v28 }
  0x39   : > { %v348_v35 = vmul.f32 %v1282_v27, %v332_v22  ;;  %v355_v37 = vmul.f32 %v354_v29, %v330_v21  ;;  %v375_v44 = vsub.s32 6, %v1251_v11  ;;  %v380_v45 = vsub.s32 7, %v1251_v11 }
  0x3a   : > { %v360_v38 = vmul.f32 %v359_v30, %v326_v13  ;;  %v343_v42 = vadd.f32 %v342_v34, %v337_v33  ;;  %v366_v43 = vmul.f32 %v365_v36, %v332_v22  ;;  %v1307_v47 = vrot.slane %v1301_v41, %v1275_v23 }
  0x3b   : > { %v1310_v48 = vrot.slane %v319_v12, %v1275_v23  ;;  %v1312_v49 = vrot.slane %v319_v12, %v358_v24  ;;  %v1321_v51 = vrot.slane %v319_v12, %v375_v44  ;;  %v1325_v52 = vrot.slane %v319_v12, %v380_v45 }
  0x3c   : > { %v361_v46 = vadd.f32 %v360_v38, %v355_v37  ;;  %v349_v50 = vadd.f32 %v348_v35, %v343_v42  ;;  %v1327_v53 = vrot.slane %v319_v12, %v364_v28  ;;  %v388_v55 = vmul.f32 %v1307_v47, %v372_v40 }
  0x3d   : > { %v416_v57 = vmul.f32 %v370_v39, %v1278_v25  ;;  %v417_v58 = vmul.f32 %v1263_v16, %v1280_v26  ;;  %v377_v59 = vmul.f32 %v1321_v51, %v370_v39  ;;  %v382_v60 = vmul.f32 %v1263_v16, %v1325_v52 }
  0x3e   : > { %v367_v54 = vadd.f32 %v366_v43, %v361_v46  ;;  %v419_v61 = vmul.f32 %v372_v40, %v1282_v27  ;;  %v429_v62 = vmul.f32 %v1310_v48, %v330_v21  ;;  %v434_v1 = vmul.f32 %v1312_v49, %v326_v13 }
  0x3f   : > { %v418_v0 = vadd.f32 %v417_v58, %v416_v57  ;;  %v440_v2 = vmul.f32 %v1327_v53, %v332_v22  ;;  %v383_v3 = vadd.f32 %v382_v60, %v377_v59  ;;  %v448_v6 = vmul.f32 %v929_v56, %v1325_v52  ;;  %v1381_v59 = vld [vmem:[%s1257_s24 + $0x20] sm:$0xff] }
  0x40   : > { %v368_v63 = vadd.f32 %v367_v54, %v349_v50  ;;  %v435_v8 = vadd.f32 %v434_v1, %v429_v62  ;;  %v474_v9 = vmul.f32 %v929_v56, %v1280_v26  ;;  %v482_v10 = vmul.f32 %v1310_v48, %v370_v39 }
  0x41   : > { %v420_v7 = vadd.f32 %v419_v61, %v418_v0  ;;  %v389_v12 = vadd.f32 %v388_v55, %v383_v3  ;;  %v444_v13 = vsel %vm324_vm0, 0.0, %v443_v4  ;;  %v446_v14 = vsel %vm325_vm1, 0.0, %v445_v5 }
  0x42   : > { %v483_v17 = vmul.f32 %v1263_v16, %v1312_v49  ;;  %v441_v19 = vadd.f32 %v440_v2, %v435_v8  ;;  %v447_v21 = vmul.f32 %v444_v13, %v1321_v51  ;;  %v450_v22 = vmul.f32 %v446_v14, %v1307_v47 }
  0x43   : > { %v473_v24 = vmul.f32 %v444_v13, %v1278_v25  ;;  %v390_v28 = vadd.f32 %v389_v12, %v368_v63  ;;  %v476_v29 = vmul.f32 %v446_v14, %v1282_v27  ;;  %v485_v31 = vmul.f32 %v1327_v53, %v372_v40 }
  0x44   : > { %v484_v30 = vadd.f32 %v483_v17, %v482_v10  ;;  %v442_v32 = vadd.f32 %v441_v19, %v420_v7  ;;  %v449_v33 = vadd.f32 %v448_v6, %v447_v21  ;;  %v488_v16 = vrot.slane %v1353_v15, 7 }
  0x45   : > { %v475_v34 = vadd.f32 %v474_v9, %v473_v24  ;;  %v1366_v35 = vadd.f32 %v1357_v18, %v390_v28  ;;  %v490_v37 = vrot.slane %v1353_v15, 1  ;;  %v493_v38 = vmul.f32 %v1353_v15, %v1325_v52 }
  0x46   : > { %v486_v36 = vadd.f32 %v485_v31, %v484_v30  ;;  %v451_v39 = vadd.f32 %v450_v22, %v449_v33  ;;  %v489_v40 = vsel %vm324_vm0, 0.0, %v488_v16  ;;  %v519_v43 = vmul.f32 %v1353_v15, %v1280_v26  ;;  %v1412_v16 = vld [vmem:[%s1257_s24 + $0x28] sm:$0xff] }
  0x47   : > { %v477_v42 = vadd.f32 %v476_v29, %v475_v34  ;;  %v399_v46 = vmul.f32 0.044715, %v1366_v35  ;;  %v491_v50 = vsel %vm325_vm1, 0.0, %v490_v37  ;;  %v492_v54 = vmul.f32 %v489_v40, %v1321_v51 }
  0x48   : > { %v452_v55 = vadd.f32 %v451_v39, %v442_v32  ;;  %v495_v58 = vmul.f32 %v491_v50, %v1307_v47  ;;  %v518_v60 = vmul.f32 %v489_v40, %v1278_v25  ;;  %v521_v63 = vmul.f32 %v491_v50, %v1282_v27 }
  0x49   : > { %v487_v57 = vadd.f32 %v486_v36, %v477_v42  ;;  %v400_v61 = vmul.f32 %v399_v46, %v1366_v35  ;;  %v494_v62 = vadd.f32 %v493_v38, %v492_v54  ;;  %v527_v0 = vmul.f32 %v444_v13, %v1310_v48 }
  0x4a   : > { %v1388_v1 = vadd.f32 %v1357_v18, %v452_v55  ;;  %v520_v2 = vadd.f32 %v519_v43, %v518_v60  ;;  %v528_v3 = vmul.f32 %v929_v56, %v1312_v49  ;;  %v530_v4 = vmul.f32 %v446_v14, %v1327_v53 }
  0x4b   : > { %v401_v5 = vmul.f32 %v400_v61, %v1366_v35  ;;  %v496_v6 = vadd.f32 %v495_v58, %v494_v62  ;;  %v533_v7 = vrot.slane %v1381_v59, 7  ;;  %v535_v8 = vrot.slane %v1381_v59, 1 }
  0x4c   : > { %v455_v9 = vmul.f32 0.044715, %v1388_v1  ;;  %v522_v10 = vadd.f32 %v521_v63, %v520_v2  ;;  %v529_v12 = vadd.f32 %v528_v3, %v527_v0  ;;  %v538_v24 = vmul.f32 %v1381_v59, %v1325_v52 }
  0x4d   : > { %v402_v13 = vadd.f32 %v401_v5, %v1366_v35  ;;  %v497_v17 = vadd.f32 %v496_v6, %v487_v57  ;;  %v534_v56 = vsel %vm324_vm0, 0.0, %v533_v7  ;;  %v536_v14 = vsel %vm325_vm1, 0.0, %v535_v8 }
  0x4e   : > { %v456_v19 = vmul.f32 %v455_v9, %v1388_v1  ;;  %v531_v21 = vadd.f32 %v530_v4, %v529_v12  ;;  %v537_v22 = vmul.f32 %v534_v56, %v1321_v51  ;;  %v540_v30 = vmul.f32 %v536_v14, %v1307_v47 }
  0x4f   : > { %v403_v28 = vmul.f32 0.7978846, %v402_v13  ;;  %v1406_v29 = vadd.f32 %v1357_v18, %v497_v17  ;;  %v563_v31 = vmul.f32 %v534_v56, %v1278_v25  ;;  %v564_v36 = vmul.f32 %v1381_v59, %v1280_v26  ;;  %v1443_v13 = vld [vmem:[%s1257_s24 + $0x30] sm:$0xff] }
  0x50   : > { %v457_v32 = vmul.f32 %v456_v19, %v1388_v1  ;;  %v532_v33 = vadd.f32 %v531_v21, %v522_v10  ;;  %v539_v34 = vadd.f32 %v538_v24, %v537_v22  ;;  %v566_v38 = vmul.f32 %v536_v14, %v1282_v27 }
  0x51   : > { %1031 = vtanh.f32 %v403_v28  ;;  %v500_v37 = vmul.f32 0.044715, %v1406_v29  ;;  %v565_v43 = vadd.f32 %v564_v36, %v563_v31  ;;  %v572_v46 = vmul.f32 %v489_v40, %v1310_v48 }
  0x52   : > { %v458_v39 = vadd.f32 %v457_v32, %v1388_v1  ;;  %v541_v42 = vadd.f32 %v540_v30, %v539_v34  ;;  %v573_v55 = vmul.f32 %v1353_v15, %v1312_v49  ;;  %v575_v57 = vmul.f32 %v491_v50, %v1327_v53 }
  0x53   : > { %v501_v54 = vmul.f32 %v500_v37, %v1406_v29  ;;  %v578_v58 = vrot.slane %v1412_v16, 7  ;;  %v567_v62 = vadd.f32 %v566_v38, %v565_v43  ;;  %v580_v63 = vrot.slane %v1412_v16, 1 }
  0x54   : > { %v459_v60 = vmul.f32 0.7978846, %v458_v39  ;;  %v542_v61 = vadd.f32 %v541_v42, %v532_v33  ;;  %v574_v2 = vadd.f32 %v573_v55, %v572_v46  ;;  %v583_v3 = vmul.f32 %v1412_v16, %v1325_v52 }
  0x55   : > { %v502_v0 = vmul.f32 %v501_v54, %v1406_v29  ;;  %v579_v40 = vsel %vm324_vm0, 0.0, %v578_v58  ;;  %v581_v50 = vsel %vm325_vm1, 0.0, %v580_v63  ;;  %v398_v9 = vmul.f32 0.5, %v1366_v35 }
  0x56   : > { %1033 = vtanh.f32 %v459_v60  ;;  %v1432_v15 = vadd.f32 %v1357_v18, %v542_v61  ;;  %v582_v4 = vmul.f32 %v579_v40, %v1321_v51  ;;  %v576_v6 = vadd.f32 %v575_v57, %v574_v2 }
  0x57   : > { %v503_v5 = vadd.f32 %v502_v0, %v1406_v29  ;;  %v585_v7 = vmul.f32 %v581_v50, %v1307_v47  ;;  %v608_v8 = vmul.f32 %v579_v40, %v1278_v25  ;;  %v609_v17 = vmul.f32 %v1412_v16, %v1280_v26 }
  0x58   : > { %v545_v10 = vmul.f32 0.044715, %v1432_v15  ;;  %v584_v12 = vadd.f32 %v583_v3, %v582_v4  ;;  %v577_v21 = vadd.f32 %v576_v6, %v567_v62  ;;  %v611_v22 = vmul.f32 %v581_v50, %v1282_v27  ;;  %v949_v4 = vld [vmem:[%s1257_s24 + $0x38] sm:$0xff] }
  0x59   : > { %v504_v19 = vmul.f32 0.7978846, %v503_v5  ;;  %v617_v24 = vmul.f32 %v534_v56, %v1310_v48  ;;  %v610_v31 = vadd.f32 %v609_v17, %v608_v8  ;;  %v618_v35 = vmul.f32 %v1381_v59, %v1312_v49 }
  0x5a   : > { %v546_v28 = vmul.f32 %v545_v10, %v1432_v15  ;;  %v586_v30 = vadd.f32 %v585_v7, %v584_v12  ;;  %v620_v32 = vmul.f32 %v536_v14, %v1327_v53  ;;  %v623_v33 = vrot.slane %v1443_v13, 7 }
  0x5b   : > { %1035 = vtanh.f32 %v504_v19  ;;  %v625_v34 = vrot.slane %v1443_v13, 1  ;;  %v612_v38 = vadd.f32 %v611_v22, %v610_v31  ;;  %v619_v39 = vadd.f32 %v618_v35, %v617_v24 }
  0x5c   : > { %v547_v36 = vmul.f32 %v546_v28, %v1432_v15  ;;  %v587_v37 = vadd.f32 %v586_v30, %v577_v21  ;;  %v624_v56 = vsel %vm324_vm0, 0.0, %v623_v33  ;;  %v628_v59 = vmul.f32 %v1443_v13, %v1325_v52 }
  0x5d   : > { %v626_v42 = vsel %vm325_vm1, 0.0, %v625_v34  ;;  %v654_v14 = vmul.f32 %v1443_v13, %v1280_v26  ;;  %v621_v55 = vadd.f32 %v620_v32, %v619_v39  ;;  %v627_v57 = vmul.f32 %v624_v56, %v1321_v51 }
  0x5e   : > { %v1032_v43 = vpop.eup %1031  ;;  %v548_v46 = vadd.f32 %v547_v36, %v1432_v15  ;;  %v1466_v54 = vadd.f32 %v1357_v18, %v587_v37  ;;  %v630_v60 = vmul.f32 %v626_v42, %v1307_v47  ;;  %v653_v61 = vmul.f32 %v624_v56, %v1278_v25 }
  0x5f   : > { %v405_v58 = vadd.f32 1.0, %v1032_v43  ;;  %v656_v62 = vmul.f32 %v626_v42, %v1282_v27  ;;  %v454_v63 = vmul.f32 0.5, %v1388_v1  ;;  %v622_v3 = vadd.f32 %v621_v55, %v612_v38 }
  0x60   : > { %v549_v0 = vmul.f32 0.7978846, %v548_v46  ;;  %v590_v2 = vmul.f32 0.044715, %v1466_v54  ;;  %v629_v6 = vadd.f32 %v628_v59, %v627_v57  ;;  %v655_v7 = vadd.f32 %v654_v14, %v653_v61 }
  0x61   : > { %v406_v5 = vmul.f32 %v405_v58, %v398_v9  ;;  %v662_v8 = vmul.f32 %v579_v40, %v1310_v48  ;;  %v663_v12 = vmul.f32 %v1412_v16, %v1312_v49  ;;  %v665_v17 = vmul.f32 %v581_v50, %v1327_v53 }
  0x62   : > { %1037 = vtanh.f32 %v549_v0  ;;  %v591_v10 = vmul.f32 %v590_v2, %v1466_v54  ;;  %v631_v1 = vadd.f32 %v630_v60, %v629_v6  ;;  %v657_v21 = vadd.f32 %v656_v62, %v655_v7 }
  0x63   : > { %v1034_v19 = vpop.eup %1033  ;;  %407 = vst [vmem:[%s1481_s30] sm:$0xff] %v406_v5  ;;  %v668_v9 = vrot.slane %v949_v4, 7  ;;  %v670_v22 = vrot.slane %v949_v4, 1  ;;  %v664_v28 = vadd.f32 %v663_v12, %v662_v8  ;;  %v673_v30 = vmul.f32 %v949_v4, %v1325_v52 }
  0x64   : > { %v461_v24 = vadd.f32 1.0, %v1034_v19  ;;  %v592_v40 = vmul.f32 %v591_v10, %v1466_v54  ;;  %v632_v31 = vadd.f32 %v631_v1, %v622_v3  ;;  %v697_v35 = vmul.f32 %v949_v4, %v1280_v26 }
  0x65   : > { %v669_v16 = vsel %vm324_vm0, 0.0, %v668_v9  ;;  %v671_v50 = vsel %vm325_vm1, 0.0, %v670_v22  ;;  %v666_v34 = vadd.f32 %v665_v17, %v664_v28  ;;  %v499_v37 = vmul.f32 0.5, %v1406_v29 }
  0x66   : > { %v462_v32 = vmul.f32 %v461_v24, %v454_v63  ;;  %v593_v33 = vadd.f32 %v592_v40, %v1466_v54  ;;  %v672_v36 = vmul.f32 %v669_v16, %v1321_v51  ;;  %v633_v38 = vadd.f32 %v1357_v18, %v632_v31 }
  0x67   : > { %v675_v52 = vmul.f32 %v671_v50, %v1307_v47  ;;  %v696_v39 = vmul.f32 %v669_v16, %v1278_v25  ;;  %v667_v43 = vadd.f32 %v666_v34, %v657_v21  ;;  %v705_v26 = vmul.f32 %v624_v56, %v1310_v48 }
  0x68   : > { %v1036_v59 = vpop.eup %1035  ;;  %930 = vst [vmem:[%s1481_s30 + $0x8] sm:$0xff] %v462_v32  ;;  %v594_v14 = vmul.f32 0.7978846, %v593_v33  ;;  %v674_v46 = vadd.f32 %v673_v30, %v672_v36  ;;  %v635_v57 = vmul.f32 0.044715, %v633_v38  ;;  %v699_v51 = vmul.f32 %v671_v50, %v1282_v27 }
  0x69   : > { %v506_v55 = vadd.f32 1.0, %v1036_v59  ;;  %v698_v58 = vadd.f32 %v697_v35, %v696_v39  ;;  %v706_v47 = vmul.f32 %v1443_v13, %v1312_v49  ;;  %v708_v25 = vmul.f32 %v626_v42, %v1327_v53 }
  0x6a   : > { %1039 = vtanh.f32 %v594_v14  ;;  %v676_v29 = vadd.f32 %v675_v52, %v674_v46  ;;  %v636_v61 = vmul.f32 %v635_v57, %v633_v38  ;;  %v711_v62 = vmul.f32 0.0, %v1301_v41 }
  0x6b   : > { %v507_v60 = vmul.f32 %v506_v55, %v499_v37  ;;  %v707_v0 = vadd.f32 %v706_v47, %v705_v26  ;;  %v715_v48 = vrot.slane %v1268_v20, %v375_v44  ;;  %v720_v27 = vrot.slane %v1268_v20, %v380_v45 }
  0x6c   : > { %v677_v63 = vadd.f32 %v676_v29, %v667_v43  ;;  %v544_v56 = vmul.f32 0.5, %v1432_v15  ;;  %v637_v49 = vmul.f32 %v636_v61, %v633_v38  ;;  %v700_v13 = vadd.f32 %v699_v51, %v698_v58 }
  0x6d   : > { %934 = vst [vmem:[%s1481_s30 + $0x10] sm:$0xff] %v507_v60  ;;  %v726_v53 = vrot.slane %v711_v62, %v1275_v23  ;;  %v709_v41 = vadd.f32 %v708_v25, %v707_v0  ;;  %v716_v2 = vmul.f32 %v715_v48, %v669_v16  ;;  %v721_v3 = vmul.f32 %v949_v4, %v720_v27 }
  0x6e   : > { %v678_v42 = vadd.f32 %v1357_v18, %v677_v63  ;;  %v638_v6 = vadd.f32 %v637_v49, %v633_v38  ;;  %v589_v19 = vmul.f32 0.5, %v1466_v54  ;;  %v634_v31 = vmul.f32 0.5, %v633_v38  ;;  %v795_v38 = vld [vmem:[%s1481_s30] sm:$0xff] (%p1220_p10) }
  0x6f   : > { %v1038_v5 = vpop.eup %1037  ;;  %v727_v44 = vmul.f32 %v726_v53, %v671_v50  ;;  %v710_v20 = vadd.f32 %v709_v41, %v700_v13  ;;  %v722_v45 = vadd.f32 %v721_v3, %v716_v2  ;;  %v797_v14 = vld [vmem:[%s1481_s30 + $0x8] sm:$0xff] (%p1220_p10)  ;;  %796 = vst [vmem:[%s752_s4] sm:$0xff] (%p1220_p10), %v795_v38 }
  0x70   : > { %v551_v7 = vadd.f32 1.0, %v1038_v5  ;;  %v680_v11 = vmul.f32 0.044715, %v678_v42  ;;  %v639_v8 = vmul.f32 0.7978846, %v638_v6  ;;  %798 = vst [vmem:[%s752_s4 + $0x10] sm:$0xff] (%p1220_p10), %v797_v14 }
  0x71   : > { %v728_v12 = vadd.f32 %v727_v44, %v722_v45 }
  0x72   : > { %v552_v10 = vmul.f32 %v551_v7, %v544_v56  ;;  %v681_v15 = vmul.f32 %v680_v11, %v678_v42  ;;  %1041 = vtanh.f32 %v639_v8 }
  0x73   : > { %v729_v17 = vadd.f32 %v728_v12, %v710_v20 }
  0x74   : > { %938 = vst [vmem:[%s1481_s30 + $0x18] sm:$0xff] %v552_v10  ;;  %v682_v23 = vmul.f32 %v681_v15, %v678_v42  ;;  %v799_v43 = vld [vmem:[%s1481_s30 + $0x10] sm:$0xff] (%p1220_p10) }
  0x75   : > { %v730_v21 = vadd.f32 %v1357_v18, %v729_v17  ;;  %v679_v18 = vmul.f32 0.5, %v678_v42  ;;  %800 = vst [vmem:[%s752_s4 + $0x20] sm:$0xff] (%p1220_p10), %v799_v43 }
  0x76   : > { %v683_v1 = vadd.f32 %v682_v23, %v678_v42 }
  0x77   : > { %v1040_v4 = vpop.eup %1039  ;;  %v732_v24 = vmul.f32 0.044715, %v730_v21  ;;  %v731_v37 = vmul.f32 0.5, %v730_v21 }
  0x78   : > { %v596_v9 = vadd.f32 1.0, %v1040_v4  ;;  %v684_v22 = vmul.f32 0.7978846, %v683_v1 }
  0x79   : > { %v733_v28 = vmul.f32 %v732_v24, %v730_v21 }
  0x7a   : > { %v597_v40 = vmul.f32 %v596_v9, %v589_v19  ;;  %1043 = vtanh.f32 %v684_v22 }
  0x7b   : > { %v734_v30 = vmul.f32 %v733_v28, %v730_v21  ;;  %v801_v46 = vld [vmem:[%s1481_s30 + $0x18] sm:$0xff] (%p1220_p10) }
  0x7c   : > { %942 = vst [vmem:[%s1481_s30 + $0x20] sm:$0xff] %v597_v40  ;;  %802 = vst [vmem:[%s752_s4 + $0x30] sm:$0xff] (%p1220_p10), %v801_v46 }
  0x7d   : > { %v735_v16 = vadd.f32 %v734_v30, %v730_v21 }
  0x7f   : > { %v1042_v50 = vpop.eup %1041  ;;  %v736_v54 = vmul.f32 0.7978846, %v735_v16 }
  0x80   : > { %v641_v35 = vadd.f32 1.0, %v1042_v50 }
  0x81   : > { %1045 = vtanh.f32 %v736_v54 }
  0x82   : > { %v642_v32 = vmul.f32 %v641_v35, %v634_v31 }
  0x83   : > { %v803_v26 = vld [vmem:[%s1481_s30 + $0x20] sm:$0xff] (%p1220_p10) }
  0x84   : > { %946 = vst [vmem:[%s1481_s30 + $0x28] sm:$0xff] %v642_v32  ;;  %804 = vst [vmem:[%s752_s4 + $0x40] sm:$0xff] (%p1220_p10), %v803_v26 }
  0x87   : > { %v1044_v33 = vpop.eup %1043 }
  0x88   : > { %v686_v34 = vadd.f32 1.0, %v1044_v33 }
  0x8a   : > { %v687_v36 = vmul.f32 %v686_v34, %v679_v18 }
  0x8b   : > { %v805_v55 = vld [vmem:[%s1481_s30 + $0x28] sm:$0xff] (%p1220_p10) }
  0x8c   : > { %950 = vst [vmem:[%s1481_s30 + $0x30] sm:$0xff] %v687_v36  ;;  %806 = vst [vmem:[%s752_s4 + $0x50] sm:$0xff] (%p1220_p10), %v805_v55 }
  0x8e   : > { %v1046_v52 = vpop.eup %1045 }
  0x8f   : > { %v738_v39 = vadd.f32 1.0, %v1046_v52  ;;  %748 = sbr.rel (!%p1220_p10) target bundleno = 156 (0x9c), region = 112 }
  0x91   : > { %v739_v59 = vmul.f32 %v738_v39, %v731_v37 }
  0x93   : > { %953 = vst [vmem:[%s1481_s30 + $0x38] sm:$0xff] %v739_v59  ;;  %v807_v57 = vld [vmem:[%s1481_s30 + $0x30] sm:$0xff] (%p1220_p10) }
  0x94   : > { %808 = vst [vmem:[%s752_s4 + $0x60] sm:$0xff] %v807_v57 }
  0x9a   : > { %v809_v58 = vld [vmem:[%s1481_s30 + $0x38] sm:$0xff] }
  0x9b   : > { %810 = vst [vmem:[%s752_s4 + $0x70] sm:$0xff] %v809_v58 }
  0x9c PF: > { %s13_s20 = sadd.s32 1, %s1117_s20   ;;  %s1570_s12 = smov %s1089_s13 }
  0x9d   : > { %p10_p2 = scmp.ge.s32.totalorder %s13_s20, 6   ;;  %s1571_s13 = smov %s1207_s28 }
  0x9e   : > { %s1572_s14 = smov %s1097_s15  ;;  %s1573_s15 = smov %s1225_s6 }
  0x9f   : > { %s1574_s16 = smov %s1109_s18  ;;  %s1575_s17 = smov %s1113_s19 }
  0xa0   : > { %s1576_s18 = smov %s1579_s22  ;;  %s1577_s19 = smov %s1583_s23 }
  0xa1   :  { %12 = sbr.rel (!%p10_p2) target bundleno = 5 (0x5), region = 206 }

</bundles_post_ra>
